<compile_context>
chip_gen: v7x
topology: tpu7x:2x2x1
jax: 0.10.0
libtpu: 0.0.40
codegen_flags: <defaults>
</compile_context>

<pallas_src>
import functools

import jax
import jax.numpy as jnp
from jax.experimental import pallas as pl
from jax.experimental.pallas import tpu as pltpu

LANES = 128  # TPU lane width; all channel dims are zero-padded to this.


def _round_up(x, m):
    return (x + m - 1) // m * m


# ---------------------------------------------------------------------------
# Fused whole-network Pallas kernel (one batch element per grid step)
# ---------------------------------------------------------------------------
def _fused_resnet_kernel(x_ref, w3_ref, ws_ref, b_ref, out_ref, buf_a, buf_b,
                         *, net, l_in):
    """Whole LambdaResNet forward for one batch element, VMEM resident.

    x_ref   : (l_in, 128) bf16           input (channels zero-padded to 128)
    w3_ref  : (3*n_conv3, 128, 128) bf16 per-tap BN-folded conv weights
    ws_ref  : (n_shortcut, 128, 128) bf16 BN-folded 1x1 shortcut weights
    b_ref   : (n_bias_pad, 128) f32      BN-folded biases
    out_ref : (1, 128) f32               pooled features (lane-dense)
    buf_a/b : (l_buf, 128) f32           ping-pong activation buffers; valid
              rows live at [1, 1+L) with a zero halo (= conv zero padding).
    """
    f32 = jnp.float32
    bf16 = jnp.bfloat16

    def bias_row(idx):
        return b_ref[pl.ds(idx, 1), :].astype(f32)           # (1, 128)

    def conv3(src_ref, l_out, stride, w_idx, b_idx, relu, residual=None):
        # out[l] = sum_k src[stride*l + k] @ W_k   (+ bias [+ residual]) [relu]
        acc = None
        for k in range(3):
            if stride == 1:
                tap = src_ref[pl.ds(k, l_out), :]
            else:
                tap = src_ref[pl.ds(k, l_out, stride=stride), :]
            w_k = w3_ref[3 * w_idx + k]                        # (128, 128) bf16
            part = jnp.dot(tap.astype(bf16), w_k,
                           preferred_element_type=f32)
            acc = part if acc is None else acc + part
        y = acc + bias_row(b_idx)
        if residual is not None:
            y = y + residual
        if relu:
            y = jnp.maximum(y, 0.0)
        return y                                               # (l_out, 128) f32

    def store_stage(dst_ref, val, l):
        # Zero the halo / any stale rows, then place valid rows at [1, 1+l).
        dst_ref[...] = jnp.zeros(dst_ref.shape, dst_ref.dtype)
        dst_ref[pl.ds(1, l), :] = val.astype(dst_ref.dtype)

    # ---- stem: conv(k=3, s=1, p=0) + folded BN + ReLU ----------------------
    l = l_in - 2
    stem = conv3(x_ref, l, 1, net["stem_w"], net["stem_b"], relu=True)
    store_stage(buf_a, stem, l)

    # ---- MaxPool1d(k=3, s=2, p=1).  Inputs are post-ReLU (>= 0), so the zero
    # ---- halo is equivalent to PyTorch's -inf padding. ---------------------
    l_out = (l - 1) // 2 + 1
    p0 = buf_a[pl.ds(0, l_out, stride=2), :]
    p1 = buf_a[pl.ds(1, l_out, stride=2), :]
    p2 = buf_a[pl.ds(2, l_out, stride=2), :]
    store_stage(buf_b, jnp.maximum(jnp.maximum(p0, p1), p2), l_out)
    l = l_out

    # ---- residual blocks (statically unrolled) -----------------------------
    for blk in net["blocks"]:
        s = blk["stride"]
        l_out = l if s == 1 else (l - 1) // 2 + 1
        # shortcut branch (1x1 conv + folded BN, or identity)
        if blk["ws"] is not None:
            if s == 1:
                sc_in = buf_b[pl.ds(1, l_out), :]
            else:
                sc_in = buf_b[pl.ds(1, l_out, stride=s), :]
            sc = jnp.dot(sc_in.astype(bf16), ws_ref[blk["ws"]],
                         preferred_element_type=f32) + bias_row(blk["bs"])
        else:
            sc = buf_b[pl.ds(1, l_out), :].astype(f32)
        # conv1 (k=3, p=1, stride=s) + BN + ReLU
        c1 = conv3(buf_b, l_out, s, blk["w1"], blk["b1"], relu=True)
        store_stage(buf_a, c1, l_out)
        # conv2 (k=3, p=1, s=1) + BN, residual add + ReLU fused in the epilogue
        c2 = conv3(buf_a, l_out, 1, blk["w2"], blk["b2"],
                   relu=True, residual=sc)
        store_stage(buf_b, c2, l_out)
        l = l_out

    # ---- AdaptiveAvgPool1d(1) + flatten ------------------------------------
    v = buf_b[pl.ds(1, l), :].astype(f32)
    out_ref[...] = (jnp.sum(v, axis=0, keepdims=True) * (1.0 / l)).astype(
        out_ref.dtype)


# ---------------------------------------------------------------------------
# Parameter folding / packing (BN into weights, channels padded to 128 lanes)
# ---------------------------------------------------------------------------
def _fold_conv_taps(w, scale):
    """(Cout, Cin, K) PyTorch conv weight * BN scale -> (K, 128, 128) bf16."""
    cout, cin, ksize = w.shape
    assert cout <= LANES and cin <= LANES, "channel widths must be <= 128"
    wf = w * scale[:, None, None]
    wt = jnp.transpose(wf, (2, 1, 0))                    # (K, Cin, Cout)
    wt = jnp.pad(wt, ((0, 0), (0, LANES - cin), (0, LANES - cout)))
    return wt.astype(jnp.bfloat16)


def _pad_bias(b):
    return jnp.pad(b, (0, LANES - b.shape[0])).astype(jnp.float32)


def pack_params(params):
    """Fold BN into weights, pad channels, stack everything into three dense
    arrays plus a static plan consumed by the fused kernel."""
    w3_chunks, ws_chunks, b_rows = [], [], []

    def add_conv3(w, scale, bias):
        w_idx = len(w3_chunks)
        w3_chunks.append(_fold_conv_taps(w, scale))
        b_idx = len(b_rows)
        b_rows.append(_pad_bias(bias))
        return w_idx, b_idx

    stem_w, stem_b = add_conv3(params["conv1_w"], params["bn1_scale"],
                               params["bn1_bias"])
    blocks = []
    for name in ("layer1", "layer2", "layer3", "layer4"):
        for bp in params[name]:
            w1, b1 = add_conv3(bp["conv1_w"], bp["bn1_scale"], bp["bn1_bias"])
            w2, b2 = add_conv3(bp["conv2_w"], bp["bn2_scale"], bp["bn2_bias"])
            if bp["shortcut"] is not None:
                ws_idx = len(ws_chunks)
                ws_chunks.append(
                    _fold_conv_taps(bp["shortcut"]["w"],
                                    bp["shortcut"]["scale"])[0])
                bs_idx = len(b_rows)
                b_rows.append(_pad_bias(bp["shortcut"]["bias"]))
            else:
                ws_idx, bs_idx = None, None
            blocks.append(dict(stride=bp["stride"], w1=w1, b1=b1, w2=w2, b2=b2,
                               ws=ws_idx, bs=bs_idx))

    w3 = jnp.concatenate(w3_chunks, axis=0)              # (3*n, 128, 128) bf16
    ws = (jnp.stack(ws_chunks) if ws_chunks
          else jnp.zeros((1, LANES, LANES), jnp.bfloat16))
    nb = len(b_rows)
    bias = jnp.stack(b_rows)
    bias = jnp.pad(bias, ((0, _round_up(nb, 8) - nb), (0, 0)))

    out_dim = params["layer4"][-1]["conv2_w"].shape[0]
    net = dict(stem_w=stem_w, stem_b=stem_b, blocks=tuple(blocks),
               out_dim=out_dim)
    return dict(arrays=dict(w3=w3, ws=ws, bias=bias), net=net)


# ---------------------------------------------------------------------------
# Forward wrapper
# ---------------------------------------------------------------------------
def make_forward(packed):
    w3 = packed["arrays"]["w3"]
    ws = packed["arrays"]["ws"]
    bias = packed["arrays"]["bias"]
    net = packed["net"]

    def forward(x):
        # x: (B, C, L)  (or (B, 1, C, L), squeezed like the PyTorch forward)
        if x.ndim > 3 and x.shape[1] == 1:
            x = jnp.squeeze(x, axis=1)
        batch, cin, l_in = x.shape
        assert l_in >= 3 and cin <= LANES
        # NCL -> NLC, pad channels to 128 lanes, cast to bf16 for the MXU.
        xn = jnp.transpose(x, (0, 2, 1))
        xn = jnp.pad(xn, ((0, 0), (0, 0), (0, LANES - cin))).astype(jnp.bfloat16)

        l_buf = _round_up(l_in + 2, 8)
        kernel = functools.partial(_fused_resnet_kernel, net=net, l_in=l_in)

        out = pl.pallas_call(
            kernel,
            out_shape=jax.ShapeDtypeStruct((batch, 1, LANES), jnp.float32),
            grid=(batch,),
            in_specs=[
                pl.BlockSpec((None, l_in, LANES), lambda b: (b, 0, 0)),
                pl.BlockSpec(w3.shape, lambda b: (0, 0, 0)),
                pl.BlockSpec(ws.shape, lambda b: (0, 0, 0)),
                pl.BlockSpec(bias.shape, lambda b: (0, 0)),
            ],
            out_specs=pl.BlockSpec((None, 1, LANES), lambda b: (b, 0, 0)),
            scratch_shapes=[
                pltpu.VMEM((l_buf, LANES), jnp.float32),
                pltpu.VMEM((l_buf, LANES), jnp.float32),
            ],
            compiler_params=pltpu.CompilerParams(
                dimension_semantics=("parallel",),
                vmem_limit_bytes=32 * 1024 * 1024,
            ),
        )(xn, w3, ws, bias)
        return out[:, 0, :net["out_dim"]]

    return forward


# ---------------------------------------------------------------------------
# Model parameter init (inference-mode BN already folded to scale/bias)
# ---------------------------------------------------------------------------
def _conv_w(key, cout, cin, ksize):
    return 0.1 * jax.random.normal(key, (cout, cin, ksize), jnp.float32)


def _bn_fold(key, c, eps=1e-5):
    k1, k2 = jax.random.split(key)
    gamma = 1.0 + 0.1 * jax.random.normal(k1, (c,), jnp.float32)
    beta = 0.1 * jax.random.normal(k2, (c,), jnp.float32)
    running_mean = jnp.zeros((c,), jnp.float32)
    running_var = jnp.ones((c,), jnp.float32)
    scale = gamma / jnp.sqrt(running_var + eps)
    bias = beta - running_mean * scale
    return scale, bias


def _make_block_params(key, in_planes, planes, stride):
    keys = jax.random.split(key, 6)
    p = {"stride": stride}
    p["conv1_w"] = _conv_w(keys[0], planes, in_planes, 3)
    p["bn1_scale"], p["bn1_bias"] = _bn_fold(keys[1], planes)
    p["conv2_w"] = _conv_w(keys[2], planes, planes, 3)
    p["bn2_scale"], p["bn2_bias"] = _bn_fold(keys[3], planes)
    if stride != 1 or in_planes != planes:
        sw = _conv_w(keys[4], planes, in_planes, 1)
        ss, sb = _bn_fold(keys[5], planes)
        p["shortcut"] = {"w": sw, "scale": ss, "bias": sb}
    else:
        p["shortcut"] = None
    return p


def init_lambda_resnet(key, in_channels, num_blocks, k=1):
    params = {}
    keys = jax.random.split(key, 6)
    params["conv1_w"] = _conv_w(keys[0], 16, in_channels, 3)
    params["bn1_scale"], params["bn1_bias"] = _bn_fold(keys[1], 16)
    in_planes = 16
    planes_list = [int(24 * k), int(36 * k), int(48 * k), int(60 * k)]
    stride_list = [1, 2, 2, 2]
    for li, (planes, nb, s0) in enumerate(zip(planes_list, num_blocks, stride_list)):
        blk_keys = jax.random.split(keys[2 + li], nb)
        strides = [s0] + [1] * (nb - 1)
        blocks = []
        for bk, s in zip(blk_keys, strides):
            blocks.append(_make_block_params(bk, in_planes, planes, s))
            in_planes = planes  # expansion = 1
        params[f"layer{li + 1}"] = blocks
    return params


# ---------------------------------------------------------------------------
if __name__ == "__main__":
    key = jax.random.PRNGKey(0)
    pkey, xkey = jax.random.split(key)

    in_channels = 4
    num_blocks = (1, 1, 1, 1)
    params = init_lambda_resnet(pkey, in_channels, num_blocks, k=1)
    packed = pack_params(params)

    B, L = 2, 64
    x = jax.random.normal(xkey, (B, in_channels, L), jnp.float32)

    forward = jax.jit(make_forward(packed))
    out = jax.block_until_ready(forward(x))

    assert out.shape == (B, 60), out.shape
    assert bool(jnp.all(jnp.isfinite(out)))
    print("KERNEL_OK")
</pallas_src>

<mosaic_0001>
module attributes {stable_mosaic.version = 11 : i64} {
  func.func @_fused_resnet_kernel(%arg0: i32, %arg1: memref<1x64x128xbf16, #tpu.memory_space<vmem>>, %arg2: memref<27x128x128xbf16, #tpu.memory_space<vmem>>, %arg3: memref<4x128x128xbf16, #tpu.memory_space<vmem>>, %arg4: memref<16x128xf32, #tpu.memory_space<vmem>>, %arg5: memref<1x1x128xf32, #tpu.memory_space<vmem>>, %arg6: memref<72x128xf32, #tpu.memory_space<vmem>>, %arg7: memref<72x128xf32, #tpu.memory_space<vmem>>) attributes {dimension_semantics = [#tpu.dimension_semantics<parallel>], iteration_bounds = array<i64: 2>, scalar_prefetch = 0 : i64, scratch_operands = 2 : i64, tpu.core_type = #tpu.core_type<tc>, window_params = [{transform_indices = @transform_0, window_bounds = array<i64: 1, 64, 128>}, {pipeline_mode = #tpu.pipeline_mode<synchronous>, transform_indices = @transform_1, window_bounds = array<i64: 27, 128, 128>}, {pipeline_mode = #tpu.pipeline_mode<synchronous>, transform_indices = @transform_2, window_bounds = array<i64: 4, 128, 128>}, {pipeline_mode = #tpu.pipeline_mode<synchronous>, transform_indices = @transform_3, window_bounds = array<i64: 16, 128>}, {transform_indices = @transform_4, window_bounds = array<i64: 1, 1, 128>}]} {
    %c0 = arith.constant 0 : index
    %c0_0 = arith.constant 0 : index
    %c0_1 = arith.constant 0 : index
    %0 = vector.load %arg1[%c0, %c0_0, %c0_1] : memref<1x64x128xbf16, #tpu.memory_space<vmem>>, vector<1x62x128xbf16>
    %1 = vector.shape_cast %0 : vector<1x62x128xbf16> to vector<62x128xbf16>
    %c0_2 = arith.constant 0 : index
    %c0_3 = arith.constant 0 : index
    %c0_4 = arith.constant 0 : index
    %2 = vector.load %arg2[%c0_2, %c0_3, %c0_4] : memref<27x128x128xbf16, #tpu.memory_space<vmem>>, vector<1x128x128xbf16>
    %3 = vector.shape_cast %2 : vector<1x128x128xbf16> to vector<128x128xbf16>
    %cst = arith.constant dense<0.000000e+00> : vector<62x128xf32>
    %4 = tpu.matmul %1, %3, %cst {dimension_numbers = #tpu.dot_dimension_numbers<[1], [0], [0], [1], [0, 0, 1, 1], [], []>} : vector<62x128xbf16>, vector<128x128xbf16>, vector<62x128xf32> -> vector<62x128xf32>
    %c0_5 = arith.constant 0 : index
    %c1 = arith.constant 1 : index
    %c0_6 = arith.constant 0 : index
    %5 = vector.load %arg1[%c0_5, %c1, %c0_6] : memref<1x64x128xbf16, #tpu.memory_space<vmem>>, vector<1x62x128xbf16>
    %6 = vector.shape_cast %5 : vector<1x62x128xbf16> to vector<62x128xbf16>
    %c1_7 = arith.constant 1 : index
    %c0_8 = arith.constant 0 : index
    %c0_9 = arith.constant 0 : index
    %7 = vector.load %arg2[%c1_7, %c0_8, %c0_9] : memref<27x128x128xbf16, #tpu.memory_space<vmem>>, vector<1x128x128xbf16>
    %8 = vector.shape_cast %7 : vector<1x128x128xbf16> to vector<128x128xbf16>
    %cst_10 = arith.constant dense<0.000000e+00> : vector<62x128xf32>
    %9 = tpu.matmul %6, %8, %cst_10 {dimension_numbers = #tpu.dot_dimension_numbers<[1], [0], [0], [1], [0, 0, 1, 1], [], []>} : vector<62x128xbf16>, vector<128x128xbf16>, vector<62x128xf32> -> vector<62x128xf32>
    %10 = arith.addf %4, %9 : vector<62x128xf32>
    %c0_11 = arith.constant 0 : index
    %c2 = arith.constant 2 : index
    %c0_12 = arith.constant 0 : index
    %11 = vector.load %arg1[%c0_11, %c2, %c0_12] : memref<1x64x128xbf16, #tpu.memory_space<vmem>>, vector<1x62x128xbf16>
    %12 = vector.shape_cast %11 : vector<1x62x128xbf16> to vector<62x128xbf16>
    %c2_13 = arith.constant 2 : index
    %c0_14 = arith.constant 0 : index
    %c0_15 = arith.constant 0 : index
    %13 = vector.load %arg2[%c2_13, %c0_14, %c0_15] : memref<27x128x128xbf16, #tpu.memory_space<vmem>>, vector<1x128x128xbf16>
    %14 = vector.shape_cast %13 : vector<1x128x128xbf16> to vector<128x128xbf16>
    %cst_16 = arith.constant dense<0.000000e+00> : vector<62x128xf32>
    %15 = tpu.matmul %12, %14, %cst_16 {dimension_numbers = #tpu.dot_dimension_numbers<[1], [0], [0], [1], [0, 0, 1, 1], [], []>} : vector<62x128xbf16>, vector<128x128xbf16>, vector<62x128xf32> -> vector<62x128xf32>
    %16 = arith.addf %10, %15 : vector<62x128xf32>
    %c0_17 = arith.constant 0 : index
    %c0_18 = arith.constant 0 : index
    %17 = vector.load %arg4[%c0_17, %c0_18] : memref<16x128xf32, #tpu.memory_space<vmem>>, vector<1x128xf32>
    %18 = vector.broadcast %17 : vector<1x128xf32> to vector<62x128xf32>
    %19 = arith.addf %16, %18 : vector<62x128xf32>
    %cst_19 = arith.constant 0.000000e+00 : f32
    %20 = vector.broadcast %cst_19 : f32 to vector<62x128xf32>
    %21 = arith.maximumf %19, %20 : vector<62x128xf32>
    %cst_20 = arith.constant 0.000000e+00 : f32
    %22 = vector.broadcast %cst_20 : f32 to vector<72x128xf32>
    %c0_21 = arith.constant 0 : index
    %c0_22 = arith.constant 0 : index
    %23 = vector.load %arg6[%c0_21, %c0_22] : memref<72x128xf32, #tpu.memory_space<vmem>>, vector<72x128xf32>
    tpu.vector_store %arg6[%c0_21, %c0_22], %22 {strides = array<i32>} : memref<72x128xf32, #tpu.memory_space<vmem>>, vector<72x128xf32>,
    %c1_23 = arith.constant 1 : index
    %c0_24 = arith.constant 0 : index
    %24 = vector.load %arg6[%c1_23, %c0_24] : memref<72x128xf32, #tpu.memory_space<vmem>>, vector<62x128xf32>
    tpu.vector_store %arg6[%c1_23, %c0_24], %21 {strides = array<i32>} : memref<72x128xf32, #tpu.memory_space<vmem>>, vector<62x128xf32>,
    %c0_25 = arith.constant 0 : index
    %c0_26 = arith.constant 0 : index
    %25 = tpu.strided_load %arg6[%c0_25, %c0_26] {strides = array<i32: 2, 1>} : memref<72x128xf32, #tpu.memory_space<vmem>>, vector<31x128xf32>
    %c1_27 = arith.constant 1 : index
    %c0_28 = arith.constant 0 : index
    %26 = tpu.strided_load %arg6[%c1_27, %c0_28] {strides = array<i32: 2, 1>} : memref<72x128xf32, #tpu.memory_space<vmem>>, vector<31x128xf32>
    %c2_29 = arith.constant 2 : index
    %c0_30 = arith.constant 0 : index
    %27 = tpu.strided_load %arg6[%c2_29, %c0_30] {strides = array<i32: 2, 1>} : memref<72x128xf32, #tpu.memory_space<vmem>>, vector<31x128xf32>
    %28 = arith.maximumf %25, %26 : vector<31x128xf32>
    %29 = arith.maximumf %28, %27 : vector<31x128xf32>
    %cst_31 = arith.constant 0.000000e+00 : f32
    %30 = vector.broadcast %cst_31 : f32 to vector<72x128xf32>
    %c0_32 = arith.constant 0 : index
    %c0_33 = arith.constant 0 : index
    %31 = vector.load %arg7[%c0_32, %c0_33] : memref<72x128xf32, #tpu.memory_space<vmem>>, vector<72x128xf32>
    tpu.vector_store %arg7[%c0_32, %c0_33], %30 {strides = array<i32>} : memref<72x128xf32, #tpu.memory_space<vmem>>, vector<72x128xf32>,
    %c1_34 = arith.constant 1 : index
    %c0_35 = arith.constant 0 : index
    %32 = vector.load %arg7[%c1_34, %c0_35] : memref<72x128xf32, #tpu.memory_space<vmem>>, vector<31x128xf32>
    tpu.vector_store %arg7[%c1_34, %c0_35], %29 {strides = array<i32>} : memref<72x128xf32, #tpu.memory_space<vmem>>, vector<31x128xf32>,
    %c1_36 = arith.constant 1 : index
    %c0_37 = arith.constant 0 : index
    %33 = vector.load %arg7[%c1_36, %c0_37] : memref<72x128xf32, #tpu.memory_space<vmem>>, vector<31x128xf32>
    %34 = arith.truncf %33 : vector<31x128xf32> to vector<31x128xbf16>
    %c0_38 = arith.constant 0 : index
    %c0_39 = arith.constant 0 : index
    %c0_40 = arith.constant 0 : index
    %35 = vector.load %arg3[%c0_38, %c0_39, %c0_40] : memref<4x128x128xbf16, #tpu.memory_space<vmem>>, vector<1x128x128xbf16>
    %36 = vector.shape_cast %35 : vector<1x128x128xbf16> to vector<128x128xbf16>
    %cst_41 = arith.constant dense<0.000000e+00> : vector<31x128xf32>
    %37 = tpu.matmul %34, %36, %cst_41 {dimension_numbers = #tpu.dot_dimension_numbers<[1], [0], [0], [1], [0, 0, 1, 1], [], []>} : vector<31x128xbf16>, vector<128x128xbf16>, vector<31x128xf32> -> vector<31x128xf32>
    %c3 = arith.constant 3 : index
    %c0_42 = arith.constant 0 : index
    %38 = vector.load %arg4[%c3, %c0_42] : memref<16x128xf32, #tpu.memory_space<vmem>>, vector<1x128xf32>
    %39 = vector.broadcast %38 : vector<1x128xf32> to vector<31x128xf32>
    %40 = arith.addf %37, %39 : vector<31x128xf32>
    %c0_43 = arith.constant 0 : index
    %c0_44 = arith.constant 0 : index
    %41 = vector.load %arg7[%c0_43, %c0_44] : memref<72x128xf32, #tpu.memory_space<vmem>>, vector<31x128xf32>
    %c3_45 = arith.constant 3 : index
    %c0_46 = arith.constant 0 : index
    %c0_47 = arith.constant 0 : index
    %42 = vector.load %arg2[%c3_45, %c0_46, %c0_47] : memref<27x128x128xbf16, #tpu.memory_space<vmem>>, vector<1x128x128xbf16>
    %43 = vector.shape_cast %42 : vector<1x128x128xbf16> to vector<128x128xbf16>
    %44 = arith.truncf %41 : vector<31x128xf32> to vector<31x128xbf16>
    %cst_48 = arith.constant dense<0.000000e+00> : vector<31x128xf32>
    %45 = tpu.matmul %44, %43, %cst_48 {dimension_numbers = #tpu.dot_dimension_numbers<[1], [0], [0], [1], [0, 0, 1, 1], [], []>} : vector<31x128xbf16>, vector<128x128xbf16>, vector<31x128xf32> -> vector<31x128xf32>
    %c1_49 = arith.constant 1 : index
    %c0_50 = arith.constant 0 : index
    %46 = vector.load %arg7[%c1_49, %c0_50] : memref<72x128xf32, #tpu.memory_space<vmem>>, vector<31x128xf32>
    %c4 = arith.constant 4 : index
    %c0_51 = arith.constant 0 : index
    %c0_52 = arith.constant 0 : index
    %47 = vector.load %arg2[%c4, %c0_51, %c0_52] : memref<27x128x128xbf16, #tpu.memory_space<vmem>>, vector<1x128x128xbf16>
    %48 = vector.shape_cast %47 : vector<1x128x128xbf16> to vector<128x128xbf16>
    %49 = arith.truncf %46 : vector<31x128xf32> to vector<31x128xbf16>
    %cst_53 = arith.constant dense<0.000000e+00> : vector<31x128xf32>
    %50 = tpu.matmul %49, %48, %cst_53 {dimension_numbers = #tpu.dot_dimension_numbers<[1], [0], [0], [1], [0, 0, 1, 1], [], []>} : vector<31x128xbf16>, vector<128x128xbf16>, vector<31x128xf32> -> vector<31x128xf32>
    %51 = arith.addf %45, %50 : vector<31x128xf32>
    %c2_54 = arith.constant 2 : index
    %c0_55 = arith.constant 0 : index
    %52 = vector.load %arg7[%c2_54, %c0_55] : memref<72x128xf32, #tpu.memory_space<vmem>>, vector<31x128xf32>
    %c5 = arith.constant 5 : index
    %c0_56 = arith.constant 0 : index
    %c0_57 = arith.constant 0 : index
    %53 = vector.load %arg2[%c5, %c0_56, %c0_57] : memref<27x128x128xbf16, #tpu.memory_space<vmem>>, vector<1x128x128xbf16>
    %54 = vector.shape_cast %53 : vector<1x128x128xbf16> to vector<128x128xbf16>
    %55 = arith.truncf %52 : vector<31x128xf32> to vector<31x128xbf16>
    %cst_58 = arith.constant dense<0.000000e+00> : vector<31x128xf32>
    %56 = tpu.matmul %55, %54, %cst_58 {dimension_numbers = #tpu.dot_dimension_numbers<[1], [0], [0], [1], [0, 0, 1, 1], [], []>} : vector<31x128xbf16>, vector<128x128xbf16>, vector<31x128xf32> -> vector<31x128xf32>
    %57 = arith.addf %51, %56 : vector<31x128xf32>
    %c1_59 = arith.constant 1 : index
    %c0_60 = arith.constant 0 : index
    %58 = vector.load %arg4[%c1_59, %c0_60] : memref<16x128xf32, #tpu.memory_space<vmem>>, vector<1x128xf32>
    %59 = vector.broadcast %58 : vector<1x128xf32> to vector<31x128xf32>
    %60 = arith.addf %57, %59 : vector<31x128xf32>
    %cst_61 = arith.constant 0.000000e+00 : f32
    %61 = vector.broadcast %cst_61 : f32 to vector<31x128xf32>
    %62 = arith.maximumf %60, %61 : vector<31x128xf32>
    %cst_62 = arith.constant 0.000000e+00 : f32
    %63 = vector.broadcast %cst_62 : f32 to vector<72x128xf32>
    %c0_63 = arith.constant 0 : index
    %c0_64 = arith.constant 0 : index
    %64 = vector.load %arg6[%c0_63, %c0_64] : memref<72x128xf32, #tpu.memory_space<vmem>>, vector<72x128xf32>
    tpu.vector_store %arg6[%c0_63, %c0_64], %63 {strides = array<i32>} : memref<72x128xf32, #tpu.memory_space<vmem>>, vector<72x128xf32>,
    %c1_65 = arith.constant 1 : index
    %c0_66 = arith.constant 0 : index
    %65 = vector.load %arg6[%c1_65, %c0_66] : memref<72x128xf32, #tpu.memory_space<vmem>>, vector<31x128xf32>
    tpu.vector_store %arg6[%c1_65, %c0_66], %62 {strides = array<i32>} : memref<72x128xf32, #tpu.memory_space<vmem>>, vector<31x128xf32>,
    %c0_67 = arith.constant 0 : index
    %c0_68 = arith.constant 0 : index
    %66 = vector.load %arg6[%c0_67, %c0_68] : memref<72x128xf32, #tpu.memory_space<vmem>>, vector<31x128xf32>
    %c6 = arith.constant 6 : index
    %c0_69 = arith.constant 0 : index
    %c0_70 = arith.constant 0 : index
    %67 = vector.load %arg2[%c6, %c0_69, %c0_70] : memref<27x128x128xbf16, #tpu.memory_space<vmem>>, vector<1x128x128xbf16>
    %68 = vector.shape_cast %67 : vector<1x128x128xbf16> to vector<128x128xbf16>
    %69 = arith.truncf %66 : vector<31x128xf32> to vector<31x128xbf16>
    %cst_71 = arith.constant dense<0.000000e+00> : vector<31x128xf32>
    %70 = tpu.matmul %69, %68, %cst_71 {dimension_numbers = #tpu.dot_dimension_numbers<[1], [0], [0], [1], [0, 0, 1, 1], [], []>} : vector<31x128xbf16>, vector<128x128xbf16>, vector<31x128xf32> -> vector<31x128xf32>
    %c1_72 = arith.constant 1 : index
    %c0_73 = arith.constant 0 : index
    %71 = vector.load %arg6[%c1_72, %c0_73] : memref<72x128xf32, #tpu.memory_space<vmem>>, vector<31x128xf32>
    %c7 = arith.constant 7 : index
    %c0_74 = arith.constant 0 : index
    %c0_75 = arith.constant 0 : index
    %72 = vector.load %arg2[%c7, %c0_74, %c0_75] : memref<27x128x128xbf16, #tpu.memory_space<vmem>>, vector<1x128x128xbf16>
    %73 = vector.shape_cast %72 : vector<1x128x128xbf16> to vector<128x128xbf16>
    %74 = arith.truncf %71 : vector<31x128xf32> to vector<31x128xbf16>
    %cst_76 = arith.constant dense<0.000000e+00> : vector<31x128xf32>
    %75 = tpu.matmul %74, %73, %cst_76 {dimension_numbers = #tpu.dot_dimension_numbers<[1], [0], [0], [1], [0, 0, 1, 1], [], []>} : vector<31x128xbf16>, vector<128x128xbf16>, vector<31x128xf32> -> vector<31x128xf32>
    %76 = arith.addf %70, %75 : vector<31x128xf32>
    %c2_77 = arith.constant 2 : index
    %c0_78 = arith.constant 0 : index
    %77 = vector.load %arg6[%c2_77, %c0_78] : memref<72x128xf32, #tpu.memory_space<vmem>>, vector<31x128xf32>
    %c8 = arith.constant 8 : index
    %c0_79 = arith.constant 0 : index
    %c0_80 = arith.constant 0 : index
    %78 = vector.load %arg2[%c8, %c0_79, %c0_80] : memref<27x128x128xbf16, #tpu.memory_space<vmem>>, vector<1x128x128xbf16>
    %79 = vector.shape_cast %78 : vector<1x128x128xbf16> to vector<128x128xbf16>
    %80 = arith.truncf %77 : vector<31x128xf32> to vector<31x128xbf16>
    %cst_81 = arith.constant dense<0.000000e+00> : vector<31x128xf32>
    %81 = tpu.matmul %80, %79, %cst_81 {dimension_numbers = #tpu.dot_dimension_numbers<[1], [0], [0], [1], [0, 0, 1, 1], [], []>} : vector<31x128xbf16>, vector<128x128xbf16>, vector<31x128xf32> -> vector<31x128xf32>
    %82 = arith.addf %76, %81 : vector<31x128xf32>
    %c2_82 = arith.constant 2 : index
    %c0_83 = arith.constant 0 : index
    %83 = vector.load %arg4[%c2_82, %c0_83] : memref<16x128xf32, #tpu.memory_space<vmem>>, vector<1x128xf32>
    %84 = vector.broadcast %83 : vector<1x128xf32> to vector<31x128xf32>
    %85 = arith.addf %82, %84 : vector<31x128xf32>
    %86 = arith.addf %85, %40 : vector<31x128xf32>
    %cst_84 = arith.constant 0.000000e+00 : f32
    %87 = vector.broadcast %cst_84 : f32 to vector<31x128xf32>
    %88 = arith.maximumf %86, %87 : vector<31x128xf32>
    %cst_85 = arith.constant 0.000000e+00 : f32
    %89 = vector.broadcast %cst_85 : f32 to vector<72x128xf32>
    %c0_86 = arith.constant 0 : index
    %c0_87 = arith.constant 0 : index
    %90 = vector.load %arg7[%c0_86, %c0_87] : memref<72x128xf32, #tpu.memory_space<vmem>>, vector<72x128xf32>
    tpu.vector_store %arg7[%c0_86, %c0_87], %89 {strides = array<i32>} : memref<72x128xf32, #tpu.memory_space<vmem>>, vector<72x128xf32>,
    %c1_88 = arith.constant 1 : index
    %c0_89 = arith.constant 0 : index
    %91 = vector.load %arg7[%c1_88, %c0_89] : memref<72x128xf32, #tpu.memory_space<vmem>>, vector<31x128xf32>
    tpu.vector_store %arg7[%c1_88, %c0_89], %88 {strides = array<i32>} : memref<72x128xf32, #tpu.memory_space<vmem>>, vector<31x128xf32>,
    %c1_90 = arith.constant 1 : index
    %c0_91 = arith.constant 0 : index
    %92 = tpu.strided_load %arg7[%c1_90, %c0_91] {strides = array<i32: 2, 1>} : memref<72x128xf32, #tpu.memory_space<vmem>>, vector<16x128xf32>
    %93 = arith.truncf %92 : vector<16x128xf32> to vector<16x128xbf16>
    %c1_92 = arith.constant 1 : index
    %c0_93 = arith.constant 0 : index
    %c0_94 = arith.constant 0 : index
    %94 = vector.load %arg3[%c1_92, %c0_93, %c0_94] : memref<4x128x128xbf16, #tpu.memory_space<vmem>>, vector<1x128x128xbf16>
    %95 = vector.shape_cast %94 : vector<1x128x128xbf16> to vector<128x128xbf16>
    %cst_95 = arith.constant dense<0.000000e+00> : vector<16x128xf32>
    %96 = tpu.matmul %93, %95, %cst_95 {dimension_numbers = #tpu.dot_dimension_numbers<[1], [0], [0], [1], [0, 0, 1, 1], [], []>} : vector<16x128xbf16>, vector<128x128xbf16>, vector<16x128xf32> -> vector<16x128xf32>
    %c6_96 = arith.constant 6 : index
    %c0_97 = arith.constant 0 : index
    %97 = vector.load %arg4[%c6_96, %c0_97] : memref<16x128xf32, #tpu.memory_space<vmem>>, vector<1x128xf32>
    %98 = vector.broadcast %97 : vector<1x128xf32> to vector<16x128xf32>
    %99 = arith.addf %96, %98 : vector<16x128xf32>
    %c0_98 = arith.constant 0 : index
    %c0_99 = arith.constant 0 : index
    %100 = tpu.strided_load %arg7[%c0_98, %c0_99] {strides = array<i32: 2, 1>} : memref<72x128xf32, #tpu.memory_space<vmem>>, vector<16x128xf32>
    %c9 = arith.constant 9 : index
    %c0_100 = arith.constant 0 : index
    %c0_101 = arith.constant 0 : index
    %101 = vector.load %arg2[%c9, %c0_100, %c0_101] : memref<27x128x128xbf16, #tpu.memory_space<vmem>>, vector<1x128x128xbf16>
    %102 = vector.shape_cast %101 : vector<1x128x128xbf16> to vector<128x128xbf16>
    %103 = arith.truncf %100 : vector<16x128xf32> to vector<16x128xbf16>
    %cst_102 = arith.constant dense<0.000000e+00> : vector<16x128xf32>
    %104 = tpu.matmul %103, %102, %cst_102 {dimension_numbers = #tpu.dot_dimension_numbers<[1], [0], [0], [1], [0, 0, 1, 1], [], []>} : vector<16x128xbf16>, vector<128x128xbf16>, vector<16x128xf32> -> vector<16x128xf32>
    %c1_103 = arith.constant 1 : index
    %c0_104 = arith.constant 0 : index
    %105 = tpu.strided_load %arg7[%c1_103, %c0_104] {strides = array<i32: 2, 1>} : memref<72x128xf32, #tpu.memory_space<vmem>>, vector<16x128xf32>
    %c10 = arith.constant 10 : index
    %c0_105 = arith.constant 0 : index
    %c0_106 = arith.constant 0 : index
    %106 = vector.load %arg2[%c10, %c0_105, %c0_106] : memref<27x128x128xbf16, #tpu.memory_space<vmem>>, vector<1x128x128xbf16>
    %107 = vector.shape_cast %106 : vector<1x128x128xbf16> to vector<128x128xbf16>
    %108 = arith.truncf %105 : vector<16x128xf32> to vector<16x128xbf16>
    %cst_107 = arith.constant dense<0.000000e+00> : vector<16x128xf32>
    %109 = tpu.matmul %108, %107, %cst_107 {dimension_numbers = #tpu.dot_dimension_numbers<[1], [0], [0], [1], [0, 0, 1, 1], [], []>} : vector<16x128xbf16>, vector<128x128xbf16>, vector<16x128xf32> -> vector<16x128xf32>
    %110 = arith.addf %104, %109 : vector<16x128xf32>
    %c2_108 = arith.constant 2 : index
    %c0_109 = arith.constant 0 : index
    %111 = tpu.strided_load %arg7[%c2_108, %c0_109] {strides = array<i32: 2, 1>} : memref<72x128xf32, #tpu.memory_space<vmem>>, vector<16x128xf32>
    %c11 = arith.constant 11 : index
    %c0_110 = arith.constant 0 : index
    %c0_111 = arith.constant 0 : index
    %112 = vector.load %arg2[%c11, %c0_110, %c0_111] : memref<27x128x128xbf16, #tpu.memory_space<vmem>>, vector<1x128x128xbf16>
    %113 = vector.shape_cast %112 : vector<1x128x128xbf16> to vector<128x128xbf16>
    %114 = arith.truncf %111 : vector<16x128xf32> to vector<16x128xbf16>
    %cst_112 = arith.constant dense<0.000000e+00> : vector<16x128xf32>
    %115 = tpu.matmul %114, %113, %cst_112 {dimension_numbers = #tpu.dot_dimension_numbers<[1], [0], [0], [1], [0, 0, 1, 1], [], []>} : vector<16x128xbf16>, vector<128x128xbf16>, vector<16x128xf32> -> vector<16x128xf32>
    %116 = arith.addf %110, %115 : vector<16x128xf32>
    %c4_113 = arith.constant 4 : index
    %c0_114 = arith.constant 0 : index
    %117 = vector.load %arg4[%c4_113, %c0_114] : memref<16x128xf32, #tpu.memory_space<vmem>>, vector<1x128xf32>
    %118 = vector.broadcast %117 : vector<1x128xf32> to vector<16x128xf32>
    %119 = arith.addf %116, %118 : vector<16x128xf32>
    %cst_115 = arith.constant 0.000000e+00 : f32
    %120 = vector.broadcast %cst_115 : f32 to vector<16x128xf32>
    %121 = arith.maximumf %119, %120 : vector<16x128xf32>
    %cst_116 = arith.constant 0.000000e+00 : f32
    %122 = vector.broadcast %cst_116 : f32 to vector<72x128xf32>
    %c0_117 = arith.constant 0 : index
    %c0_118 = arith.constant 0 : index
    %123 = vector.load %arg6[%c0_117, %c0_118] : memref<72x128xf32, #tpu.memory_space<vmem>>, vector<72x128xf32>
    tpu.vector_store %arg6[%c0_117, %c0_118], %122 {strides = array<i32>} : memref<72x128xf32, #tpu.memory_space<vmem>>, vector<72x128xf32>,
    %c1_119 = arith.constant 1 : index
    %c0_120 = arith.constant 0 : index
    %124 = vector.load %arg6[%c1_119, %c0_120] : memref<72x128xf32, #tpu.memory_space<vmem>>, vector<16x128xf32>
    tpu.vector_store %arg6[%c1_119, %c0_120], %121 {strides = array<i32>} : memref<72x128xf32, #tpu.memory_space<vmem>>, vector<16x128xf32>,
    %c0_121 = arith.constant 0 : index
    %c0_122 = arith.constant 0 : index
    %125 = vector.load %arg6[%c0_121, %c0_122] : memref<72x128xf32, #tpu.memory_space<vmem>>, vector<16x128xf32>
    %c12 = arith.constant 12 : index
    %c0_123 = arith.constant 0 : index
    %c0_124 = arith.constant 0 : index
    %126 = vector.load %arg2[%c12, %c0_123, %c0_124] : memref<27x128x128xbf16, #tpu.memory_space<vmem>>, vector<1x128x128xbf16>
    %127 = vector.shape_cast %126 : vector<1x128x128xbf16> to vector<128x128xbf16>
    %128 = arith.truncf %125 : vector<16x128xf32> to vector<16x128xbf16>
    %cst_125 = arith.constant dense<0.000000e+00> : vector<16x128xf32>
    %129 = tpu.matmul %128, %127, %cst_125 {dimension_numbers = #tpu.dot_dimension_numbers<[1], [0], [0], [1], [0, 0, 1, 1], [], []>} : vector<16x128xbf16>, vector<128x128xbf16>, vector<16x128xf32> -> vector<16x128xf32>
    %c1_126 = arith.constant 1 : index
    %c0_127 = arith.constant 0 : index
    %130 = vector.load %arg6[%c1_126, %c0_127] : memref<72x128xf32, #tpu.memory_space<vmem>>, vector<16x128xf32>
    %c13 = arith.constant 13 : index
    %c0_128 = arith.constant 0 : index
    %c0_129 = arith.constant 0 : index
    %131 = vector.load %arg2[%c13, %c0_128, %c0_129] : memref<27x128x128xbf16, #tpu.memory_space<vmem>>, vector<1x128x128xbf16>
    %132 = vector.shape_cast %131 : vector<1x128x128xbf16> to vector<128x128xbf16>
    %133 = arith.truncf %130 : vector<16x128xf32> to vector<16x128xbf16>
    %cst_130 = arith.constant dense<0.000000e+00> : vector<16x128xf32>
    %134 = tpu.matmul %133, %132, %cst_130 {dimension_numbers = #tpu.dot_dimension_numbers<[1], [0], [0], [1], [0, 0, 1, 1], [], []>} : vector<16x128xbf16>, vector<128x128xbf16>, vector<16x128xf32> -> vector<16x128xf32>
    %135 = arith.addf %129, %134 : vector<16x128xf32>
    %c2_131 = arith.constant 2 : index
    %c0_132 = arith.constant 0 : index
    %136 = vector.load %arg6[%c2_131, %c0_132] : memref<72x128xf32, #tpu.memory_space<vmem>>, vector<16x128xf32>
    %c14 = arith.constant 14 : index
    %c0_133 = arith.constant 0 : index
    %c0_134 = arith.constant 0 : index
    %137 = vector.load %arg2[%c14, %c0_133, %c0_134] : memref<27x128x128xbf16, #tpu.memory_space<vmem>>, vector<1x128x128xbf16>
    %138 = vector.shape_cast %137 : vector<1x128x128xbf16> to vector<128x128xbf16>
    %139 = arith.truncf %136 : vector<16x128xf32> to vector<16x128xbf16>
    %cst_135 = arith.constant dense<0.000000e+00> : vector<16x128xf32>
    %140 = tpu.matmul %139, %138, %cst_135 {dimension_numbers = #tpu.dot_dimension_numbers<[1], [0], [0], [1], [0, 0, 1, 1], [], []>} : vector<16x128xbf16>, vector<128x128xbf16>, vector<16x128xf32> -> vector<16x128xf32>
    %141 = arith.addf %135, %140 : vector<16x128xf32>
    %c5_136 = arith.constant 5 : index
    %c0_137 = arith.constant 0 : index
    %142 = vector.load %arg4[%c5_136, %c0_137] : memref<16x128xf32, #tpu.memory_space<vmem>>, vector<1x128xf32>
    %143 = vector.broadcast %142 : vector<1x128xf32> to vector<16x128xf32>
    %144 = arith.addf %141, %143 : vector<16x128xf32>
    %145 = arith.addf %144, %99 : vector<16x128xf32>
    %cst_138 = arith.constant 0.000000e+00 : f32
    %146 = vector.broadcast %cst_138 : f32 to vector<16x128xf32>
    %147 = arith.maximumf %145, %146 : vector<16x128xf32>
    %cst_139 = arith.constant 0.000000e+00 : f32
    %148 = vector.broadcast %cst_139 : f32 to vector<72x128xf32>
    %c0_140 = arith.constant 0 : index
    %c0_141 = arith.constant 0 : index
    %149 = vector.load %arg7[%c0_140, %c0_141] : memref<72x128xf32, #tpu.memory_space<vmem>>, vector<72x128xf32>
    tpu.vector_store %arg7[%c0_140, %c0_141], %148 {strides = array<i32>} : memref<72x128xf32, #tpu.memory_space<vmem>>, vector<72x128xf32>,
    %c1_142 = arith.constant 1 : index
    %c0_143 = arith.constant 0 : index
    %150 = vector.load %arg7[%c1_142, %c0_143] : memref<72x128xf32, #tpu.memory_space<vmem>>, vector<16x128xf32>
    tpu.vector_store %arg7[%c1_142, %c0_143], %147 {strides = array<i32>} : memref<72x128xf32, #tpu.memory_space<vmem>>, vector<16x128xf32>,
    %c1_144 = arith.constant 1 : index
    %c0_145 = arith.constant 0 : index
    %151 = tpu.strided_load %arg7[%c1_144, %c0_145] {strides = array<i32: 2, 1>} : memref<72x128xf32, #tpu.memory_space<vmem>>, vector<8x128xf32>
    %152 = arith.truncf %151 : vector<8x128xf32> to vector<8x128xbf16>
    %c2_146 = arith.constant 2 : index
    %c0_147 = arith.constant 0 : index
    %c0_148 = arith.constant 0 : index
    %153 = vector.load %arg3[%c2_146, %c0_147, %c0_148] : memref<4x128x128xbf16, #tpu.memory_space<vmem>>, vector<1x128x128xbf16>
    %154 = vector.shape_cast %153 : vector<1x128x128xbf16> to vector<128x128xbf16>
    %cst_149 = arith.constant dense<0.000000e+00> : vector<8x128xf32>
    %155 = tpu.matmul %152, %154, %cst_149 {dimension_numbers = #tpu.dot_dimension_numbers<[1], [0], [0], [1], [0, 0, 1, 1], [], []>} : vector<8x128xbf16>, vector<128x128xbf16>, vector<8x128xf32> -> vector<8x128xf32>
    %c9_150 = arith.constant 9 : index
    %c0_151 = arith.constant 0 : index
    %156 = vector.load %arg4[%c9_150, %c0_151] : memref<16x128xf32, #tpu.memory_space<vmem>>, vector<1x128xf32>
    %157 = vector.broadcast %156 : vector<1x128xf32> to vector<8x128xf32>
    %158 = arith.addf %155, %157 : vector<8x128xf32>
    %c0_152 = arith.constant 0 : index
    %c0_153 = arith.constant 0 : index
    %159 = tpu.strided_load %arg7[%c0_152, %c0_153] {strides = array<i32: 2, 1>} : memref<72x128xf32, #tpu.memory_space<vmem>>, vector<8x128xf32>
    %c15 = arith.constant 15 : index
    %c0_154 = arith.constant 0 : index
    %c0_155 = arith.constant 0 : index
    %160 = vector.load %arg2[%c15, %c0_154, %c0_155] : memref<27x128x128xbf16, #tpu.memory_space<vmem>>, vector<1x128x128xbf16>
    %161 = vector.shape_cast %160 : vector<1x128x128xbf16> to vector<128x128xbf16>
    %162 = arith.truncf %159 : vector<8x128xf32> to vector<8x128xbf16>
    %cst_156 = arith.constant dense<0.000000e+00> : vector<8x128xf32>
    %163 = tpu.matmul %162, %161, %cst_156 {dimension_numbers = #tpu.dot_dimension_numbers<[1], [0], [0], [1], [0, 0, 1, 1], [], []>} : vector<8x128xbf16>, vector<128x128xbf16>, vector<8x128xf32> -> vector<8x128xf32>
    %c1_157 = arith.constant 1 : index
    %c0_158 = arith.constant 0 : index
    %164 = tpu.strided_load %arg7[%c1_157, %c0_158] {strides = array<i32: 2, 1>} : memref<72x128xf32, #tpu.memory_space<vmem>>, vector<8x128xf32>
    %c16 = arith.constant 16 : index
    %c0_159 = arith.constant 0 : index
    %c0_160 = arith.constant 0 : index
    %165 = vector.load %arg2[%c16, %c0_159, %c0_160] : memref<27x128x128xbf16, #tpu.memory_space<vmem>>, vector<1x128x128xbf16>
    %166 = vector.shape_cast %165 : vector<1x128x128xbf16> to vector<128x128xbf16>
    %167 = arith.truncf %164 : vector<8x128xf32> to vector<8x128xbf16>
    %cst_161 = arith.constant dense<0.000000e+00> : vector<8x128xf32>
    %168 = tpu.matmul %167, %166, %cst_161 {dimension_numbers = #tpu.dot_dimension_numbers<[1], [0], [0], [1], [0, 0, 1, 1], [], []>} : vector<8x128xbf16>, vector<128x128xbf16>, vector<8x128xf32> -> vector<8x128xf32>
    %169 = arith.addf %163, %168 : vector<8x128xf32>
    %c2_162 = arith.constant 2 : index
    %c0_163 = arith.constant 0 : index
    %170 = tpu.strided_load %arg7[%c2_162, %c0_163] {strides = array<i32: 2, 1>} : memref<72x128xf32, #tpu.memory_space<vmem>>, vector<8x128xf32>
    %c17 = arith.constant 17 : index
    %c0_164 = arith.constant 0 : index
    %c0_165 = arith.constant 0 : index
    %171 = vector.load %arg2[%c17, %c0_164, %c0_165] : memref<27x128x128xbf16, #tpu.memory_space<vmem>>, vector<1x128x128xbf16>
    %172 = vector.shape_cast %171 : vector<1x128x128xbf16> to vector<128x128xbf16>
    %173 = arith.truncf %170 : vector<8x128xf32> to vector<8x128xbf16>
    %cst_166 = arith.constant dense<0.000000e+00> : vector<8x128xf32>
    %174 = tpu.matmul %173, %172, %cst_166 {dimension_numbers = #tpu.dot_dimension_numbers<[1], [0], [0], [1], [0, 0, 1, 1], [], []>} : vector<8x128xbf16>, vector<128x128xbf16>, vector<8x128xf32> -> vector<8x128xf32>
    %175 = arith.addf %169, %174 : vector<8x128xf32>
    %c7_167 = arith.constant 7 : index
    %c0_168 = arith.constant 0 : index
    %176 = vector.load %arg4[%c7_167, %c0_168] : memref<16x128xf32, #tpu.memory_space<vmem>>, vector<1x128xf32>
    %177 = vector.broadcast %176 : vector<1x128xf32> to vector<8x128xf32>
    %178 = arith.addf %175, %177 : vector<8x128xf32>
    %cst_169 = arith.constant 0.000000e+00 : f32
    %179 = vector.broadcast %cst_169 : f32 to vector<8x128xf32>
    %180 = arith.maximumf %178, %179 : vector<8x128xf32>
    %cst_170 = arith.constant 0.000000e+00 : f32
    %181 = vector.broadcast %cst_170 : f32 to vector<72x128xf32>
    %c0_171 = arith.constant 0 : index
    %c0_172 = arith.constant 0 : index
    %182 = vector.load %arg6[%c0_171, %c0_172] : memref<72x128xf32, #tpu.memory_space<vmem>>, vector<72x128xf32>
    tpu.vector_store %arg6[%c0_171, %c0_172], %181 {strides = array<i32>} : memref<72x128xf32, #tpu.memory_space<vmem>>, vector<72x128xf32>,
    %c1_173 = arith.constant 1 : index
    %c0_174 = arith.constant 0 : index
    %183 = vector.load %arg6[%c1_173, %c0_174] : memref<72x128xf32, #tpu.memory_space<vmem>>, vector<8x128xf32>
    tpu.vector_store %arg6[%c1_173, %c0_174], %180 {strides = array<i32>} : memref<72x128xf32, #tpu.memory_space<vmem>>, vector<8x128xf32>,
    %c0_175 = arith.constant 0 : index
    %c0_176 = arith.constant 0 : index
    %184 = vector.load %arg6[%c0_175, %c0_176] : memref<72x128xf32, #tpu.memory_space<vmem>>, vector<8x128xf32>
    %c18 = arith.constant 18 : index
    %c0_177 = arith.constant 0 : index
    %c0_178 = arith.constant 0 : index
    %185 = vector.load %arg2[%c18, %c0_177, %c0_178] : memref<27x128x128xbf16, #tpu.memory_space<vmem>>, vector<1x128x128xbf16>
    %186 = vector.shape_cast %185 : vector<1x128x128xbf16> to vector<128x128xbf16>
    %187 = arith.truncf %184 : vector<8x128xf32> to vector<8x128xbf16>
    %cst_179 = arith.constant dense<0.000000e+00> : vector<8x128xf32>
    %188 = tpu.matmul %187, %186, %cst_179 {dimension_numbers = #tpu.dot_dimension_numbers<[1], [0], [0], [1], [0, 0, 1, 1], [], []>} : vector<8x128xbf16>, vector<128x128xbf16>, vector<8x128xf32> -> vector<8x128xf32>
    %c1_180 = arith.constant 1 : index
    %c0_181 = arith.constant 0 : index
    %189 = vector.load %arg6[%c1_180, %c0_181] : memref<72x128xf32, #tpu.memory_space<vmem>>, vector<8x128xf32>
    %c19 = arith.constant 19 : index
    %c0_182 = arith.constant 0 : index
    %c0_183 = arith.constant 0 : index
    %190 = vector.load %arg2[%c19, %c0_182, %c0_183] : memref<27x128x128xbf16, #tpu.memory_space<vmem>>, vector<1x128x128xbf16>
    %191 = vector.shape_cast %190 : vector<1x128x128xbf16> to vector<128x128xbf16>
    %192 = arith.truncf %189 : vector<8x128xf32> to vector<8x128xbf16>
    %cst_184 = arith.constant dense<0.000000e+00> : vector<8x128xf32>
    %193 = tpu.matmul %192, %191, %cst_184 {dimension_numbers = #tpu.dot_dimension_numbers<[1], [0], [0], [1], [0, 0, 1, 1], [], []>} : vector<8x128xbf16>, vector<128x128xbf16>, vector<8x128xf32> -> vector<8x128xf32>
    %194 = arith.addf %188, %193 : vector<8x128xf32>
    %c2_185 = arith.constant 2 : index
    %c0_186 = arith.constant 0 : index
    %195 = vector.load %arg6[%c2_185, %c0_186] : memref<72x128xf32, #tpu.memory_space<vmem>>, vector<8x128xf32>
    %c20 = arith.constant 20 : index
    %c0_187 = arith.constant 0 : index
    %c0_188 = arith.constant 0 : index
    %196 = vector.load %arg2[%c20, %c0_187, %c0_188] : memref<27x128x128xbf16, #tpu.memory_space<vmem>>, vector<1x128x128xbf16>
    %197 = vector.shape_cast %196 : vector<1x128x128xbf16> to vector<128x128xbf16>
    %198 = arith.truncf %195 : vector<8x128xf32> to vector<8x128xbf16>
    %cst_189 = arith.constant dense<0.000000e+00> : vector<8x128xf32>
    %199 = tpu.matmul %198, %197, %cst_189 {dimension_numbers = #tpu.dot_dimension_numbers<[1], [0], [0], [1], [0, 0, 1, 1], [], []>} : vector<8x128xbf16>, vector<128x128xbf16>, vector<8x128xf32> -> vector<8x128xf32>
    %200 = arith.addf %194, %199 : vector<8x128xf32>
    %c8_190 = arith.constant 8 : index
    %c0_191 = arith.constant 0 : index
    %201 = vector.load %arg4[%c8_190, %c0_191] : memref<16x128xf32, #tpu.memory_space<vmem>>, vector<1x128xf32>
    %202 = vector.broadcast %201 : vector<1x128xf32> to vector<8x128xf32>
    %203 = arith.addf %200, %202 : vector<8x128xf32>
    %204 = arith.addf %203, %158 : vector<8x128xf32>
    %cst_192 = arith.constant 0.000000e+00 : f32
    %205 = vector.broadcast %cst_192 : f32 to vector<8x128xf32>
    %206 = arith.maximumf %204, %205 : vector<8x128xf32>
    %cst_193 = arith.constant 0.000000e+00 : f32
    %207 = vector.broadcast %cst_193 : f32 to vector<72x128xf32>
    %c0_194 = arith.constant 0 : index
    %c0_195 = arith.constant 0 : index
    %208 = vector.load %arg7[%c0_194, %c0_195] : memref<72x128xf32, #tpu.memory_space<vmem>>, vector<72x128xf32>
    tpu.vector_store %arg7[%c0_194, %c0_195], %207 {strides = array<i32>} : memref<72x128xf32, #tpu.memory_space<vmem>>, vector<72x128xf32>,
    %c1_196 = arith.constant 1 : index
    %c0_197 = arith.constant 0 : index
    %209 = vector.load %arg7[%c1_196, %c0_197] : memref<72x128xf32, #tpu.memory_space<vmem>>, vector<8x128xf32>
    tpu.vector_store %arg7[%c1_196, %c0_197], %206 {strides = array<i32>} : memref<72x128xf32, #tpu.memory_space<vmem>>, vector<8x128xf32>,
    %c1_198 = arith.constant 1 : index
    %c0_199 = arith.constant 0 : index
    %210 = tpu.strided_load %arg7[%c1_198, %c0_199] {strides = array<i32: 2, 1>} : memref<72x128xf32, #tpu.memory_space<vmem>>, vector<4x128xf32>
    %211 = arith.truncf %210 : vector<4x128xf32> to vector<4x128xbf16>
    %c3_200 = arith.constant 3 : index
    %c0_201 = arith.constant 0 : index
    %c0_202 = arith.constant 0 : index
    %212 = vector.load %arg3[%c3_200, %c0_201, %c0_202] : memref<4x128x128xbf16, #tpu.memory_space<vmem>>, vector<1x128x128xbf16>
    %213 = vector.shape_cast %212 : vector<1x128x128xbf16> to vector<128x128xbf16>
    %cst_203 = arith.constant dense<0.000000e+00> : vector<4x128xf32>
    %214 = tpu.matmul %211, %213, %cst_203 {dimension_numbers = #tpu.dot_dimension_numbers<[1], [0], [0], [1], [0, 0, 1, 1], [], []>} : vector<4x128xbf16>, vector<128x128xbf16>, vector<4x128xf32> -> vector<4x128xf32>
    %c12_204 = arith.constant 12 : index
    %c0_205 = arith.constant 0 : index
    %215 = vector.load %arg4[%c12_204, %c0_205] : memref<16x128xf32, #tpu.memory_space<vmem>>, vector<1x128xf32>
    %216 = vector.broadcast %215 : vector<1x128xf32> to vector<4x128xf32>
    %217 = arith.addf %214, %216 : vector<4x128xf32>
    %c0_206 = arith.constant 0 : index
    %c0_207 = arith.constant 0 : index
    %218 = tpu.strided_load %arg7[%c0_206, %c0_207] {strides = array<i32: 2, 1>} : memref<72x128xf32, #tpu.memory_space<vmem>>, vector<4x128xf32>
    %c21 = arith.constant 21 : index
    %c0_208 = arith.constant 0 : index
    %c0_209 = arith.constant 0 : index
    %219 = vector.load %arg2[%c21, %c0_208, %c0_209] : memref<27x128x128xbf16, #tpu.memory_space<vmem>>, vector<1x128x128xbf16>
    %220 = vector.shape_cast %219 : vector<1x128x128xbf16> to vector<128x128xbf16>
    %221 = arith.truncf %218 : vector<4x128xf32> to vector<4x128xbf16>
    %cst_210 = arith.constant dense<0.000000e+00> : vector<4x128xf32>
    %222 = tpu.matmul %221, %220, %cst_210 {dimension_numbers = #tpu.dot_dimension_numbers<[1], [0], [0], [1], [0, 0, 1, 1], [], []>} : vector<4x128xbf16>, vector<128x128xbf16>, vector<4x128xf32> -> vector<4x128xf32>
    %c1_211 = arith.constant 1 : index
    %c0_212 = arith.constant 0 : index
    %223 = tpu.strided_load %arg7[%c1_211, %c0_212] {strides = array<i32: 2, 1>} : memref<72x128xf32, #tpu.memory_space<vmem>>, vector<4x128xf32>
    %c22 = arith.constant 22 : index
    %c0_213 = arith.constant 0 : index
    %c0_214 = arith.constant 0 : index
    %224 = vector.load %arg2[%c22, %c0_213, %c0_214] : memref<27x128x128xbf16, #tpu.memory_space<vmem>>, vector<1x128x128xbf16>
    %225 = vector.shape_cast %224 : vector<1x128x128xbf16> to vector<128x128xbf16>
    %226 = arith.truncf %223 : vector<4x128xf32> to vector<4x128xbf16>
    %cst_215 = arith.constant dense<0.000000e+00> : vector<4x128xf32>
    %227 = tpu.matmul %226, %225, %cst_215 {dimension_numbers = #tpu.dot_dimension_numbers<[1], [0], [0], [1], [0, 0, 1, 1], [], []>} : vector<4x128xbf16>, vector<128x128xbf16>, vector<4x128xf32> -> vector<4x128xf32>
    %228 = arith.addf %222, %227 : vector<4x128xf32>
    %c2_216 = arith.constant 2 : index
    %c0_217 = arith.constant 0 : index
    %229 = tpu.strided_load %arg7[%c2_216, %c0_217] {strides = array<i32: 2, 1>} : memref<72x128xf32, #tpu.memory_space<vmem>>, vector<4x128xf32>
    %c23 = arith.constant 23 : index
    %c0_218 = arith.constant 0 : index
    %c0_219 = arith.constant 0 : index
    %230 = vector.load %arg2[%c23, %c0_218, %c0_219] : memref<27x128x128xbf16, #tpu.memory_space<vmem>>, vector<1x128x128xbf16>
    %231 = vector.shape_cast %230 : vector<1x128x128xbf16> to vector<128x128xbf16>
    %232 = arith.truncf %229 : vector<4x128xf32> to vector<4x128xbf16>
    %cst_220 = arith.constant dense<0.000000e+00> : vector<4x128xf32>
    %233 = tpu.matmul %232, %231, %cst_220 {dimension_numbers = #tpu.dot_dimension_numbers<[1], [0], [0], [1], [0, 0, 1, 1], [], []>} : vector<4x128xbf16>, vector<128x128xbf16>, vector<4x128xf32> -> vector<4x128xf32>
    %234 = arith.addf %228, %233 : vector<4x128xf32>
    %c10_221 = arith.constant 10 : index
    %c0_222 = arith.constant 0 : index
    %235 = vector.load %arg4[%c10_221, %c0_222] : memref<16x128xf32, #tpu.memory_space<vmem>>, vector<1x128xf32>
    %236 = vector.broadcast %235 : vector<1x128xf32> to vector<4x128xf32>
    %237 = arith.addf %234, %236 : vector<4x128xf32>
    %cst_223 = arith.constant 0.000000e+00 : f32
    %238 = vector.broadcast %cst_223 : f32 to vector<4x128xf32>
    %239 = arith.maximumf %237, %238 : vector<4x128xf32>
    %cst_224 = arith.constant 0.000000e+00 : f32
    %240 = vector.broadcast %cst_224 : f32 to vector<72x128xf32>
    %c0_225 = arith.constant 0 : index
    %c0_226 = arith.constant 0 : index
    %241 = vector.load %arg6[%c0_225, %c0_226] : memref<72x128xf32, #tpu.memory_space<vmem>>, vector<72x128xf32>
    tpu.vector_store %arg6[%c0_225, %c0_226], %240 {strides = array<i32>} : memref<72x128xf32, #tpu.memory_space<vmem>>, vector<72x128xf32>,
    %c1_227 = arith.constant 1 : index
    %c0_228 = arith.constant 0 : index
    %242 = vector.load %arg6[%c1_227, %c0_228] : memref<72x128xf32, #tpu.memory_space<vmem>>, vector<4x128xf32>
    tpu.vector_store %arg6[%c1_227, %c0_228], %239 {strides = array<i32>} : memref<72x128xf32, #tpu.memory_space<vmem>>, vector<4x128xf32>,
    %c0_229 = arith.constant 0 : index
    %c0_230 = arith.constant 0 : index
    %243 = vector.load %arg6[%c0_229, %c0_230] : memref<72x128xf32, #tpu.memory_space<vmem>>, vector<4x128xf32>
    %c24 = arith.constant 24 : index
    %c0_231 = arith.constant 0 : index
    %c0_232 = arith.constant 0 : index
    %244 = vector.load %arg2[%c24, %c0_231, %c0_232] : memref<27x128x128xbf16, #tpu.memory_space<vmem>>, vector<1x128x128xbf16>
    %245 = vector.shape_cast %244 : vector<1x128x128xbf16> to vector<128x128xbf16>
    %246 = arith.truncf %243 : vector<4x128xf32> to vector<4x128xbf16>
    %cst_233 = arith.constant dense<0.000000e+00> : vector<4x128xf32>
    %247 = tpu.matmul %246, %245, %cst_233 {dimension_numbers = #tpu.dot_dimension_numbers<[1], [0], [0], [1], [0, 0, 1, 1], [], []>} : vector<4x128xbf16>, vector<128x128xbf16>, vector<4x128xf32> -> vector<4x128xf32>
    %c1_234 = arith.constant 1 : index
    %c0_235 = arith.constant 0 : index
    %248 = vector.load %arg6[%c1_234, %c0_235] : memref<72x128xf32, #tpu.memory_space<vmem>>, vector<4x128xf32>
    %c25 = arith.constant 25 : index
    %c0_236 = arith.constant 0 : index
    %c0_237 = arith.constant 0 : index
    %249 = vector.load %arg2[%c25, %c0_236, %c0_237] : memref<27x128x128xbf16, #tpu.memory_space<vmem>>, vector<1x128x128xbf16>
    %250 = vector.shape_cast %249 : vector<1x128x128xbf16> to vector<128x128xbf16>
    %251 = arith.truncf %248 : vector<4x128xf32> to vector<4x128xbf16>
    %cst_238 = arith.constant dense<0.000000e+00> : vector<4x128xf32>
    %252 = tpu.matmul %251, %250, %cst_238 {dimension_numbers = #tpu.dot_dimension_numbers<[1], [0], [0], [1], [0, 0, 1, 1], [], []>} : vector<4x128xbf16>, vector<128x128xbf16>, vector<4x128xf32> -> vector<4x128xf32>
    %253 = arith.addf %247, %252 : vector<4x128xf32>
    %c2_239 = arith.constant 2 : index
    %c0_240 = arith.constant 0 : index
    %254 = vector.load %arg6[%c2_239, %c0_240] : memref<72x128xf32, #tpu.memory_space<vmem>>, vector<4x128xf32>
    %c26 = arith.constant 26 : index
    %c0_241 = arith.constant 0 : index
    %c0_242 = arith.constant 0 : index
    %255 = vector.load %arg2[%c26, %c0_241, %c0_242] : memref<27x128x128xbf16, #tpu.memory_space<vmem>>, vector<1x128x128xbf16>
    %256 = vector.shape_cast %255 : vector<1x128x128xbf16> to vector<128x128xbf16>
    %257 = arith.truncf %254 : vector<4x128xf32> to vector<4x128xbf16>
    %cst_243 = arith.constant dense<0.000000e+00> : vector<4x128xf32>
    %258 = tpu.matmul %257, %256, %cst_243 {dimension_numbers = #tpu.dot_dimension_numbers<[1], [0], [0], [1], [0, 0, 1, 1], [], []>} : vector<4x128xbf16>, vector<128x128xbf16>, vector<4x128xf32> -> vector<4x128xf32>
    %259 = arith.addf %253, %258 : vector<4x128xf32>
    %c11_244 = arith.constant 11 : index
    %c0_245 = arith.constant 0 : index
    %260 = vector.load %arg4[%c11_244, %c0_245] : memref<16x128xf32, #tpu.memory_space<vmem>>, vector<1x128xf32>
    %261 = vector.broadcast %260 : vector<1x128xf32> to vector<4x128xf32>
    %262 = arith.addf %259, %261 : vector<4x128xf32>
    %263 = arith.addf %262, %217 : vector<4x128xf32>
    %cst_246 = arith.constant 0.000000e+00 : f32
    %264 = vector.broadcast %cst_246 : f32 to vector<4x128xf32>
    %265 = arith.maximumf %263, %264 : vector<4x128xf32>
    %cst_247 = arith.constant 0.000000e+00 : f32
    %266 = vector.broadcast %cst_247 : f32 to vector<72x128xf32>
    %c0_248 = arith.constant 0 : index
    %c0_249 = arith.constant 0 : index
    %267 = vector.load %arg7[%c0_248, %c0_249] : memref<72x128xf32, #tpu.memory_space<vmem>>, vector<72x128xf32>
    tpu.vector_store %arg7[%c0_248, %c0_249], %266 {strides = array<i32>} : memref<72x128xf32, #tpu.memory_space<vmem>>, vector<72x128xf32>,
    %c1_250 = arith.constant 1 : index
    %c0_251 = arith.constant 0 : index
    %268 = vector.load %arg7[%c1_250, %c0_251] : memref<72x128xf32, #tpu.memory_space<vmem>>, vector<4x128xf32>
    tpu.vector_store %arg7[%c1_250, %c0_251], %265 {strides = array<i32>} : memref<72x128xf32, #tpu.memory_space<vmem>>, vector<4x128xf32>,
    %c1_252 = arith.constant 1 : index
    %c0_253 = arith.constant 0 : index
    %269 = vector.load %arg7[%c1_252, %c0_253] : memref<72x128xf32, #tpu.memory_space<vmem>>, vector<4x128xf32>
    %cst_254 = arith.constant dense<0.000000e+00> : vector<128xf32>
    %270 = vector.multi_reduction <add>, %269, %cst_254 [0] : vector<4x128xf32> to vector<128xf32>
    %271 = vector.shape_cast %270 : vector<128xf32> to vector<1x128xf32>
    %cst_255 = arith.constant 2.500000e-01 : f32
    %272 = vector.broadcast %cst_255 : f32 to vector<1x128xf32>
    %273 = arith.mulf %271, %272 : vector<1x128xf32>
    %c0_256 = arith.constant 0 : index
    %c0_257 = arith.constant 0 : index
    %c0_258 = arith.constant 0 : index
    %274 = vector.load %arg5[%c0_256, %c0_257, %c0_258] : memref<1x1x128xf32, #tpu.memory_space<vmem>>, vector<1x1x128xf32>
    %275 = vector.shape_cast %274 : vector<1x1x128xf32> to vector<1x128xf32>
    %276 = vector.shape_cast %273 : vector<1x128xf32> to vector<1x1x128xf32>
    tpu.vector_store %arg5[%c0_256, %c0_257, %c0_258], %276 {strides = array<i32>} : memref<1x1x128xf32, #tpu.memory_space<vmem>>, vector<1x1x128xf32>,
    return
  }
  func.func @transform_0(%arg0: i32) -> (i32, i32, i32) {
    %c0_i32 = arith.constant 0 : i32
    %c0_i32_0 = arith.constant 0 : i32
    %c0_i32_1 = arith.constant 0 : i32
    return %arg0, %c0_i32, %c0_i32_0 : i32, i32, i32
  }
  func.func @transform_1(%arg0: i32) -> (i32, i32, i32) {
    %c0_i32 = arith.constant 0 : i32
    %c0_i32_0 = arith.constant 0 : i32
    %c0_i32_1 = arith.constant 0 : i32
    %c0_i32_2 = arith.constant 0 : i32
    return %c0_i32, %c0_i32_0, %c0_i32_1 : i32, i32, i32
  }
  func.func @transform_2(%arg0: i32) -> (i32, i32, i32) {
    %c0_i32 = arith.constant 0 : i32
    %c0_i32_0 = arith.constant 0 : i32
    %c0_i32_1 = arith.constant 0 : i32
    %c0_i32_2 = arith.constant 0 : i32
    return %c0_i32, %c0_i32_0, %c0_i32_1 : i32, i32, i32
  }
  func.func @transform_3(%arg0: i32) -> (i32, i32) {
    %c0_i32 = arith.constant 0 : i32
    %c0_i32_0 = arith.constant 0 : i32
    %c0_i32_1 = arith.constant 0 : i32
    return %c0_i32, %c0_i32_0 : i32, i32
  }
  func.func @transform_4(%arg0: i32) -> (i32, i32, i32) {
    %c0_i32 = arith.constant 0 : i32
    %c0_i32_0 = arith.constant 0 : i32
    %c0_i32_1 = arith.constant 0 : i32
    return %arg0, %c0_i32, %c0_i32_0 : i32, i32, i32
  }
}

</mosaic_0001>

<bundles_post_ra>
// kernel: forward.1
= control target key start
LH: loop header
LB: loop body
LE: loop exit
PB: predicated region body
PF: predicated region fallthrough
CT: control target
= control target key end

     0   :  { %9 = vsyncpa [#allocation5], 0  ;;  %s6496_s0 = inlined_call_operand.vmem [shape: bf16[2,64,128], index: 0, kind: input, shape index: {}]   ;;  %s6497_s1 = inlined_call_operand.hbm [shape: bf16[27,128,128], index: 1, kind: input, shape index: {}]   ;;  %s6498_s2 = inlined_call_operand.hbm [shape: bf16[4,128,128], index: 2, kind: input, shape index: {}]   ;;  %s6499_s3 = inlined_call_operand.vmem [shape: f32[16,128], index: 3, kind: input, shape index: {}]   ;;  %s6500_s4 = inlined_call_operand.hbm [shape: f32[2,1,128], index: 4, kind: output, shape index: {}]  }
   0x1   :  { %10 = vsyncpa [#allocation8], 0 }
   0x2   :  { %11 = vsyncpa [#allocation6], 0 }
   0x3   :  { %13 = vsyncpa [#allocation6 + $0x1], 0  ;;  %s5966_s15 = smov 0   ;;  %s5968_s16 = smov 0  }
   0x4   :  { %s5970_s17 = smov 0   ;;  %s5972_s18 = smov 0  }
   0x5 LB: > { %s5987_s19 = sadd.s32 4294967295, %s5932_s18   ;;  %s4190_s20 = sadd.s32 4294967294, %s5932_s18   ;;  %s5932_s18 = sphi %s5972_s18, %s6518_s18   ;;  %s5928_s17 = sphi %s5970_s17, %s6517_s17   ;;  %s5924_s16 = sphi %s5968_s16, %s6516_s16   ;;  %s5920_s15 = sphi %s5966_s15, %s6515_s15  }
   0x6   : > { %s5991_s21 = sadd.s32 1, %s5932_s18   ;;  %s115_s22 = sadd.s32 1, %s5928_s17 }
   0x7   : > { %s112_s23 = ssub.s32 %s5932_s18, %s5991_s21  ;;  %p125_p0 = scmp.ne.s32.totalorder %s5928_s17, %s5924_s16 }
   0x8   : > { %p113_p1 = scmp.eq.s32.totalorder %s112_s23, 0  ;;  %p126_p2 = scmp.eq.s32.totalorder %s5987_s19, 1 }
   0x9   : > { %p131_p3 = scmp.ne.s32.totalorder %s5924_s16, %s5920_s15  ;;  %p132_p4 = scmp.eq.s32.totalorder %s4190_s20, 1 }
   0xa   : > { %s6002_s24 = scalar_select %p113_p1, %s5928_s17, %s115_s22  }
   0xb   : > { %p6004_p5 = por %p126_p2, %p125_p0  ;;  %p6008_p6 = por %p132_p4, %p131_p3 }
   0xc   : > { %p4191_p7 = scmp.ge.s32.totalorder %s5932_s18, 1  ;;  %p139_p8 = scmp.lt.s32.totalorder %s5932_s18, 3 }
   0xd   : > { %s6504_s25 = scalar_select %p6004_p5, 1, 0 }
   0xe   : > { %s6505_s26 = scalar_select %p6008_p6, 1, 0 }
   0xf   : > { %p6501_p9 = scmp.eq.s32.totalorder %s5987_s19, 0  ;;  %p6015_p10 = pnand %p4191_p7, %p139_p8 }
  0x10   : > { %s5934_s28 = smov [#allocation4]   ;;  %s5935_s5 = smov [#allocation7]  }
  0x11   : > { %s6506_s27 = scalar_select %p6015_p10, 1, 0 }
  0x12   : > { %s151_s29 = sshll.u32 %s5934_s28, 4  ;;  %p5496_p11 = pneg %p6015_p10  ;;  %s152_s29 = int_to_ptr.vmem [resolvable:$true] %s151_s29 }
  0x13   : > { %s164_s6 = sshll.u32 %s5935_s5, 4  ;;  %s5806_s9 = scalar_lea.hbm %s6497_s1, 27648  ;;  %s6027_s6 = int_to_ptr.vmem [resolvable:$true] %s164_s6 }
  0x14   : > { %p6023_p12 = pnand %p6501_p9, %p5496_p11  ;;  %p5807_p13 = scmp.ne.s32.totalorder %s6497_s1, %s5806_s9 }
  0x15   : > { %p5813_p3 = scmp.lt.u32.totalorder %s5806_s9, %s6497_s1 }
  0x16   : > { %p5808_p0 = pneg %p6023_p12 }
  0x18   : > { %p5809_p1 = pnand %p5808_p0, %p5807_p13 }
  0x1a   : > { %p5810_p2 = pneg %p5809_p1 }
  0x1c   : > { %p5815_p4 = pnand %p5813_p3, %p5810_p2 }
  0x1e   : > { %5818 = shalt.err (!%p5815_p4)
}
  0x1f   : > { %s5819_s14 = scalar_lea.vmem %s152_s29, 27648  ;;  %p5827_p9 = scmp.lt.s32.totalorder %s152_s29, %s152_s29 }
  0x20   : > { %p5820_p7 = scmp.ne.s32.totalorder %s152_s29, %s5819_s14  ;;  %p5828_p6 = scmp.lt.s32.totalorder %s5819_s14, %s5819_s14 }
  0x22   : > { %p5822_p8 = pnand %p5820_p7, %p5808_p0  ;;  %p5829_p5 = por %p5828_p6, %p5827_p9 }
  0x24   : > { %p5823_p11 = pneg %p5822_p8 }
  0x26   : > { %p5830_p10 = pnand %p5829_p5, %p5823_p11 }
  0x28   : > { %5833 = shalt.err (!%p5830_p10)
}
  0x29   : > { %s5936_s20 = smov 64   ;;  %s5937_s22 = smov 4  }
  0x2a   : > { %5499 = dma.hbm_to_vmem [thread:$0]  (!%p6023_p12), %s6497_s1, 27648, %s152_s29, [#allocation5], %s5936_s20, %s5936_s20, %s5937_s22  }
  0x2b   : > { %s5834_s8 = scalar_lea.hbm %s6498_s2, 4096 }
  0x2c   : > { %p5835_p13 = scmp.ne.s32.totalorder %s6498_s2, %s5834_s8  ;;  %p5841_p9 = scmp.lt.u32.totalorder %s5834_s8, %s6498_s2 }
  0x2e   : > { %p5837_p5 = pnand %p5835_p13, %p5808_p0 }
  0x30   : > { %p5838_p6 = pneg %p5837_p5 }
  0x32   : > { %p5843_p10 = pnand %p5841_p9, %p5838_p6 }
  0x34   : > { %5846 = shalt.err (!%p5843_p10)
}
  0x35   : > { %s5847_s29 = scalar_lea.vmem %s6027_s6, 4096  ;;  %p5855_p4 = scmp.lt.s32.totalorder %s6027_s6, %s6027_s6 }
  0x36   : > { %p5848_p1 = scmp.ne.s32.totalorder %s6027_s6, %s5847_s29  ;;  %p5856_p7 = scmp.lt.s32.totalorder %s5847_s29, %s5847_s29 }
  0x38   : > { %p5850_p2 = pnand %p5848_p1, %p5808_p0  ;;  %p5857_p8 = por %p5856_p7, %p5855_p4 }
  0x3a   : > { %p5851_p3 = pneg %p5850_p2 }
  0x3c   : > { %p5858_p11 = pnand %p5857_p8, %p5851_p3 }
  0x3e   : > { %5861 = shalt.err (!%p5858_p11)
}
  0x3f   : > { %5502 = dma.hbm_to_vmem [thread:$0]  (!%p6023_p12), %s6498_s2, 4096, %s6027_s6, [#allocation8], %s5936_s20, %s5936_s20, %s5937_s22  }
  0x40   : > { %p6508_p13 = scmp.ne.s32.totalorder %s6506_s27, 0 }
  0x41   : > { %p6509_p5 = scmp.eq.s32.totalorder (!%p6508_p13), %s5987_s19, 0 }
  0x42   : > { %191 = sbr.rel (%p6508_p13) target bundleno = 2817 (0xb01), region = 36 }
  0x49   : > { %5907 = dma.done.wait (%p6509_p5), [#allocation5], 27648   ;;  %p6510_p0 = pmov %p6509_p5 }
  0x4b   : > { %5909 = vsyncadd (%p6510_p0), [#allocation5], 4294939648  ;;  %p6511_p6 = pmov %p6510_p0 }
  0x4c   : > { %p6512_p9 = pmov %p6510_p0 }
  0x4d   : > { %5911 = dma.done.wait (%p6511_p6), [#allocation8], 4096  }
  0x4e   : > { %5913 = vsyncadd (%p6512_p9), [#allocation8], 4294963200  ;;  %v5938_v0 = vmov 0.0   ;;  %p220_p12 = scmp.lt.s32.totalorder %s5987_s19, 1  ;;  %v5550_v1 = vld [vmem:[#allocation4] sm:$0xff]   ;;  %v5551_v2 = vld [vmem:[#allocation4 + $0x8] sm:$0xff]  }
  0x4f   : > { %3747 = vst [vmem:[#allocation2 + $0x40] sm:$0xff] %v5938_v0  ;;  %732 = vst [vmem:[#allocation2] sm:$0xff] %v5938_v0  ;;  %4790 = vmatprep.subr.bf16.mxu0 %v5550_v1  ;;  %v5552_v3 = vld [vmem:[#allocation4 + $0x10] sm:$0xff]   ;;  %v5553_v4 = vld [vmem:[#allocation4 + $0x18] sm:$0xff]   ;;  %vm288_vm0 = vsmask.f32 7424 }
  0x50   : > { %733 = vst [vmem:[#allocation2 + $0x8] sm:$0xff] %v5938_v0  ;;  %734 = vst [vmem:[#allocation2 + $0x10] sm:$0xff] %v5938_v0  ;;  %s221_s27 = scalar_select %p220_p12, %s5987_s19, 1  ;;  %4791 = vmatpush3.bf16.msra.mxu0 %v5550_v1  ;;  %v5558_v5 = vld [vmem:[#allocation4 + $0x40] sm:$0xff]   ;;  %v5562_v10 = vld [vmem:[#allocation4 + $0x48] sm:$0xff]   ;;  %vm578_vm1 = vcmask 1046528  }
  0x51   : > { %735 = vst [vmem:[#allocation2 + $0x18] sm:$0xff] %v5938_v0  ;;  %736 = vst [vmem:[#allocation2 + $0x20] sm:$0xff] %v5938_v0  ;;  %4792 = vmatprep.subr.bf16.mxu0 %v5551_v2  ;;  %v5554_v8 = vld [vmem:[#allocation4 + $0x20] sm:$0xff]   ;;  %4766 = vmatprep.subr.bf16.mxu1 %v5558_v5  ;;  %v5565_v14 = vld [vmem:[#allocation4 + $0x50] sm:$0xff]   ;;  %vm5939_vm2 = vmmov 0   ;;  %vm4090_vm3 = vcmask 1043456  }
  0x52   : > { %737 = vst [vmem:[#allocation2 + $0x28] sm:$0xff] %v5938_v0  ;;  %738 = vst [vmem:[#allocation2 + $0x30] sm:$0xff] %v5938_v0  ;;  %s4470_s30 = sshll.u32 %s221_s27, 5  ;;  %4767 = vmatpush3.bf16.msra.mxu1 %v5558_v5  ;;  %v5555_v16 = vld [vmem:[#allocation4 + $0x28] sm:$0xff]   ;;  %v5567_v18 = vld [vmem:[#allocation4 + $0x58] sm:$0xff]   ;;  %s218_s29 = sand.u32 1, %s5924_s16  }
  0x53   : > { %739 = vst [vmem:[#allocation2 + $0x38] sm:$0xff] %v5938_v0  ;;  %780 = vst [vmem:[#allocation3] sm:$0xff] %v5938_v0  ;;  %s6105_s22 = scalar_lea.vmem %s6496_s0, %s4470_s30  ;;  %4768 = vmatprep.subr.bf16.mxu1 %v5562_v10  ;;  %v5556_v21 = vld [vmem:[#allocation4 + $0x30] sm:$0xff]   ;;  %v5569_v24 = vld [vmem:[#allocation4 + $0x60] sm:$0xff]   ;;  %s4467_s13 = sshll.u32 %s5987_s19, 4 }
  0x54   : > { %781 = vst [vmem:[#allocation3 + $0x8] sm:$0xff] %v5938_v0  ;;  %782 = vst [vmem:[#allocation3 + $0x10] sm:$0xff] %v5938_v0  ;;  %4793 = vmatpush3.bf16.msra.mxu0 %v5551_v2  ;;  %v226_v6 = vld [vmem:[%s6105_s22] sm:$0xf]  ;;  %v227_v7 = vld [vmem:[%s6105_s22 + $0x4] sm:$0xf]  ;;  %s6454_s20 = scalar_lea.hbm %s6500_s4, %s4467_s13 }
  0x55   : > { %783 = vst [vmem:[#allocation3 + $0x18] sm:$0xff] %v5938_v0  ;;  %784 = vst [vmem:[#allocation3 + $0x20] sm:$0xff] %v5938_v0  ;;  %4794 = vmatprep.subr.bf16.mxu0 %v5552_v3  ;;  %v4200_v9 = vcombine.low %v226_v6, %v227_v7  ;;  %v6110_v11 = vld [vmem:[%s6105_s22 + $0x8] sm:$0xff]   ;;  %v557_v22 = vld [vmem:[%s6105_s22] sm:$0xe]  ;;  %s219_s14 = scalar_lea.vmem [#allocation9], %s218_s29 }
  0x56   : > { %v297_v15 = vshll.u32 %v6110_v11, 16  ;;  %4769 = vmatpush3.bf16.msra.mxu1 %v5562_v10  ;;  %v5557_v25 = vld [vmem:[#allocation4 + $0x38] sm:$0xff]   ;;  %v4221_v26 = vcombine.low %v557_v22, %v227_v7  ;;  %v6116_v27 = vld [vmem:[%s6105_s22 + $0x10] sm:$0xff]   ;;  %v5571_v28 = vld [vmem:[#allocation4 + $0x68] sm:$0xff]   ;;  %v301_v34 = vshrl.u32 %v6110_v11, 16  ;;  %v580_v36 = vrot.slane %v6110_v11, 1 }
  0x57   : > { %4806 = vmatprep.mubr.bf16.mxu0 %v4200_v9  ;;  %v290_v12 = vshrl.u32 %v4200_v9, 16  ;;  %v292_v13 = vshll.u32 %v4200_v9, 16  ;;  %4770 = vmatprep.subr.bf16.mxu1 %v5565_v14  ;;  %v232_v29 = vld [vmem:[%s6105_s22 + $0x18] sm:$0xf]  ;;  %v250_v30 = vld [vmem:[%s6105_s22 + $0x1c] sm:$0xf] }
  0x58   : > { %4795 = vmatpush3.bf16.msra.mxu0 %v5552_v3  ;;  %v299_v19 = vrot.slane %v297_v15, 1  ;;  %v6120_v31 = vcombine.low %v232_v29, %v250_v30  ;;  %v305_v32 = vshll.u32 %v6116_v27, 16  ;;  %v5561_v33 = vld [vmem:[#allocation4 + $0x80] sm:$0xff]   ;;  %v579_v35 = vrot.slane %v4221_v26, 1  ;;  %v5573_v37 = vld [vmem:[#allocation4 + $0x70] sm:$0xff]   ;;  %v5564_v43 = vld [vmem:[#allocation4 + $0x88] sm:$0xff]  }
  0x59   : > { %4796 = vmatprep.subr.bf16.mxu0 %v5553_v4  ;;  %v294_v17 = vrot.slane %v292_v13, 1  ;;  %v582_v39 = vrot.slane %v6116_v27, 1  ;;  %v309_v41 = vshrl.u32 %v6116_v27, 16  ;;  %v5578_v46 = vld [vmem:[#allocation4 + $0x78] sm:$0xff]   ;;  %v233_v47 = vld [vmem:[%s6105_s22 + $0x1c] sm:$0x7] }
  0x5a   : > { %4771 = vmatpush3.bf16.msra.mxu1 %v5565_v14  ;;  %v307_v38 = vrot.slane %v305_v32, 1  ;;  %v313_v40 = vshll.u32 %v6120_v31, 16  ;;  %v317_v42 = vshrl.u32 %v6120_v31, 16  ;;  %v584_v45 = vrot.slane %v6120_v31, 1  ;;  %v5566_v48 = vld [vmem:[#allocation4 + $0x90] sm:$0xff]   ;;  %v5568_v51 = vld [vmem:[#allocation4 + $0x98] sm:$0xff]  }
  0x5b   : > { %v295_v20 = vor.u32 %v294_v17, %v290_v12  ;;  %4772 = vmatprep.subr.bf16.mxu1 %v5567_v18  ;;  %v303_v49 = vor.u32 %v301_v34, %v299_v19  ;;  %v4212_v52 = vcombine.low %v232_v29, %v233_v47  ;;  %v581_v54 = vsel %vm578_vm1, %v579_v35, %v580_v36  ;;  %v5570_v56 = vld [vmem:[#allocation4 + $0xa0] sm:$0xff]   ;;  %v5572_v57 = vld [vmem:[#allocation4 + $0xa8] sm:$0xff]   ;;  %v5577_v59 = vld [vmem:[#allocation4 + $0xb0] sm:$0xff]   ;;  %s4113_s27 = sshll.u32 %s219_s14, 4  ;;  %s4101_s22 = scalar_lea.sflag [#allocation6], %s218_s29  ;;  %s6456_s27 = int_to_ptr.vmem [resolvable:$true] %s4113_s27 }
  0x5c   : > { %4797 = vmatpush3.bf16.msra.mxu0 %v5553_v4  ;;  %v315_v44 = vrot.slane %v313_v40, 1  ;;  %v311_v50 = vor.u32 %v309_v41, %v307_v38  ;;  %v5579_v60 = vld [vmem:[#allocation4 + $0xb8] sm:$0xff]   ;;  %v583_v61 = vsel %vm578_vm1, %v580_v36, %v582_v39  ;;  %v585_v62 = vsel %vm578_vm1, %v582_v39, %v584_v45  ;;  %v5580_v63 = vld [vmem:[#allocation7] sm:$0xff]   ;;  %v5581_v1 = vld [vmem:[#allocation7 + $0x8] sm:$0xff]   ;;  %s5862_s23 = scalar_lea.vmem %s6456_s27, 16  ;;  %p6513_p1 = scmp.ne.s32.totalorder %s6504_s25, 0 }
  0x5d   : > { %4798 = vmatprep.subr.bf16.mxu0 %v5554_v8  ;;  %v300_v23 = vsel %vm288_vm0, %v295_v20, %v299_v19  ;;  %v308_v53 = vsel %vm288_vm0, %v303_v49, %v307_v38  ;;  %v5582_v2 = vld [vmem:[#allocation7 + $0x10] sm:$0xff]   ;;  %v5583_v3 = vld [vmem:[#allocation7 + $0x18] sm:$0xff]   ;;  %v5584_v4 = vld [vmem:[#allocation7 + $0x20] sm:$0xff]   ;;  %p5863_p10 = scmp.ne.s32.totalorder %s6456_s27, %s5862_s23  ;;  %s5940_s19 = smov [#allocation9]  }
  0x5e   : > { %4782 = vmatprep.mubr.bf16.mxu1 %v300_v23  ;;  %4773 = vmatpush3.bf16.msra.mxu1 %v5567_v18  ;;  %v316_v55 = vsel %vm288_vm0, %v311_v50, %v315_v44  ;;  %v319_v58 = vor.u32 %v317_v42, %v315_v44  ;;  %v5585_v5 = vld [vmem:[#allocation7 + $0x28] sm:$0xff]   ;;  %v5587_v6 = vld [vmem:[#allocation7 + $0x38] sm:$0xff]   ;;  %v6139_v7 = vld [vmem:[#allocation4 + $0x100] sm:$0xff]   ;;  %s5866_s28 = sshll.u32 %s5940_s19, 4  ;;  %s5867_s28 = int_to_ptr.vmem [resolvable:$false] %s5866_s28 }
  0x5f   : > { %4774 = vmatprep.subr.bf16.mxu1 %v5569_v24  ;;  %v4230_v17 = vld [vmem:[%s6499_s3] ss:$0 sm:$0xff]  ;;  %p5864_p2 = pnand %p5863_p10, %p6513_p1  ;;  %s5868_s5 = scalar_lea.vmem %s5867_s28, 32 }
  0x60   : > { %4799 = vmatpush3.bf16.msra.mxu0 %v5554_v8  ;;  %p5869_p4 = scmp.lt.s32.totalorder %s6456_s27, %s5867_s28  ;;  %p5870_p7 = scmp.lt.s32.totalorder %s5868_s5, %s5862_s23 }
  0x61   : > { %4800 = vmatprep.subr.bf16.mxu0 %v5555_v16  ;;  %p5865_p3 = pneg %p5864_p2 }
  0x62   : > { %4775 = vmatpush3.bf16.msra.mxu1 %v5569_v24  ;;  %p5871_p8 = por %p5870_p7, %p5869_p4 }
  0x63   : > { %4776 = vmatprep.subr.bf16.mxu1 %v5571_v28 }
  0x64   : > { %4801 = vmatpush3.bf16.msra.mxu0 %v5555_v16  ;;  %p5872_p11 = pnand %p5871_p8, %p5865_p3 }
  0x65   : > { %4802 = vmatprep.subr.bf16.mxu0 %v5556_v21 }
  0x66   : > { %4777 = vmatpush3.bf16.msra.mxu1 %v5571_v28 }
  0x67   : > { %4778 = vmatprep.subr.bf16.mxu1 %v5573_v37 }
  0x68   : > { %4803 = vmatpush3.bf16.msra.mxu0 %v5556_v21 }
  0x69   : > { %4804 = vmatprep.subr.bf16.mxu0 %v5557_v25 }
  0x6a   : > { %4779 = vmatpush3.bf16.msra.mxu1 %v5573_v37 }
  0x6b   : > { %4780 = vmatprep.subr.bf16.mxu1 %v5578_v46 }
  0x6c   : > { %4805 = vmatpush3.bf16.msra.mxu0 %v5557_v25 }
  0x6d   : > { %4814 = vmatprep.subr.bf16.mxu0 %v5561_v33 }
  0x6e   : > { %4781 = vmatpush3.bf16.msra.mxu1 %v5578_v46 }
  0x6f   : > { %4807 = vmatmul.mubr.bf16.vlgmr.msra.gmra.mrb[0].mxu0 %v6110_v11  ;;  %4838 = vmatprep.subr.bf16.mxu1 %v5580_v63 }
  0x70   : > { %4815 = vmatpush3.bf16.msra.mxu0 %v5561_v33  ;;  %4810 = vmatprep.mubr.bf16.mxu0 %v6116_v27 }
  0x71   : > { %4816 = vmatprep.subr.bf16.mxu0 %v5564_v43  ;;  %4783 = vmatmul.mubr.bf16.vlgmr.msra.gmra.mrb[0].mxu1 %v308_v53 }
  0x72   : > { %4786 = vmatprep.mubr.bf16.mxu1 %v316_v55  ;;  %4839 = vmatpush3.bf16.msra.mxu1 %v5580_v63  ;;  %v6145_v55 = vld [vmem:[#allocation2 + $0x40] sm:$0xff] }
  0x73   : > { %4840 = vmatprep.subr.bf16.mxu1 %v5581_v1 }
  0x74   : > { %4817 = vmatpush3.bf16.msra.mxu0 %v5564_v43 }
  0x75   : > { %4818 = vmatprep.subr.bf16.mxu0 %v5566_v48 }
  0x76   : > { %4841 = vmatpush3.bf16.msra.mxu1 %v5581_v1 }
  0x77   : > { %4811 = vmatmul.mubr.bf16.gmra.mrb[4].mxu0 %v4212_v52  ;;  %4842 = vmatprep.subr.bf16.mxu1 %v5582_v2 }
  0x78   : > { %4819 = vmatpush3.bf16.msra.mxu0 %v5566_v48  ;;  %4830 = vmatprep.mubr.bf16.mxu0 %v581_v54 }
  0x79   : > { %4820 = vmatprep.subr.bf16.mxu0 %v5568_v51  ;;  %4787 = vmatmul.mubr.bf16.gmra.mrb[4].mxu1 %v319_v58 }
  0x7a   : > { %4843 = vmatpush3.bf16.msra.mxu1 %v5582_v2 }
  0x7b   : > { %4844 = vmatprep.subr.bf16.mxu1 %v5583_v3 }
  0x7c   : > { %4821 = vmatpush3.bf16.msra.mxu0 %v5568_v51 }
  0x7d   : > { %4822 = vmatprep.subr.bf16.mxu0 %v5570_v56 }
  0x7e   : > { %4845 = vmatpush3.bf16.msra.mxu1 %v5583_v3 }
  0x7f   : > { %4846 = vmatprep.subr.bf16.mxu1 %v5584_v4 }
  0x80   : > { %4823 = vmatpush3.bf16.msra.mxu0 %v5570_v56 }
  0x81   : > { %4824 = vmatprep.subr.bf16.mxu0 %v5572_v57 }
  0x82   : > { %4847 = vmatpush3.bf16.msra.mxu1 %v5584_v4 }
  0x83   : > { %4848 = vmatprep.subr.bf16.mxu1 %v5585_v5 }
  0x84   : > { %4825 = vmatpush3.bf16.msra.mxu0 %v5572_v57 }
  0x85   : > { %4826 = vmatprep.subr.bf16.mxu0 %v5577_v59 }
  0x86   : > { %4849 = vmatpush3.bf16.msra.mxu1 %v5585_v5 }
  0x88   : > { %4827 = vmatpush3.bf16.msra.mxu0 %v5577_v59 }
  0x89   : > { %4828 = vmatprep.subr.bf16.mxu0 %v5579_v60 }
  0x8c   : > { %4829 = vmatpush3.bf16.msra.mxu0 %v5579_v60 }
  0x8d   : > { %4978 = vmatprep.subr.bf16.mxu0 %v5938_v0  ;;  %v5586_v0 = vld [vmem:[#allocation7 + $0x30] sm:$0xff]  }
  0x8e   : > { %4850 = vmatprep.subr.bf16.mxu1 %v5586_v0 }
  0x8f   : > { %4831 = vmatmul.mubr.bf16.vlgmr.msra.gmra.mrb[0].mxu0 %v583_v61  ;;  %4851 = vmatpush3.bf16.msra.mxu1 %v5586_v0 }
  0x90   : > { %4834 = vmatprep.mubr.bf16.mxu0 %v585_v62  ;;  %4852 = vmatprep.subr.bf16.mxu1 %v5587_v6 }
  0x93   : > { %4853 = vmatpush3.bf16.msra.mxu1 %v5587_v6 }
  0x94   : > { %4858 = vmatprep.subr.bf16.mxu1 %v6139_v7 }
  0x97   : > { %4835 = vmatmul.mubr.bf16.gmra.mrb[4].mxu0 %v584_v45 }
  0x98   : > { %4994 = vmatprep.mubr.msk.bf16.mxu0 %vm5939_vm2, %v6145_v55 }
 0x144   : > { %v4784_v8 = vpop.f32.mrb[0].mxu1 }
 0x145   : > { %v406_v9 = vpop.f32.mrb[1].mxu1 }
 0x146   : > { %v4785_v10 = vpop.f32.mrb[2].mxu1 }
 0x147   : > { %v409_v11 = vpop.f32.mrb[3].mxu1 }
 0x14c   : > { %v4788_v12 = vpop.f32.mrb[4].mxu1 }
 0x14d   : > { %v422_v13 = vpop.f32.mrb[5].mxu1 }
 0x14e   : > { %v4789_v14 = vpop.f32.mrb[6].mxu1 }
 0x14f   : > { %v425_v15 = vpop.f32.mrb[7].mxu1 }
 0x162   : > { %v4832_v16 = vpop.f32.mrb[0].mxu0 }
 0x163   : > { %v5398_v18 = vadd.f32 %v4832_v16, %v4784_v8  ;;  %v672_v19 = vpop.f32.mrb[1].mxu0 }
 0x164   : > { %v5399_v20 = vadd.f32 %v672_v19, %v406_v9  ;;  %v4833_v21 = vpop.f32.mrb[2].mxu0  ;;  %v5590_v19 = vld [vmem:[#allocation4 + $0x110] sm:$0xff]  }
 0x165   : > { %v718_v22 = vadd.f32 %v5398_v18, %v4230_v17  ;;  %v5400_v23 = vadd.f32 %v4833_v21, %v4785_v10  ;;  %v675_v24 = vpop.f32.mrb[3].mxu0  ;;  %v5592_v21 = vld [vmem:[#allocation4 + $0x120] sm:$0xff]  }
 0x166   : > { %v716_v25 = vadd.f32 %v5399_v20, %v4230_v17  ;;  %v5401_v26 = vadd.f32 %v675_v24, %v409_v11  ;;  %v5591_v20 = vld [vmem:[#allocation4 + $0x118] sm:$0xff]  }
 0x167   : > { %v726_v27 = vmax.f32 %v718_v22, 0.0  ;;  %v719_v28 = vadd.f32 %v5400_v23, %v4230_v17  ;;  %v5593_v22 = vld [vmem:[#allocation4 + $0x128] sm:$0xff]   ;;  %v5594_v23 = vld [vmem:[#allocation4 + $0x130] sm:$0xff]   ;;  %v5595_v24 = vld [vmem:[#allocation4 + $0x138] sm:$0xff]  }
 0x168   : > { %v724_v29 = vmax.f32 %v716_v25, 0.0  ;;  %v717_v30 = vadd.f32 %v5401_v26, %v4230_v17  ;;  %v5597_v25 = vld [vmem:[#allocation4 + $0xc8] sm:$0xff]  }
 0x169   : > { %743 = vst [vmem:[#allocation2 + $0x11] sm:$0xff] %v726_v27  ;;  %v727_v31 = vmax.f32 %v719_v28, 0.0  ;;  %v5598_v27 = vld [vmem:[#allocation4 + $0xd0] sm:$0xff]   ;;  %v5599_v28 = vld [vmem:[#allocation4 + $0xd8] sm:$0xff]  }
 0x16a   : > { %741 = vst [vmem:[#allocation2 + $0x1] sm:$0xff] %v724_v29  ;;  %v725_v32 = vmax.f32 %v717_v30, 0.0  ;;  %v4836_v33 = vpop.f32.mrb[4].mxu0  ;;  %v5600_v29 = vld [vmem:[#allocation4 + $0xe0] sm:$0xff]   ;;  %v5601_v30 = vld [vmem:[#allocation4 + $0xe8] sm:$0xff]  }
 0x16b   : > { %744 = vst [vmem:[#allocation2 + $0x19] sm:$0xff] %v727_v31  ;;  %v5402_v34 = vadd.f32 %v4836_v33, %v4788_v12  ;;  %v688_v35 = vpop.f32.mrb[5].mxu0  ;;  %v5602_v31 = vld [vmem:[#allocation4 + $0xf0] sm:$0xff]   ;;  %v5604_v33 = vld [vmem:[#allocation4 + $0x140] sm:$0xff]  }
 0x16c   : > { %742 = vst [vmem:[#allocation2 + $0x9] sm:$0xff] %v725_v32  ;;  %v5403_v36 = vadd.f32 %v688_v35, %v422_v13  ;;  %v4837_v37 = vpop.f32.mrb[6].mxu0  ;;  %v5589_v13 = vld [vmem:[#allocation4 + $0x108] sm:$0xff]   ;;  %v5603_v32 = vld [vmem:[#allocation4 + $0xf8] sm:$0xff]  }
 0x16d   : > { %v722_v38 = vadd.f32 %v5402_v34, %v4230_v17  ;;  %v5404_v39 = vadd.f32 %v4837_v37, %v4789_v14  ;;  %v691_v40 = vpop.f32.mrb[7].mxu0  ;;  %v5605_v35 = vld [vmem:[#allocation4 + $0x148] sm:$0xff]   ;;  %v5606_v37 = vld [vmem:[#allocation4 + $0x150] sm:$0xff]  }
 0x16e   : > { %v720_v41 = vadd.f32 %v5403_v36, %v4230_v17  ;;  %v5405_v42 = vadd.f32 %v691_v40, %v425_v15  ;;  %v5609_v40 = vld [vmem:[#allocation4 + $0x168] sm:$0xff]  }
 0x16f   : > { %v730_v43 = vmax.f32 %v722_v38, 0.0  ;;  %v723_v44 = vadd.f32 %v5404_v39, %v4230_v17  ;;  %v5607_v38 = vld [vmem:[#allocation4 + $0x158] sm:$0xff]   ;;  %v5608_v39 = vld [vmem:[#allocation4 + $0x160] sm:$0xff]  }
 0x170   : > { %v728_v45 = vmax.f32 %v720_v41, 0.0  ;;  %v721_v46 = vadd.f32 %v5405_v42, %v4230_v17  ;;  %v5610_v41 = vld [vmem:[#allocation4 + $0x170] sm:$0xff]   ;;  %v5611_v42 = vld [vmem:[#allocation4 + $0x178] sm:$0xff]  }
 0x171   : > { %747 = vst [vmem:[#allocation2 + $0x31] sm:$0xff] %v730_v43  ;;  %v731_v47 = vmax.f32 %v723_v44, 0.0  ;;  %v5612_v43 = vld [vmem:[#allocation4 + $0x1c0] sm:$0xff]  }
 0x172   : > { %v759_v48 = vld [vmem:[#allocation2 + $0x11] ss:$2 sm:$0xff]  ;;  %v767_v49 = vld [vmem:[#allocation2 + $0x12] ss:$2 sm:$0xff]  ;;  %745 = vst [vmem:[#allocation2 + $0x21] sm:$0xff] %v728_v45  ;;  %v729_v50 = vmax.f32 %v721_v46, 0.0 }
 0x173   : > { %v749_v51 = vld [vmem:[#allocation2] ss:$2 sm:$0xff]  ;;  %v751_v52 = vld [vmem:[#allocation2 + $0x10] ss:$2 sm:$0xff]  ;;  %v757_v53 = vld [vmem:[#allocation2 + $0x1] ss:$2 sm:$0xff] }
 0x174   : > { %748 = vst [vmem:[#allocation2 + $0x39] sm:$0x3f] %v731_v47  ;;  %v765_v54 = vld [vmem:[#allocation2 + $0x2] ss:$2 sm:$0xff]  ;;  %1291 = vst [vmem:[#allocation2 + $0x18] sm:$0xff] %v6145_v55  ;;  %v772_v56 = vmax.f32 %v749_v51, %v757_v53  ;;  %v773_v57 = vmax.f32 %v751_v52, %v759_v48  ;;  %v5613_v45 = vld [vmem:[#allocation4 + $0x1c8] sm:$0xff]  }
 0x175   : > { %746 = vst [vmem:[#allocation2 + $0x29] sm:$0xff] %v729_v50  ;;  %1289 = vst [vmem:[#allocation2 + $0x8] sm:$0xff] %v6145_v55  ;;  %v5614_v46 = vld [vmem:[#allocation4 + $0x1d0] sm:$0xff]   ;;  %v5615_v47 = vld [vmem:[#allocation4 + $0x1d8] sm:$0xff]  }
 0x176   : > { %1290 = vst [vmem:[#allocation2 + $0x10] sm:$0xff] %v6145_v55  ;;  %1288 = vst [vmem:[#allocation2] sm:$0xff] %v6145_v55  ;;  %v776_v58 = vmax.f32 %v772_v56, %v765_v54  ;;  %v777_v59 = vmax.f32 %v773_v57, %v767_v49  ;;  %v5616_v48 = vld [vmem:[#allocation4 + $0x1e0] sm:$0xff]   ;;  %v5617_v49 = vld [vmem:[#allocation4 + $0x1e8] sm:$0xff]  }
 0x177   : > { %v5618_v50 = vld [vmem:[#allocation4 + $0x1f0] sm:$0xff]   ;;  %v5619_v51 = vld [vmem:[#allocation4 + $0x1f8] sm:$0xff]   ;;  %v5620_v52 = vld [vmem:[#allocation4 + $0x180] sm:$0xff]  }
 0x178   : > { %789 = vst [vmem:[#allocation3 + $0x1] sm:$0xff] %v776_v58  ;;  %790 = vst [vmem:[#allocation3 + $0x9] sm:$0xff] %v777_v59  ;;  %v797_v60 = vpack.c.bf16 %v777_v59, %v776_v58  ;;  %v5636_v53 = vld [vmem:[#allocation7 + $0x40] sm:$0xff]   ;;  %v5637_v54 = vld [vmem:[#allocation7 + $0x48] sm:$0xff]  }
 0x179   : > { %4979 = vmatpush3.bf16.msra.mxu0 %v5636_v53  ;;  %v5638_v56 = vld [vmem:[#allocation7 + $0x50] sm:$0xff]  }
 0x17a   : > { %4854 = vmatprep.mubr.bf16.mxu1 %v797_v60  ;;  %4980 = vmatprep.subr.bf16.mxu0 %v6145_v55  ;;  %v4264_v57 = vld [vmem:[%s6499_s3 + $0x1] ss:$0 sm:$0xff] }
 0x17b   : > { %v763_v61 = vld [vmem:[#allocation2 + $0x31] ss:$2 sm:$0x7f]  ;;  %v771_v62 = vld [vmem:[#allocation2 + $0x32] ss:$2 sm:$0x7f] }
 0x17c   : > { %v753_v63 = vld [vmem:[#allocation2 + $0x20] ss:$2 sm:$0xff]  ;;  %v755_v1 = vld [vmem:[#allocation2 + $0x30] ss:$2 sm:$0x7f] }
 0x17d   : > { %v761_v2 = vld [vmem:[#allocation2 + $0x21] ss:$2 sm:$0xff]  ;;  %v769_v3 = vld [vmem:[#allocation2 + $0x22] ss:$2 sm:$0xff]  ;;  %3746 = vst [vmem:[#allocation2 + $0x38] sm:$0xff] %v6145_v55  ;;  %v775_v4 = vmax.f32 %v755_v1, %v763_v61  ;;  %4981 = vmatpush3.bf16.msra.mxu0 %v5637_v54 }
 0x17e   : > { %3744 = vst [vmem:[#allocation2 + $0x28] sm:$0xff] %v6145_v55  ;;  %3745 = vst [vmem:[#allocation2 + $0x30] sm:$0xff] %v6145_v55  ;;  %v774_v5 = vmax.f32 %v753_v63, %v761_v2  ;;  %4982 = vmatprep.subr.bf16.mxu0 %v6145_v55 }
 0x17f   : > { %1292 = vst [vmem:[#allocation2 + $0x20] sm:$0xff] %v6145_v55  ;;  %v779_v0 = vmax.f32 %v775_v4, %v771_v62  ;;  %v6155_v6 = vld [vmem:[#allocation3 + $0x2] sm:$0xff] }
 0x180   : > { %v778_v8 = vmax.f32 %v774_v5, %v769_v3  ;;  %v917_v9 = vld [vmem:[#allocation3] sm:$0xff]  ;;  %v918_v14 = vld [vmem:[#allocation3 + $0x8] sm:$0xff] }
 0x181   : > { %792 = vst [vmem:[#allocation3 + $0x19] sm:$0x7f] %v779_v0  ;;  %1682 = vst [vmem:[#allocation3] sm:$0xff] %v6145_v55  ;;  %v938_v26 = vpack.c.bf16 %v918_v14, %v917_v9  ;;  %4983 = vmatpush3.bf16.msra.mxu0 %v5638_v56 }
 0x182   : > { %791 = vst [vmem:[#allocation3 + $0x11] sm:$0xff] %v778_v8  ;;  %4984 = vmatprep.subr.bf16.mxu0 %v6145_v55 }
 0x188   : > { %v796_v10 = vld [vmem:[#allocation3 + $0x19] sm:$0x7f] }
 0x189   : > { %v6158_v11 = vld [vmem:[#allocation3 + $0x1a] sm:$0x7f]  ;;  %v798_v12 = vpack.c.bf16 %v796_v10, %v778_v8  ;;  %v6160_v15 = vld [vmem:[#allocation3 + $0xa] sm:$0xff]  ;;  %v6164_v18 = vld [vmem:[#allocation3 + $0x12] sm:$0xff] }
 0x18a   : > { %1686 = vst [vmem:[#allocation3 + $0x20] sm:$0xff] %v6145_v55  ;;  %1683 = vst [vmem:[#allocation3 + $0x8] sm:$0xff] %v6145_v55  ;;  %v919_v16 = vld [vmem:[#allocation3 + $0x10] sm:$0xff]  ;;  %v920_v17 = vld [vmem:[#allocation3 + $0x18] sm:$0x7f]  ;;  %v1172_v36 = vpack.c.bf16 %v6160_v15, %v6155_v6  ;;  %v1173_v44 = vpack.c.bf16 %v6158_v11, %v6164_v18 }
 0x18b   : > { %4855 = vmatmul.mubr.bf16.vlgmr.msra.gmra.mrb[8].mxu1 %v798_v12  ;;  %1684 = vst [vmem:[#allocation3 + $0x10] sm:$0xff] %v6145_v55  ;;  %1685 = vst [vmem:[#allocation3 + $0x18] sm:$0xff] %v6145_v55  ;;  %v939_v34 = vpack.c.bf16 %v920_v17, %v919_v16  ;;  %v5621_v8 = vld [vmem:[#allocation4 + $0x188] sm:$0xff]  }
 0x18c   : > { %4859 = vmatpush3.bf16.msra.mxu1 %v6139_v7  ;;  %4874 = vmatprep.mubr.bf16.mxu1 %v797_v60  ;;  %v5596_v7 = vld [vmem:[#allocation4 + $0xc0] sm:$0xff]  }
 0x18d   : > { %4860 = vmatprep.subr.bf16.mxu1 %v5589_v13 }
 0x190   : > { %4861 = vmatpush3.bf16.msra.mxu1 %v5589_v13 }
 0x191   : > { %4862 = vmatprep.subr.bf16.mxu1 %v5590_v19 }
 0x194   : > { %4863 = vmatpush3.bf16.msra.mxu1 %v5590_v19 }
 0x195   : > { %4864 = vmatprep.subr.bf16.mxu1 %v5591_v20 }
 0x198   : > { %4865 = vmatpush3.bf16.msra.mxu1 %v5591_v20  ;;  %v5622_v20 = vld [vmem:[#allocation4 + $0x190] sm:$0xff]  }
 0x199   : > { %4866 = vmatprep.subr.bf16.mxu1 %v5592_v21 }
 0x19c   : > { %4867 = vmatpush3.bf16.msra.mxu1 %v5592_v21  ;;  %v5623_v21 = vld [vmem:[#allocation4 + $0x198] sm:$0xff]  }
 0x19d   : > { %4868 = vmatprep.subr.bf16.mxu1 %v5593_v22 }
 0x1a0   : > { %4869 = vmatpush3.bf16.msra.mxu1 %v5593_v22  ;;  %v5624_v22 = vld [vmem:[#allocation4 + $0x1a0] sm:$0xff]  }
 0x1a1   : > { %4870 = vmatprep.subr.bf16.mxu1 %v5594_v23 }
 0x1a4   : > { %4871 = vmatpush3.bf16.msra.mxu1 %v5594_v23  ;;  %v5625_v23 = vld [vmem:[#allocation4 + $0x1a8] sm:$0xff]  }
 0x1a5   : > { %4872 = vmatprep.subr.bf16.mxu1 %v5595_v24 }
 0x1a8   : > { %4873 = vmatpush3.bf16.msra.mxu1 %v5595_v24  ;;  %v5626_v24 = vld [vmem:[#allocation4 + $0x1b0] sm:$0xff]  }
 0x1a9   : > { %4878 = vmatprep.subr.bf16.mxu1 %v5596_v7 }
 0x1ab   : > { %4875 = vmatmul.mubr.bf16.vlgmr.msra.gmra.mrb[12].mxu1 %v798_v12 }
 0x1ac   : > { %4879 = vmatpush3.bf16.msra.mxu1 %v5596_v7  ;;  %4894 = vmatprep.mubr.bf16.mxu1 %v938_v26  ;;  %v5627_v7 = vld [vmem:[#allocation4 + $0x1b8] sm:$0xff]  }
 0x1ad   : > { %4880 = vmatprep.subr.bf16.mxu1 %v5597_v25 }
 0x1b0   : > { %4881 = vmatpush3.bf16.msra.mxu1 %v5597_v25  ;;  %v5628_v25 = vld [vmem:[#allocation4 + $0x200] sm:$0xff]  }
 0x1b1   : > { %4882 = vmatprep.subr.bf16.mxu1 %v5598_v27 }
 0x1b4   : > { %4883 = vmatpush3.bf16.msra.mxu1 %v5598_v27  ;;  %v5629_v27 = vld [vmem:[#allocation4 + $0x208] sm:$0xff]  }
 0x1b5   : > { %4884 = vmatprep.subr.bf16.mxu1 %v5599_v28 }
 0x1b8   : > { %4885 = vmatpush3.bf16.msra.mxu1 %v5599_v28 }
 0x1b9   : > { %4886 = vmatprep.subr.bf16.mxu1 %v5600_v29 }
 0x1bc   : > { %4887 = vmatpush3.bf16.msra.mxu1 %v5600_v29  ;;  %v5630_v29 = vld [vmem:[#allocation4 + $0x210] sm:$0xff]  }
 0x1bd   : > { %4888 = vmatprep.subr.bf16.mxu1 %v5601_v30 }
 0x1c0   : > { %4889 = vmatpush3.bf16.msra.mxu1 %v5601_v30  ;;  %v5631_v30 = vld [vmem:[#allocation4 + $0x218] sm:$0xff]  }
 0x1c1   : > { %4890 = vmatprep.subr.bf16.mxu1 %v5602_v31 }
 0x1c4   : > { %4891 = vmatpush3.bf16.msra.mxu1 %v5602_v31  ;;  %v5632_v31 = vld [vmem:[#allocation4 + $0x220] sm:$0xff]  }
 0x1c5   : > { %4892 = vmatprep.subr.bf16.mxu1 %v5603_v32 }
 0x1c8   : > { %4893 = vmatpush3.bf16.msra.mxu1 %v5603_v32  ;;  %v5633_v32 = vld [vmem:[#allocation4 + $0x228] sm:$0xff]  }
 0x1c9   : > { %4898 = vmatprep.subr.bf16.mxu1 %v5604_v33 }
 0x1cb   : > { %4895 = vmatmul.mubr.bf16.vlgmr.msra.gmra.mrb[12].mxu1 %v939_v34  ;;  %v5635_v34 = vld [vmem:[#allocation4 + $0x238] sm:$0xff]  }
 0x1cc   : > { %4899 = vmatpush3.bf16.msra.mxu1 %v5604_v33  ;;  %4914 = vmatprep.mubr.bf16.mxu1 %v1172_v36  ;;  %v5634_v33 = vld [vmem:[#allocation4 + $0x230] sm:$0xff]   ;;  %v5639_v36 = vld [vmem:[#allocation7 + $0x58] sm:$0xff]  }
 0x1cd   : > { %4900 = vmatprep.subr.bf16.mxu1 %v5605_v35  ;;  %4985 = vmatpush3.bf16.msra.mxu0 %v5639_v36  ;;  %v5675_v36 = vld [vmem:[#allocation4 + $0x378] sm:$0xff]  }
 0x1ce   : > { %4986 = vmatprep.subr.bf16.mxu0 %v6145_v55 }
 0x1d0   : > { %4901 = vmatpush3.bf16.msra.mxu1 %v5605_v35 }
 0x1d1   : > { %4902 = vmatprep.subr.bf16.mxu1 %v5606_v37 }
 0x1d4   : > { %4903 = vmatpush3.bf16.msra.mxu1 %v5606_v37  ;;  %v5640_v37 = vld [vmem:[#allocation7 + $0x60] sm:$0xff]  }
 0x1d5   : > { %4904 = vmatprep.subr.bf16.mxu1 %v5607_v38  ;;  %4987 = vmatpush3.bf16.msra.mxu0 %v5640_v37 }
 0x1d6   : > { %4988 = vmatprep.subr.bf16.mxu0 %v6145_v55 }
 0x1d8   : > { %4905 = vmatpush3.bf16.msra.mxu1 %v5607_v38  ;;  %v5641_v38 = vld [vmem:[#allocation7 + $0x68] sm:$0xff]  }
 0x1d9   : > { %4906 = vmatprep.subr.bf16.mxu1 %v5608_v39  ;;  %4989 = vmatpush3.bf16.msra.mxu0 %v5641_v38 }
 0x1da   : > { %4990 = vmatprep.subr.bf16.mxu0 %v6145_v55 }
 0x1dc   : > { %4907 = vmatpush3.bf16.msra.mxu1 %v5608_v39  ;;  %v5642_v39 = vld [vmem:[#allocation7 + $0x70] sm:$0xff]  }
 0x1dd   : > { %4908 = vmatprep.subr.bf16.mxu1 %v5609_v40  ;;  %4991 = vmatpush3.bf16.msra.mxu0 %v5642_v39 }
 0x1de   : > { %4992 = vmatprep.subr.bf16.mxu0 %v6145_v55 }
 0x1e0   : > { %4909 = vmatpush3.bf16.msra.mxu1 %v5609_v40  ;;  %v5643_v40 = vld [vmem:[#allocation7 + $0x78] sm:$0xff]  }
 0x1e1   : > { %4910 = vmatprep.subr.bf16.mxu1 %v5610_v41  ;;  %4993 = vmatpush3.bf16.msra.mxu0 %v5643_v40 }
 0x1e2   : > { %4998 = vmatprep.subr.bf16.mxu0 %v6145_v55 }
 0x1e4   : > { %4911 = vmatpush3.bf16.msra.mxu1 %v5610_v41  ;;  %v4231_v41 = vld [vmem:[%s6499_s3 + $0x3] ss:$0 sm:$0xff] }
 0x1e5   : > { %4912 = vmatprep.subr.bf16.mxu1 %v5611_v42 }
 0x1e8   : > { %4913 = vmatpush3.bf16.msra.mxu1 %v5611_v42 }
 0x1e9   : > { %4918 = vmatprep.subr.bf16.mxu1 %v5612_v43 }
 0x1eb   : > { %4915 = vmatmul.mubr.bf16.vlgmr.msra.gmra.mrb[12].mxu1 %v1173_v44 }
 0x1ec   : > { %4919 = vmatpush3.bf16.msra.mxu1 %v5612_v43  ;;  %v4289_v43 = vld [vmem:[%s6499_s3 + $0x2] ss:$0 sm:$0xff] }
 0x1ed   : > { %4920 = vmatprep.subr.bf16.mxu1 %v5613_v45 }
 0x1f0   : > { %4921 = vmatpush3.bf16.msra.mxu1 %v5613_v45 }
 0x1f1   : > { %4922 = vmatprep.subr.bf16.mxu1 %v5614_v46 }
 0x1f4   : > { %4923 = vmatpush3.bf16.msra.mxu1 %v5614_v46 }
 0x1f5   : > { %4924 = vmatprep.subr.bf16.mxu1 %v5615_v47 }
 0x1f8   : > { %4925 = vmatpush3.bf16.msra.mxu1 %v5615_v47 }
 0x1f9   : > { %4926 = vmatprep.subr.bf16.mxu1 %v5616_v48 }
 0x1fc   : > { %4927 = vmatpush3.bf16.msra.mxu1 %v5616_v48 }
 0x1fd   : > { %4928 = vmatprep.subr.bf16.mxu1 %v5617_v49 }
 0x200   : > { %4929 = vmatpush3.bf16.msra.mxu1 %v5617_v49 }
 0x201   : > { %4930 = vmatprep.subr.bf16.mxu1 %v5618_v50 }
 0x204   : > { %4931 = vmatpush3.bf16.msra.mxu1 %v5618_v50 }
 0x205   : > { %4932 = vmatprep.subr.bf16.mxu1 %v5619_v51 }
 0x208   : > { %4933 = vmatpush3.bf16.msra.mxu1 %v5619_v51 }
 0x209   : > { %4938 = vmatprep.subr.bf16.mxu1 %v5620_v52 }
 0x2be   : > { %v4916_v58 = vpop.f32.mrb[12].mxu1 }
 0x2bf   : > { %v1282_v59 = vadd.f32 %v4916_v58, %v4264_v57  ;;  %v1256_v60 = vpop.f32.mrb[13].mxu1 }
 0x2c0   : > { %v1280_v61 = vadd.f32 %v4264_v57, %v1256_v60  ;;  %v4917_v62 = vpop.f32.mrb[14].mxu1 }
 0x2c1   : > { %v1286_v63 = vmax.f32 %v1282_v59, 0.0  ;;  %v1283_v1 = vadd.f32 %v4917_v62, %v4264_v57  ;;  %v1259_v2 = vpop.f32.mrb[15].mxu1 }
 0x2c2   : > { %v1284_v3 = vmax.f32 %v1280_v61, 0.0  ;;  %v1281_v4 = vadd.f32 %v4264_v57, %v1259_v2 }
 0x2c3   : > { %1299 = vst [vmem:[#allocation2 + $0x11] sm:$0xff] %v1286_v63  ;;  %v1287_v5 = vmax.f32 %v1283_v1, 0.0 }
 0x2c4   : > { %1297 = vst [vmem:[#allocation2 + $0x1] sm:$0xff] %v1284_v3  ;;  %v1285_v0 = vmax.f32 %v1281_v4, 0.0 }
 0x2c5   : > { %1300 = vst [vmem:[#allocation2 + $0x19] sm:$0x7f] %v1287_v5  ;;  %v5645_v5 = vld [vmem:[#allocation4 + $0x288] sm:$0xff]  }
 0x2c6   : > { %1298 = vst [vmem:[#allocation2 + $0x9] sm:$0xff] %v1285_v0  ;;  %v1345_v6 = vpack.c.bf16 %v1285_v0, %v1284_v3  ;;  %v5646_v0 = vld [vmem:[#allocation4 + $0x290] sm:$0xff]  }
 0x2c8   : > { %4934 = vmatprep.mubr.bf16.mxu1 %v1345_v6  ;;  %v5647_v6 = vld [vmem:[#allocation4 + $0x298] sm:$0xff]  }
 0x2cb   : > { %v1301_v10 = vld [vmem:[#allocation2] sm:$0xff] }
 0x2cc   : > { %v1327_v9 = vld [vmem:[#allocation2 + $0x19] sm:$0x7f] }
 0x2cd   : > { %v1304_v11 = vld [vmem:[#allocation2 + $0x18] sm:$0x7f]  ;;  %v1541_v12 = vld [vmem:[#allocation2 + $0x2] sm:$0xff]  ;;  %v1346_v13 = vpack.c.bf16 %v1327_v9, %v1286_v63  ;;  %v1303_v17 = vld [vmem:[#allocation2 + $0x10] sm:$0xff] }
 0x2ce   : > { %v1302_v14 = vld [vmem:[#allocation2 + $0x8] sm:$0xff]  ;;  %v6179_v15 = vld [vmem:[#allocation2 + $0x12] sm:$0xff]  ;;  %2149 = vst [vmem:[#allocation2] sm:$0xff] %v6145_v55  ;;  %v1544_v19 = vld [vmem:[#allocation2 + $0x1a] sm:$0x7f]  ;;  %v1323_v26 = vpack.c.bf16 %v1304_v11, %v1303_v17 }
 0x2cf   : > { %v1322_v16 = vpack.c.bf16 %v1302_v14, %v1301_v10  ;;  %v1542_v18 = vld [vmem:[#allocation2 + $0xa] sm:$0xff]  ;;  %4935 = vmatmul.mubr.bf16.vlgmr.msra.gmra.mrb[8].mxu1 %v1346_v13  ;;  %3742 = vst [vmem:[#allocation2 + $0x18] sm:$0xff] %v6145_v55  ;;  %3743 = vst [vmem:[#allocation2 + $0x20] sm:$0xff] %v6145_v55  ;;  %v1563_v35 = vpack.c.bf16 %v1544_v19, %v6179_v15  ;;  %v5649_v9 = vld [vmem:[#allocation4 + $0x2a8] sm:$0xff]  }
 0x2d0   : > { %2150 = vst [vmem:[#allocation2 + $0x8] sm:$0xff] %v6145_v55  ;;  %2151 = vst [vmem:[#allocation2 + $0x10] sm:$0xff] %v6145_v55  ;;  %4939 = vmatpush3.bf16.msra.mxu1 %v5620_v52  ;;  %v1562_v28 = vpack.c.bf16 %v1542_v18, %v1541_v12  ;;  %v5644_v63 = vld [vmem:[#allocation4 + $0x280] sm:$0xff]   ;;  %v5650_v10 = vld [vmem:[#allocation4 + $0x2b0] sm:$0xff]  }
 0x2d1   : > { %4954 = vmatprep.mubr.bf16.mxu1 %v1322_v16  ;;  %4940 = vmatprep.subr.bf16.mxu1 %v5621_v8  ;;  %v5651_v11 = vld [vmem:[#allocation4 + $0x2b8] sm:$0xff]   ;;  %v5652_v12 = vld [vmem:[#allocation4 + $0x240] sm:$0xff]   ;;  %v5653_v13 = vld [vmem:[#allocation4 + $0x248] sm:$0xff]  }
 0x2d2   : > { %v5654_v14 = vld [vmem:[#allocation4 + $0x250] sm:$0xff]   ;;  %v5655_v15 = vld [vmem:[#allocation4 + $0x258] sm:$0xff]   ;;  %v5656_v16 = vld [vmem:[#allocation4 + $0x260] sm:$0xff]  }
 0x2d3   : > { %v5657_v17 = vld [vmem:[#allocation4 + $0x268] sm:$0xff]   ;;  %v5658_v18 = vld [vmem:[#allocation4 + $0x270] sm:$0xff]   ;;  %v5659_v19 = vld [vmem:[#allocation4 + $0x278] sm:$0xff]  }
 0x2d4   : > { %4941 = vmatpush3.bf16.msra.mxu1 %v5621_v8  ;;  %v5648_v8 = vld [vmem:[#allocation4 + $0x2a0] sm:$0xff]  }
 0x2d5   : > { %4942 = vmatprep.subr.bf16.mxu1 %v5622_v20 }
 0x2d8   : > { %4943 = vmatpush3.bf16.msra.mxu1 %v5622_v20  ;;  %v5660_v20 = vld [vmem:[#allocation4 + $0x2c0] sm:$0xff]  }
 0x2d9   : > { %4944 = vmatprep.subr.bf16.mxu1 %v5623_v21 }
 0x2dc   : > { %4945 = vmatpush3.bf16.msra.mxu1 %v5623_v21 }
 0x2dd   : > { %4946 = vmatprep.subr.bf16.mxu1 %v5624_v22 }
 0x2e0   : > { %4947 = vmatpush3.bf16.msra.mxu1 %v5624_v22  ;;  %v5661_v22 = vld [vmem:[#allocation4 + $0x2c8] sm:$0xff]  }
 0x2e1   : > { %4948 = vmatprep.subr.bf16.mxu1 %v5625_v23 }
 0x2e4   : > { %4949 = vmatpush3.bf16.msra.mxu1 %v5625_v23  ;;  %v5662_v23 = vld [vmem:[#allocation4 + $0x2d0] sm:$0xff]  }
 0x2e5   : > { %4950 = vmatprep.subr.bf16.mxu1 %v5626_v24 }
 0x2e8   : > { %4951 = vmatpush3.bf16.msra.mxu1 %v5626_v24  ;;  %v5663_v24 = vld [vmem:[#allocation4 + $0x2d8] sm:$0xff]  }
 0x2e9   : > { %4952 = vmatprep.subr.bf16.mxu1 %v5627_v7 }
 0x2ec   : > { %4953 = vmatpush3.bf16.msra.mxu1 %v5627_v7  ;;  %v5664_v7 = vld [vmem:[#allocation4 + $0x2e0] sm:$0xff]  }
 0x2ed   : > { %4958 = vmatprep.subr.bf16.mxu1 %v5628_v25 }
 0x2ef   : > { %4955 = vmatmul.mubr.bf16.vlgmr.msra.gmra.mrb[8].mxu1 %v1323_v26  ;;  %v5666_v26 = vld [vmem:[#allocation4 + $0x2f0] sm:$0xff]  }
 0x2f0   : > { %4959 = vmatpush3.bf16.msra.mxu1 %v5628_v25  ;;  %4974 = vmatprep.mubr.bf16.mxu1 %v1562_v28  ;;  %v5665_v25 = vld [vmem:[#allocation4 + $0x2e8] sm:$0xff]  }
 0x2f1   : > { %4960 = vmatprep.subr.bf16.mxu1 %v5629_v27 }
 0x2f4   : > { %4961 = vmatpush3.bf16.msra.mxu1 %v5629_v27  ;;  %v5667_v27 = vld [vmem:[#allocation4 + $0x2f8] sm:$0xff]  }
 0x2f5   : > { %4962 = vmatprep.subr.bf16.mxu1 %v5630_v29 }
 0x2f8   : > { %4963 = vmatpush3.bf16.msra.mxu1 %v5630_v29  ;;  %v5668_v29 = vld [vmem:[#allocation4 + $0x340] sm:$0xff]  }
 0x2f9   : > { %4964 = vmatprep.subr.bf16.mxu1 %v5631_v30 }
 0x2fc   : > { %4965 = vmatpush3.bf16.msra.mxu1 %v5631_v30  ;;  %v5669_v30 = vld [vmem:[#allocation4 + $0x348] sm:$0xff]  }
 0x2fd   : > { %4966 = vmatprep.subr.bf16.mxu1 %v5632_v31 }
 0x300   : > { %4967 = vmatpush3.bf16.msra.mxu1 %v5632_v31  ;;  %v5670_v31 = vld [vmem:[#allocation4 + $0x350] sm:$0xff]  }
 0x301   : > { %4968 = vmatprep.subr.bf16.mxu1 %v5633_v32 }
 0x304   : > { %4969 = vmatpush3.bf16.msra.mxu1 %v5633_v32  ;;  %v5671_v32 = vld [vmem:[#allocation4 + $0x358] sm:$0xff]  }
 0x305   : > { %4970 = vmatprep.subr.bf16.mxu1 %v5634_v33 }
 0x308   : > { %4971 = vmatpush3.bf16.msra.mxu1 %v5634_v33  ;;  %v5672_v33 = vld [vmem:[#allocation4 + $0x360] sm:$0xff]  }
 0x309   : > { %4972 = vmatprep.subr.bf16.mxu1 %v5635_v34 }
 0x30c   : > { %4973 = vmatpush3.bf16.msra.mxu1 %v5635_v34  ;;  %v5673_v34 = vld [vmem:[#allocation4 + $0x368] sm:$0xff]  }
 0x30d   : > { %5118 = vmatprep.subr.bf16.mxu1 %v6145_v55 }
 0x30f   : > { %4975 = vmatmul.mubr.bf16.vlgmr.msra.gmra.mrb[8].mxu1 %v1563_v35  ;;  %v5674_v35 = vld [vmem:[#allocation4 + $0x370] sm:$0xff]  }
 0x310   : > { %5134 = vmatprep.mubr.msk.bf16.mxu1 %vm5939_vm2, %v6145_v55 }
 0x3e2   : > { %v4976_v42 = vpop.f32.mrb[8].mxu1 }
 0x3e3   : > { %v5406_v44 = vadd.f32 %v4976_v42, %v4231_v41  ;;  %v1646_v45 = vpop.f32.mrb[9].mxu1  ;;  %v5694_v42 = vld [vmem:[#allocation7 + $0x88] sm:$0xff]  }
 0x3e4   : > { %v5408_v46 = vadd.f32 %v4231_v41, %v1646_v45  ;;  %v4977_v47 = vpop.f32.mrb[10].mxu1 }
 0x3e5   : > { %v5407_v48 = vadd.f32 %v5406_v44, %v4289_v43  ;;  %v5410_v49 = vadd.f32 %v4977_v47, %v4231_v41  ;;  %v1649_v50 = vpop.f32.mrb[11].mxu1  ;;  %v5698_v44 = vld [vmem:[#allocation7 + $0x98] sm:$0xff]  }
 0x3e6   : > { %v5409_v51 = vadd.f32 %v5408_v46, %v4289_v43  ;;  %v5412_v52 = vadd.f32 %v4231_v41, %v1649_v50  ;;  %v5692_v41 = vld [vmem:[#allocation7 + $0x80] sm:$0xff]  }
 0x3e7   : > { %v1680_v53 = vmax.f32 %v5407_v48, 0.0  ;;  %v5411_v54 = vadd.f32 %v5410_v49, %v4289_v43  ;;  %5119 = vmatpush3.bf16.msra.mxu1 %v5692_v41 }
 0x3e8   : > { %v1678_v56 = vmax.f32 %v5409_v51, 0.0  ;;  %v5413_v57 = vadd.f32 %v5412_v52, %v4289_v43  ;;  %5120 = vmatprep.subr.bf16.mxu1 %v6145_v55  ;;  %v5696_v43 = vld [vmem:[#allocation7 + $0x90] sm:$0xff]  }
 0x3e9   : > { %1693 = vst [vmem:[#allocation3 + $0x11] sm:$0xff] %v1680_v53  ;;  %v1681_v58 = vmax.f32 %v5411_v54, 0.0  ;;  %v4323_v52 = vld [vmem:[%s6499_s3 + $0x4] ss:$0 sm:$0xff] }
 0x3ea   : > { %1691 = vst [vmem:[#allocation3 + $0x1] sm:$0xff] %v1678_v56  ;;  %v1679_v59 = vmax.f32 %v5413_v57, 0.0 }
 0x3eb   : > { %1694 = vst [vmem:[#allocation3 + $0x19] sm:$0x7f] %v1681_v58  ;;  %5121 = vmatpush3.bf16.msra.mxu1 %v5694_v42 }
 0x3ec   : > { %1692 = vst [vmem:[#allocation3 + $0x9] sm:$0xff] %v1679_v59  ;;  %5122 = vmatprep.subr.bf16.mxu1 %v6145_v55 }
 0x3ef   : > { %5123 = vmatpush3.bf16.msra.mxu1 %v5696_v43 }
 0x3f0   : > { %5124 = vmatprep.subr.bf16.mxu1 %v6145_v55 }
 0x3f2   : > { %v1698_v60 = vld [vmem:[#allocation3 + $0x11] ss:$2 sm:$0xff]  ;;  %v6203_v61 = vld [vmem:[#allocation3 + $0x12] ss:$2 sm:$0xff] }
 0x3f3   : > { %v1696_v62 = vld [vmem:[#allocation3 + $0x1] ss:$2 sm:$0xff]  ;;  %v1813_v1 = vld [vmem:[#allocation3 + $0x10] ss:$2 sm:$0xff]  ;;  %4083 = vst [vmem:[#allocation3 + $0x20] sm:$0xff] %v6145_v55  ;;  %5125 = vmatpush3.bf16.msra.mxu1 %v5698_v44 }
 0x3f4   : > { %v1699_v2 = vpack.c.bf16 %v1698_v60, %v1696_v62  ;;  %v1811_v3 = vld [vmem:[#allocation3] ss:$2 sm:$0xff]  ;;  %4082 = vst [vmem:[#allocation3 + $0x18] sm:$0xff] %v6145_v55  ;;  %5126 = vmatprep.subr.bf16.mxu1 %v6145_v55 }
 0x3f5   : > { %v6206_v4 = vld [vmem:[#allocation3 + $0x2] ss:$2 sm:$0xff]  ;;  %v1831_v21 = vpack.c.bf16 %v1813_v1, %v1811_v3  ;;  %v5678_v3 = vld [vmem:[#allocation4 + $0x310] sm:$0xff]  }
 0x3f6   : > { %2502 = vst [vmem:[#allocation3 + $0x10] sm:$0xff] %v6145_v55  ;;  %2500 = vst [vmem:[#allocation3] sm:$0xff] %v6145_v55  ;;  %4995 = vmatmul.mubr.bf16.vlgmr.msra.gmra.mrb[8].mxu0 %v1699_v2  ;;  %v2048_v28 = vpack.c.bf16 %v6203_v61, %v6206_v4 }
 0x3f7   : > { %2501 = vst [vmem:[#allocation3 + $0x8] sm:$0xff] %v6145_v55  ;;  %4999 = vmatpush3.bf16.msra.mxu0 %v5644_v63  ;;  %5014 = vmatprep.mubr.msk.bf16.mxu0 %vm5939_vm2, %v6145_v55  ;;  %v5676_v63 = vld [vmem:[#allocation4 + $0x300] sm:$0xff]  }
 0x3f8   : > { %5000 = vmatprep.subr.bf16.mxu0 %v6145_v55 }
 0x3fb   : > { %5001 = vmatpush3.bf16.msra.mxu0 %v5645_v5 }
 0x3fc   : > { %5002 = vmatprep.subr.bf16.mxu0 %v6145_v55 }
 0x3ff   : > { %5003 = vmatpush3.bf16.msra.mxu0 %v5646_v0 }
 0x400   : > { %5004 = vmatprep.subr.bf16.mxu0 %v6145_v55 }
 0x403   : > { %5005 = vmatpush3.bf16.msra.mxu0 %v5647_v6 }
 0x404   : > { %5006 = vmatprep.subr.bf16.mxu0 %v6145_v55 }
 0x407   : > { %5007 = vmatpush3.bf16.msra.mxu0 %v5648_v8  ;;  %v5679_v8 = vld [vmem:[#allocation4 + $0x318] sm:$0xff]  }
 0x408   : > { %5008 = vmatprep.subr.bf16.mxu0 %v6145_v55 }
 0x40b   : > { %5009 = vmatpush3.bf16.msra.mxu0 %v5649_v9  ;;  %v5680_v9 = vld [vmem:[#allocation4 + $0x320] sm:$0xff]  }
 0x40c   : > { %5010 = vmatprep.subr.bf16.mxu0 %v6145_v55 }
 0x40f   : > { %5011 = vmatpush3.bf16.msra.mxu0 %v5650_v10  ;;  %v5681_v10 = vld [vmem:[#allocation4 + $0x328] sm:$0xff]  }
 0x410   : > { %5012 = vmatprep.subr.bf16.mxu0 %v6145_v55 }
 0x413   : > { %5013 = vmatpush3.bf16.msra.mxu0 %v5651_v11  ;;  %v5682_v11 = vld [vmem:[#allocation4 + $0x330] sm:$0xff]  }
 0x414   : > { %5018 = vmatprep.subr.bf16.mxu0 %v6145_v55 }
 0x416   : > { %5015 = vmatmul.mubr.bf16.vlgmr.msra.gmra.mrb[12].mxu0 %v1699_v2  ;;  %v5677_v2 = vld [vmem:[#allocation4 + $0x308] sm:$0xff]  }
 0x417   : > { %5019 = vmatpush3.bf16.msra.mxu0 %v5652_v12  ;;  %5034 = vmatprep.mubr.msk.bf16.mxu0 %vm5939_vm2, %v6145_v55  ;;  %v5683_v12 = vld [vmem:[#allocation4 + $0x338] sm:$0xff]  }
 0x418   : > { %5020 = vmatprep.subr.bf16.mxu0 %v6145_v55 }
 0x41b   : > { %5021 = vmatpush3.bf16.msra.mxu0 %v5653_v13  ;;  %v5684_v13 = vld [vmem:[#allocation4 + $0x380] sm:$0xff]  }
 0x41c   : > { %5022 = vmatprep.subr.bf16.mxu0 %v6145_v55 }
 0x41f   : > { %5023 = vmatpush3.bf16.msra.mxu0 %v5654_v14 }
 0x420   : > { %5024 = vmatprep.subr.bf16.mxu0 %v6145_v55 }
 0x423   : > { %5025 = vmatpush3.bf16.msra.mxu0 %v5655_v15  ;;  %v5685_v15 = vld [vmem:[#allocation4 + $0x388] sm:$0xff]  }
 0x424   : > { %5026 = vmatprep.subr.bf16.mxu0 %v6145_v55 }
 0x427   : > { %5027 = vmatpush3.bf16.msra.mxu0 %v5656_v16  ;;  %v5686_v16 = vld [vmem:[#allocation4 + $0x390] sm:$0xff]  }
 0x428   : > { %5028 = vmatprep.subr.bf16.mxu0 %v6145_v55 }
 0x42b   : > { %5029 = vmatpush3.bf16.msra.mxu0 %v5657_v17  ;;  %v5687_v17 = vld [vmem:[#allocation4 + $0x398] sm:$0xff]  }
 0x42c   : > { %5030 = vmatprep.subr.bf16.mxu0 %v6145_v55 }
 0x42f   : > { %5031 = vmatpush3.bf16.msra.mxu0 %v5658_v18  ;;  %v5688_v18 = vld [vmem:[#allocation4 + $0x3a0] sm:$0xff]  }
 0x430   : > { %5032 = vmatprep.subr.bf16.mxu0 %v6145_v55 }
 0x433   : > { %5033 = vmatpush3.bf16.msra.mxu0 %v5659_v19  ;;  %v5689_v19 = vld [vmem:[#allocation4 + $0x3a8] sm:$0xff]  }
 0x434   : > { %5038 = vmatprep.subr.bf16.mxu0 %v6145_v55 }
 0x436   : > { %5035 = vmatmul.mubr.bf16.vlgmr.msra.gmra.mrb[16].mxu0 %v1831_v21  ;;  %v5691_v21 = vld [vmem:[#allocation4 + $0x3b8] sm:$0xff]  }
 0x437   : > { %5039 = vmatpush3.bf16.msra.mxu0 %v5660_v20  ;;  %5054 = vmatprep.mubr.msk.bf16.mxu0 %vm5939_vm2, %v6145_v55  ;;  %v5690_v20 = vld [vmem:[#allocation4 + $0x3b0] sm:$0xff]  }
 0x438   : > { %5040 = vmatprep.subr.bf16.mxu0 %v6145_v55 }
 0x43b   : > { %5041 = vmatpush3.bf16.msra.mxu0 %v5661_v22  ;;  %v5693_v22 = vld [vmem:[#allocation4 + $0x440] sm:$0xff]  }
 0x43c   : > { %5042 = vmatprep.subr.bf16.mxu0 %v6145_v55 }
 0x43f   : > { %5043 = vmatpush3.bf16.msra.mxu0 %v5662_v23 }
 0x440   : > { %5044 = vmatprep.subr.bf16.mxu0 %v6145_v55 }
 0x443   : > { %5045 = vmatpush3.bf16.msra.mxu0 %v5663_v24  ;;  %v5695_v24 = vld [vmem:[#allocation4 + $0x448] sm:$0xff]  }
 0x444   : > { %5046 = vmatprep.subr.bf16.mxu0 %v6145_v55 }
 0x447   : > { %5047 = vmatpush3.bf16.msra.mxu0 %v5664_v7  ;;  %v5697_v7 = vld [vmem:[#allocation4 + $0x450] sm:$0xff]  }
 0x448   : > { %5048 = vmatprep.subr.bf16.mxu0 %v6145_v55 }
 0x44b   : > { %5049 = vmatpush3.bf16.msra.mxu0 %v5665_v25  ;;  %v6287_v25 = vld [vmem:[#allocation2 + $0x40] sm:$0xff] }
 0x44c   : > { %5050 = vmatprep.subr.bf16.mxu0 %v6145_v55 }
 0x44f   : > { %5051 = vmatpush3.bf16.msra.mxu0 %v5666_v26  ;;  %v5699_v26 = vld [vmem:[#allocation4 + $0x458] sm:$0xff]  }
 0x450   : > { %5052 = vmatprep.subr.bf16.mxu0 %v6145_v55 }
 0x453   : > { %5053 = vmatpush3.bf16.msra.mxu0 %v5667_v27  ;;  %v5700_v27 = vld [vmem:[#allocation7 + $0xa0] sm:$0xff]  }
 0x454   : > { %5058 = vmatprep.subr.bf16.mxu0 %v6145_v55  ;;  %5127 = vmatpush3.bf16.msra.mxu1 %v5700_v27 }
 0x455   : > { %5128 = vmatprep.subr.bf16.mxu1 %v6287_v25 }
 0x456   : > { %5055 = vmatmul.mubr.bf16.vlgmr.msra.gmra.mrb[20].mxu0 %v2048_v28  ;;  %v5701_v28 = vld [vmem:[#allocation4 + $0x460] sm:$0xff]  }
 0x457   : > { %5074 = vmatprep.mubr.msk.bf16.mxu0 %vm5939_vm2, %v6145_v55  ;;  %5059 = vmatpush3.bf16.msra.mxu0 %v5668_v29  ;;  %v5703_v29 = vld [vmem:[#allocation4 + $0x468] sm:$0xff]  }
 0x458   : > { %5060 = vmatprep.subr.bf16.mxu0 %v6145_v55 }
 0x45b   : > { %5061 = vmatpush3.bf16.msra.mxu0 %v5669_v30  ;;  %v5704_v30 = vld [vmem:[#allocation7 + $0xb0] sm:$0xff]  }
 0x45c   : > { %5062 = vmatprep.subr.bf16.mxu0 %v6145_v55 }
 0x45f   : > { %5063 = vmatpush3.bf16.msra.mxu0 %v5670_v31  ;;  %v5705_v31 = vld [vmem:[#allocation4 + $0x470] sm:$0xff]  }
 0x460   : > { %5064 = vmatprep.subr.bf16.mxu0 %v6145_v55 }
 0x463   : > { %5065 = vmatpush3.bf16.msra.mxu0 %v5671_v32  ;;  %v5706_v32 = vld [vmem:[#allocation7 + $0xb8] sm:$0xff]  }
 0x464   : > { %5066 = vmatprep.subr.bf16.mxu0 %v6145_v55 }
 0x467   : > { %5067 = vmatpush3.bf16.msra.mxu0 %v5672_v33  ;;  %v5707_v33 = vld [vmem:[#allocation4 + $0x478] sm:$0xff]  }
 0x468   : > { %5068 = vmatprep.subr.bf16.mxu0 %v6145_v55 }
 0x46b   : > { %5069 = vmatpush3.bf16.msra.mxu0 %v5673_v34  ;;  %v4290_v34 = vld [vmem:[%s6499_s3 + $0x6] ss:$0 sm:$0xff] }
 0x46c   : > { %5070 = vmatprep.subr.bf16.mxu0 %v6145_v55 }
 0x46f   : > { %5071 = vmatpush3.bf16.msra.mxu0 %v5674_v35 }
 0x470   : > { %5072 = vmatprep.subr.bf16.mxu0 %v6145_v55 }
 0x473   : > { %5073 = vmatpush3.bf16.msra.mxu0 %v5675_v36  ;;  %v4348_v36 = vld [vmem:[%s6499_s3 + $0x5] ss:$0 sm:$0xff] }
 0x474   : > { %5078 = vmatprep.subr.bf16.mxu0 %v6145_v55 }
 0x4e9   : > { %v1931_v37 = vpop.f32.mrb[12].mxu0 }
 0x4ea   : > { %v5016_v38 = vpop.f32.mrb[13].mxu0 }
 0x4eb   : > { %v1934_v39 = vpop.f32.mrb[14].mxu0 }
 0x4ec   : > { %v5017_v40 = vpop.f32.mrb[15].mxu0 }
 0x509   : > { %v2020_v45 = vpop.f32.mrb[16].mxu0 }
 0x50a   : > { %v2021_v46 = vadd.f32 %v2020_v45, %v1931_v37  ;;  %v5036_v47 = vpop.f32.mrb[17].mxu0 }
 0x50b   : > { %v2023_v48 = vpop.f32.mrb[18].mxu0 }
 0x50c   : > { %v2024_v49 = vadd.f32 %v2023_v48, %v1934_v39  ;;  %v5037_v50 = vpop.f32.mrb[19].mxu0 }
 0x529   : > { %v2131_v51 = vpop.f32.mrb[20].mxu0 }
 0x52a   : > { %v2138_v53 = vadd.f32 %v2131_v51, %v2021_v46  ;;  %v5056_v54 = vpop.f32.mrb[21].mxu0  ;;  %v5708_v46 = vld [vmem:[#allocation4 + $0x400] sm:$0xff]  }
 0x52b   : > { %v2134_v56 = vpop.f32.mrb[22].mxu0  ;;  %v5711_v54 = vld [vmem:[#allocation4 + $0x418] sm:$0xff]  }
 0x52c   : > { %v2145_v57 = vadd.f32 %v4323_v52, %v2138_v53  ;;  %v2139_v58 = vadd.f32 %v2134_v56, %v2024_v49  ;;  %v5057_v59 = vpop.f32.mrb[23].mxu0  ;;  %v5710_v53 = vld [vmem:[#allocation4 + $0x410] sm:$0xff]   ;;  %v5712_v56 = vld [vmem:[#allocation4 + $0x420] sm:$0xff]  }
 0x52d   : > { %v5715_v59 = vld [vmem:[#allocation4 + $0x438] sm:$0xff]  }
 0x52e   : > { %v2147_v60 = vmax.f32 %v2145_v57, 0.0  ;;  %v2146_v61 = vadd.f32 %v4323_v52, %v2139_v58  ;;  %v5709_v52 = vld [vmem:[#allocation4 + $0x408] sm:$0xff]   ;;  %v5714_v58 = vld [vmem:[#allocation4 + $0x430] sm:$0xff]  }
 0x52f   : > { %v5713_v57 = vld [vmem:[#allocation4 + $0x428] sm:$0xff]  }
 0x530   : > { %2158 = vst [vmem:[#allocation2 + $0x1] sm:$0xff] %v2147_v60  ;;  %v2148_v62 = vmax.f32 %v2146_v61, 0.0  ;;  %v5717_v61 = vld [vmem:[#allocation4 + $0x3c8] sm:$0xff]  }
 0x532   : > { %2159 = vst [vmem:[#allocation2 + $0x9] sm:$0xff] %v2148_v62  ;;  %v2199_v1 = vpack.c.bf16 %v2148_v62, %v2147_v60  ;;  %v5716_v60 = vld [vmem:[#allocation4 + $0x3c0] sm:$0xff]   ;;  %v5718_v62 = vld [vmem:[#allocation4 + $0x3d0] sm:$0xff]  }
 0x534   : > { %5075 = vmatmul.mubr.bf16.vlgmr.msra.gmra.mrb[8].mxu0 %v2199_v1  ;;  %v5720_v1 = vld [vmem:[#allocation4 + $0x3e0] sm:$0xff]  }
 0x535   : > { %5079 = vmatpush3.bf16.msra.mxu0 %v5676_v63  ;;  %5094 = vmatprep.mubr.msk.bf16.mxu0 %vm5939_vm2, %v6145_v55  ;;  %v5719_v63 = vld [vmem:[#allocation4 + $0x3d8] sm:$0xff]  }
 0x536   : > { %5080 = vmatprep.subr.bf16.mxu0 %v6145_v55 }
 0x537   : > { %v2160_v4 = vld [vmem:[#allocation2] sm:$0xff] }
 0x539   : > { %5081 = vmatpush3.bf16.msra.mxu0 %v5677_v2  ;;  %v2161_v5 = vld [vmem:[#allocation2 + $0x8] sm:$0xff]  ;;  %v5721_v2 = vld [vmem:[#allocation4 + $0x3e8] sm:$0xff]  }
 0x53a   : > { %v2378_v0 = vld [vmem:[#allocation2 + $0x2] sm:$0xff]  ;;  %v2379_v6 = vld [vmem:[#allocation2 + $0xa] sm:$0xff]  ;;  %5082 = vmatprep.subr.bf16.mxu0 %v6145_v55  ;;  %v2179_v14 = vpack.c.bf16 %v2161_v5, %v2160_v4 }
 0x53b   : > { %2950 = vst [vmem:[#allocation2] sm:$0xff] %v6145_v55  ;;  %2951 = vst [vmem:[#allocation2 + $0x8] sm:$0xff] %v6145_v55  ;;  %v2397_v23 = vpack.c.bf16 %v2379_v6, %v2378_v0  ;;  %v5723_v4 = vld [vmem:[#allocation4 + $0x3f8] sm:$0xff]   ;;  %v5724_v0 = vld [vmem:[#allocation4 + $0x4c0] sm:$0xff]  }
 0x53c   : > { %3741 = vst [vmem:[#allocation2 + $0x10] sm:$0xff] %v6145_v55  ;;  %v5725_v6 = vld [vmem:[#allocation4 + $0x4c8] sm:$0xff]  }
 0x53d   : > { %5083 = vmatpush3.bf16.msra.mxu0 %v5678_v3  ;;  %v5722_v3 = vld [vmem:[#allocation4 + $0x3f0] sm:$0xff]  }
 0x53e   : > { %5084 = vmatprep.subr.bf16.mxu0 %v6145_v55 }
 0x541   : > { %5085 = vmatpush3.bf16.msra.mxu0 %v5679_v8  ;;  %v5726_v8 = vld [vmem:[#allocation4 + $0x4d0] sm:$0xff]  }
 0x542   : > { %5086 = vmatprep.subr.bf16.mxu0 %v6145_v55 }
 0x545   : > { %5087 = vmatpush3.bf16.msra.mxu0 %v5680_v9  ;;  %v5727_v9 = vld [vmem:[#allocation4 + $0x4d8] sm:$0xff]  }
 0x546   : > { %5088 = vmatprep.subr.bf16.mxu0 %v6145_v55 }
 0x549   : > { %5089 = vmatpush3.bf16.msra.mxu0 %v5681_v10  ;;  %v5728_v10 = vld [vmem:[#allocation4 + $0x4e0] sm:$0xff]  }
 0x54a   : > { %5090 = vmatprep.subr.bf16.mxu0 %v6145_v55 }
 0x54d   : > { %5091 = vmatpush3.bf16.msra.mxu0 %v5682_v11  ;;  %v5729_v11 = vld [vmem:[#allocation4 + $0x4e8] sm:$0xff]  }
 0x54e   : > { %5092 = vmatprep.subr.bf16.mxu0 %v6145_v55 }
 0x551   : > { %5093 = vmatpush3.bf16.msra.mxu0 %v5683_v12  ;;  %v5730_v12 = vld [vmem:[#allocation4 + $0x4f0] sm:$0xff]  }
 0x552   : > { %5098 = vmatprep.subr.bf16.mxu0 %v6145_v55 }
 0x554   : > { %5095 = vmatmul.mubr.bf16.vlgmr.msra.gmra.mrb[8].mxu0 %v2179_v14 }
 0x555   : > { %5099 = vmatpush3.bf16.msra.mxu0 %v5684_v13  ;;  %5114 = vmatprep.mubr.msk.bf16.mxu0 %vm5939_vm2, %v6145_v55  ;;  %v5731_v13 = vld [vmem:[#allocation4 + $0x4f8] sm:$0xff]  }
 0x556   : > { %5100 = vmatprep.subr.bf16.mxu0 %v6145_v55 }
 0x559   : > { %5101 = vmatpush3.bf16.msra.mxu0 %v5685_v15 }
 0x55a   : > { %5102 = vmatprep.subr.bf16.mxu0 %v6145_v55 }
 0x55d   : > { %5103 = vmatpush3.bf16.msra.mxu0 %v5686_v16 }
 0x55e   : > { %5104 = vmatprep.subr.bf16.mxu0 %v6145_v55 }
 0x561   : > { %5105 = vmatpush3.bf16.msra.mxu0 %v5687_v17 }
 0x562   : > { %5106 = vmatprep.subr.bf16.mxu0 %v6145_v55 }
 0x565   : > { %5107 = vmatpush3.bf16.msra.mxu0 %v5688_v18  ;;  %v5748_v18 = vld [vmem:[#allocation7 + $0xc0] sm:$0xff]  }
 0x566   : > { %5108 = vmatprep.subr.bf16.mxu0 %v6145_v55 }
 0x569   : > { %5109 = vmatpush3.bf16.msra.mxu0 %v5689_v19  ;;  %v5750_v19 = vld [vmem:[#allocation7 + $0xc8] sm:$0xff]  }
 0x56a   : > { %5110 = vmatprep.subr.bf16.mxu0 %v6145_v55 }
 0x56d   : > { %5111 = vmatpush3.bf16.msra.mxu0 %v5690_v20  ;;  %v5752_v20 = vld [vmem:[#allocation7 + $0xd0] sm:$0xff]  }
 0x56e   : > { %5112 = vmatprep.subr.bf16.mxu0 %v6145_v55 }
 0x571   : > { %5113 = vmatpush3.bf16.msra.mxu0 %v5691_v21  ;;  %v5754_v21 = vld [vmem:[#allocation7 + $0xd8] sm:$0xff]  }
 0x572   : > { %5178 = vmatprep.subr.bf16.mxu0 %v6145_v55 }
 0x574   : > { %5115 = vmatmul.mubr.bf16.vlgmr.msra.gmra.mrb[8].mxu0 %v2397_v23 }
 0x575   : > { %5179 = vmatpush3.bf16.msra.mxu0 %v5693_v22  ;;  %5194 = vmatprep.mubr.msk.bf16.mxu0 %vm5939_vm2, %v6145_v55 }
 0x576   : > { %5180 = vmatprep.subr.bf16.mxu0 %v6145_v55  ;;  %v5702_v55 = vld [vmem:[#allocation7 + $0xa8] sm:$0xff]  }
 0x577   : > { %5129 = vmatpush3.bf16.msra.mxu1 %v5702_v55  ;;  %v4382_v55 = vld [vmem:[%s6499_s3 + $0x7] ss:$0 sm:$0xff] }
 0x578   : > { %5130 = vmatprep.subr.bf16.mxu1 %v6287_v25 }
 0x579   : > { %5181 = vmatpush3.bf16.msra.mxu0 %v5695_v24 }
 0x57a   : > { %5182 = vmatprep.subr.bf16.mxu0 %v6287_v25 }
 0x57b   : > { %5131 = vmatpush3.bf16.msra.mxu1 %v5704_v30 }
 0x57c   : > { %5132 = vmatprep.subr.bf16.mxu1 %v6287_v25 }
 0x57d   : > { %5183 = vmatpush3.bf16.msra.mxu0 %v5697_v7 }
 0x57e   : > { %5184 = vmatprep.subr.bf16.mxu0 %v6287_v25 }
 0x57f   : > { %5133 = vmatpush3.bf16.msra.mxu1 %v5706_v32 }
 0x580   : > { %5138 = vmatprep.subr.bf16.mxu1 %v6287_v25 }
 0x581   : > { %5185 = vmatpush3.bf16.msra.mxu0 %v5699_v26 }
 0x582   : > { %5186 = vmatprep.subr.bf16.mxu0 %v6287_v25 }
 0x585   : > { %5187 = vmatpush3.bf16.msra.mxu0 %v5701_v28 }
 0x586   : > { %5188 = vmatprep.subr.bf16.mxu0 %v6287_v25 }
 0x589   : > { %5189 = vmatpush3.bf16.msra.mxu0 %v5703_v29 }
 0x58a   : > { %5190 = vmatprep.subr.bf16.mxu0 %v6287_v25 }
 0x58d   : > { %5191 = vmatpush3.bf16.msra.mxu0 %v5705_v31 }
 0x58e   : > { %5192 = vmatprep.subr.bf16.mxu0 %v6287_v25 }
 0x591   : > { %5193 = vmatpush3.bf16.msra.mxu0 %v5707_v33 }
 0x592   : > { %5258 = vmatprep.subr.bf16.mxu0 %v6287_v25 }
 0x647   : > { %v2480_v35 = vpop.f32.mrb[8].mxu0 }
 0x648   : > { %v5414_v37 = vadd.f32 %v4290_v34, %v2480_v35  ;;  %v5116_v38 = vpop.f32.mrb[9].mxu0 }
 0x649   : > { %v2483_v39 = vpop.f32.mrb[10].mxu0 }
 0x64a   : > { %v5415_v40 = vadd.f32 %v5414_v37, %v4348_v36  ;;  %v5416_v41 = vadd.f32 %v4290_v34, %v2483_v39  ;;  %v5117_v42 = vpop.f32.mrb[11].mxu0  ;;  %v5732_v34 = vld [vmem:[#allocation4 + $0x480] sm:$0xff]   ;;  %v5734_v37 = vld [vmem:[#allocation4 + $0x490] sm:$0xff]  }
 0x64b   : > { %v5737_v42 = vld [vmem:[#allocation4 + $0x4a8] sm:$0xff]  }
 0x64c   : > { %v2498_v43 = vmax.f32 %v5415_v40, 0.0  ;;  %v5417_v44 = vadd.f32 %v5416_v41, %v4348_v36  ;;  %v5733_v36 = vld [vmem:[#allocation4 + $0x488] sm:$0xff]   ;;  %v5735_v40 = vld [vmem:[#allocation4 + $0x498] sm:$0xff]   ;;  %v5736_v41 = vld [vmem:[#allocation4 + $0x4a0] sm:$0xff]  }
 0x64e   : > { %2509 = vst [vmem:[#allocation3 + $0x1] sm:$0xff] %v2498_v43  ;;  %v2499_v45 = vmax.f32 %v5417_v44, 0.0  ;;  %v5738_v43 = vld [vmem:[#allocation4 + $0x4b0] sm:$0xff]   ;;  %v5739_v44 = vld [vmem:[#allocation4 + $0x4b8] sm:$0xff]  }
 0x650   : > { %2510 = vst [vmem:[#allocation3 + $0x9] sm:$0xff] %v2499_v45  ;;  %v5740_v45 = vld [vmem:[#allocation4 + $0x500] sm:$0xff]  }
 0x657   : > { %v2511_v47 = vld [vmem:[#allocation3 + $0x1] ss:$2 sm:$0xff]  ;;  %v2835_v48 = vld [vmem:[#allocation3 + $0x2] ss:$2 sm:$0xff] }
 0x658   : > { %v2623_v49 = vld [vmem:[#allocation3] ss:$2 sm:$0xff]  ;;  %v2512_v50 = vpack.c.bf16 %v2511_v47, %v2511_v47  ;;  %v2853_v51 = vpack.c.bf16 %v2835_v48, %v2835_v48  ;;  %4081 = vst [vmem:[#allocation3 + $0x10] sm:$0xff] %v6287_v25  ;;  %v5741_v47 = vld [vmem:[#allocation4 + $0x508] sm:$0xff]   ;;  %v5742_v48 = vld [vmem:[#allocation4 + $0x510] sm:$0xff]  }
 0x659   : > { %3290 = vst [vmem:[#allocation3] sm:$0xff] %v6287_v25  ;;  %3291 = vst [vmem:[#allocation3 + $0x8] sm:$0xff] %v6287_v25  ;;  %v2641_v5 = vpack.c.bf16 %v2623_v49, %v2623_v49  ;;  %v5743_v49 = vld [vmem:[#allocation4 + $0x518] sm:$0xff]  }
 0x65a   : > { %5135 = vmatmul.mubr.bf16.vlgmr.msra.gmra.mrb[16].mxu1 %v2512_v50  ;;  %5195 = vmatmul.mubr.bf16.vlgmr.msra.gmra.mrb[24].mxu0 %v2853_v51  ;;  %v5745_v51 = vld [vmem:[#allocation4 + $0x528] sm:$0xff]  }
 0x65b   : > { %5139 = vmatpush3.bf16.msra.mxu1 %v5708_v46  ;;  %5154 = vmatprep.mubr.msk.bf16.mxu1 %vm5939_vm2, %v6287_v25 }
 0x65c   : > { %5140 = vmatprep.subr.bf16.mxu1 %v6287_v25  ;;  %5274 = vmatprep.mubr.msk.bf16.mxu0 %vm5939_vm2, %v6287_v25 }
 0x65d   : > { %5259 = vmatpush3.bf16.msra.mxu0 %v5748_v18 }
 0x65e   : > { %5260 = vmatprep.subr.bf16.mxu0 %v6287_v25 }
 0x65f   : > { %5141 = vmatpush3.bf16.msra.mxu1 %v5709_v52  ;;  %v5746_v52 = vld [vmem:[#allocation4 + $0x530] sm:$0xff]  }
 0x660   : > { %5142 = vmatprep.subr.bf16.mxu1 %v6287_v25 }
 0x661   : > { %5261 = vmatpush3.bf16.msra.mxu0 %v5750_v19 }
 0x662   : > { %5262 = vmatprep.subr.bf16.mxu0 %v6287_v25 }
 0x663   : > { %5143 = vmatpush3.bf16.msra.mxu1 %v5710_v53  ;;  %v5747_v53 = vld [vmem:[#allocation4 + $0x538] sm:$0xff]  }
 0x664   : > { %5144 = vmatprep.subr.bf16.mxu1 %v6287_v25 }
 0x665   : > { %5263 = vmatpush3.bf16.msra.mxu0 %v5752_v20  ;;  %v5765_v20 = vld [vmem:[#allocation4 + $0x588] sm:$0xff]  }
 0x666   : > { %5264 = vmatprep.subr.bf16.mxu0 %v6287_v25 }
 0x667   : > { %5145 = vmatpush3.bf16.msra.mxu1 %v5711_v54  ;;  %v5749_v54 = vld [vmem:[#allocation4 + $0x5c0] sm:$0xff]  }
 0x668   : > { %5146 = vmatprep.subr.bf16.mxu1 %v6287_v25 }
 0x669   : > { %5265 = vmatpush3.bf16.msra.mxu0 %v5754_v21  ;;  %v5766_v21 = vld [vmem:[#allocation4 + $0x590] sm:$0xff]  }
 0x66a   : > { %5266 = vmatprep.subr.bf16.mxu0 %v6287_v25 }
 0x66b   : > { %5147 = vmatpush3.bf16.msra.mxu1 %v5712_v56 }
 0x66c   : > { %5148 = vmatprep.subr.bf16.mxu1 %v6287_v25 }
 0x66f   : > { %5149 = vmatpush3.bf16.msra.mxu1 %v5713_v57  ;;  %v5751_v57 = vld [vmem:[#allocation4 + $0x5c8] sm:$0xff]  }
 0x670   : > { %5150 = vmatprep.subr.bf16.mxu1 %v6287_v25 }
 0x673   : > { %5151 = vmatpush3.bf16.msra.mxu1 %v5714_v58  ;;  %v5753_v58 = vld [vmem:[#allocation4 + $0x5d0] sm:$0xff]  }
 0x674   : > { %5152 = vmatprep.subr.bf16.mxu1 %v6287_v25 }
 0x677   : > { %5153 = vmatpush3.bf16.msra.mxu1 %v5715_v59  ;;  %v5755_v59 = vld [vmem:[#allocation4 + $0x5d8] sm:$0xff]  }
 0x678   : > { %5158 = vmatprep.subr.bf16.mxu1 %v6287_v25 }
 0x67a   : > { %5155 = vmatmul.mubr.bf16.vlgmr.msra.gmra.mrb[20].mxu1 %v2512_v50  ;;  %v5744_v50 = vld [vmem:[#allocation4 + $0x520] sm:$0xff]  }
 0x67b   : > { %5159 = vmatpush3.bf16.msra.mxu1 %v5716_v60  ;;  %5174 = vmatprep.mubr.msk.bf16.mxu1 %vm5939_vm2, %v6287_v25  ;;  %v5756_v60 = vld [vmem:[#allocation7 + $0xe0] sm:$0xff]  }
 0x67c   : > { %5160 = vmatprep.subr.bf16.mxu1 %v6287_v25  ;;  %5267 = vmatpush3.bf16.msra.mxu0 %v5756_v60 }
 0x67d   : > { %5268 = vmatprep.subr.bf16.mxu0 %v6287_v25 }
 0x67f   : > { %5161 = vmatpush3.bf16.msra.mxu1 %v5717_v61  ;;  %v5757_v61 = vld [vmem:[#allocation4 + $0x5e0] sm:$0xff]  }
 0x680   : > { %5162 = vmatprep.subr.bf16.mxu1 %v6287_v25 }
 0x683   : > { %5163 = vmatpush3.bf16.msra.mxu1 %v5718_v62  ;;  %v5758_v62 = vld [vmem:[#allocation7 + $0xe8] sm:$0xff]  }
 0x684   : > { %5164 = vmatprep.subr.bf16.mxu1 %v6287_v25  ;;  %5269 = vmatpush3.bf16.msra.mxu0 %v5758_v62  ;;  %v5788_v62 = vld [vmem:[#allocation4 + $0x600] sm:$0xff]  }
 0x685   : > { %5270 = vmatprep.subr.bf16.mxu0 %v6287_v25 }
 0x687   : > { %5165 = vmatpush3.bf16.msra.mxu1 %v5719_v63  ;;  %v5759_v63 = vld [vmem:[#allocation4 + $0x5e8] sm:$0xff]  }
 0x688   : > { %5166 = vmatprep.subr.bf16.mxu1 %v6287_v25 }
 0x68b   : > { %5167 = vmatpush3.bf16.msra.mxu1 %v5720_v1  ;;  %v5760_v1 = vld [vmem:[#allocation7 + $0xf0] sm:$0xff]  }
 0x68c   : > { %5168 = vmatprep.subr.bf16.mxu1 %v6287_v25  ;;  %5271 = vmatpush3.bf16.msra.mxu0 %v5760_v1  ;;  %v5789_v1 = vld [vmem:[#allocation4 + $0x608] sm:$0xff]  }
 0x68d   : > { %5272 = vmatprep.subr.bf16.mxu0 %v6287_v25 }
 0x68f   : > { %5169 = vmatpush3.bf16.msra.mxu1 %v5721_v2  ;;  %v5761_v2 = vld [vmem:[#allocation4 + $0x5f0] sm:$0xff]  }
 0x690   : > { %5170 = vmatprep.subr.bf16.mxu1 %v6287_v25 }
 0x693   : > { %5171 = vmatpush3.bf16.msra.mxu1 %v5722_v3  ;;  %v5762_v3 = vld [vmem:[#allocation7 + $0xf8] sm:$0xff]  }
 0x694   : > { %5172 = vmatprep.subr.bf16.mxu1 %v6287_v25  ;;  %5273 = vmatpush3.bf16.msra.mxu0 %v5762_v3  ;;  %v5791_v3 = vld [vmem:[#allocation4 + $0x618] sm:$0xff]  }
 0x695   : > { %5278 = vmatprep.subr.bf16.mxu0 %v6287_v25 }
 0x697   : > { %5173 = vmatpush3.bf16.msra.mxu1 %v5723_v4  ;;  %v5763_v4 = vld [vmem:[#allocation4 + $0x5f8] sm:$0xff]  }
 0x698   : > { %5198 = vmatprep.subr.bf16.mxu1 %v6287_v25 }
 0x69a   : > { %5175 = vmatmul.mubr.bf16.vlgmr.msra.gmra.mrb[24].mxu1 %v2641_v5  ;;  %v4349_v5 = vld [vmem:[%s6499_s3 + $0x9] ss:$0 sm:$0xff] }
 0x69b   : > { %5214 = vmatprep.mubr.msk.bf16.mxu1 %vm5939_vm2, %v6287_v25  ;;  %5199 = vmatpush3.bf16.msra.mxu1 %v5724_v0 }
 0x69c   : > { %5200 = vmatprep.subr.bf16.mxu1 %v6287_v25 }
 0x69f   : > { %5201 = vmatpush3.bf16.msra.mxu1 %v5725_v6  ;;  %v4407_v6 = vld [vmem:[%s6499_s3 + $0x8] ss:$0 sm:$0xff] }
 0x6a0   : > { %5202 = vmatprep.subr.bf16.mxu1 %v6287_v25 }
 0x6a3   : > { %5203 = vmatpush3.bf16.msra.mxu1 %v5726_v8 }
 0x6a4   : > { %5204 = vmatprep.subr.bf16.mxu1 %v6287_v25 }
 0x6a7   : > { %5205 = vmatpush3.bf16.msra.mxu1 %v5727_v9 }
 0x6a8   : > { %5206 = vmatprep.subr.bf16.mxu1 %v6287_v25 }
 0x6ab   : > { %5207 = vmatpush3.bf16.msra.mxu1 %v5728_v10 }
 0x6ac   : > { %5208 = vmatprep.subr.bf16.mxu1 %v6287_v25 }
 0x6af   : > { %5209 = vmatpush3.bf16.msra.mxu1 %v5729_v11 }
 0x6b0   : > { %5210 = vmatprep.subr.bf16.mxu1 %v6287_v25 }
 0x6b3   : > { %5211 = vmatpush3.bf16.msra.mxu1 %v5730_v12 }
 0x6b4   : > { %5212 = vmatprep.subr.bf16.mxu1 %v6287_v25 }
 0x6b7   : > { %5213 = vmatpush3.bf16.msra.mxu1 %v5731_v13 }
 0x6b8   : > { %5218 = vmatprep.subr.bf16.mxu1 %v6287_v25 }
 0x72d   : > { %v2936_v14 = vpop.f32.mrb[24].mxu0 }
 0x72e   : > { %v5196_v15 = vpop.f32.mrb[25].mxu0 }
 0x72f   : > { %v2939_v16 = vpop.f32.mrb[26].mxu0 }
 0x730   : > { %v5197_v17 = vpop.f32.mrb[27].mxu0 }
 0x74d   : > { %v2741_v22 = vpop.f32.mrb[20].mxu1 }
 0x74e   : > { %v5156_v23 = vpop.f32.mrb[21].mxu1 }
 0x74f   : > { %v2744_v24 = vpop.f32.mrb[22].mxu1  ;;  %v5768_v23 = vld [vmem:[#allocation4 + $0x5a0] sm:$0xff]  }
 0x750   : > { %v5157_v7 = vpop.f32.mrb[23].mxu1  ;;  %v5769_v24 = vld [vmem:[#allocation4 + $0x5a8] sm:$0xff]  }
 0x751   : > { %v5770_v7 = vld [vmem:[#allocation4 + $0x5b0] sm:$0xff]  }
 0x76d   : > { %v2829_v26 = vpop.f32.mrb[24].mxu1 }
 0x76e   : > { %v2830_v27 = vadd.f32 %v2829_v26, %v2741_v22  ;;  %v5176_v28 = vpop.f32.mrb[25].mxu1  ;;  %v5767_v22 = vld [vmem:[#allocation4 + $0x598] sm:$0xff]  }
 0x76f   : > { %v2832_v29 = vpop.f32.mrb[26].mxu1  ;;  %v5771_v26 = vld [vmem:[#allocation4 + $0x5b8] sm:$0xff]   ;;  %v5773_v28 = vld [vmem:[#allocation4 + $0x548] sm:$0xff]  }
 0x770   : > { %v2942_v30 = vadd.f32 %v2936_v14, %v2830_v27  ;;  %v5177_v31 = vpop.f32.mrb[27].mxu1  ;;  %v5764_v14 = vld [vmem:[#allocation4 + $0x580] sm:$0xff]   ;;  %v5775_v29 = vld [vmem:[#allocation4 + $0x558] sm:$0xff]  }
 0x771   : > { %v5772_v27 = vld [vmem:[#allocation4 + $0x540] sm:$0xff]   ;;  %v5777_v31 = vld [vmem:[#allocation4 + $0x568] sm:$0xff]  }
 0x772   : > { %v2948_v32 = vadd.f32 %v4382_v55, %v2942_v30  ;;  %v5774_v55 = vld [vmem:[#allocation4 + $0x550] sm:$0xff]   ;;  %v5776_v30 = vld [vmem:[#allocation4 + $0x560] sm:$0xff]  }
 0x774   : > { %v2949_v33 = vmax.f32 %v2948_v32, 0.0  ;;  %v5778_v32 = vld [vmem:[#allocation4 + $0x570] sm:$0xff]  }
 0x776   : > { %2959 = vst [vmem:[#allocation2 + $0x1] sm:$0xff] %v2949_v33  ;;  %v2997_v35 = vpack.c.bf16 %v2949_v33, %v2949_v33  ;;  %v5779_v33 = vld [vmem:[#allocation4 + $0x578] sm:$0xff]  }
 0x778   : > { %5215 = vmatmul.mubr.bf16.vlgmr.msra.gmra.mrb[16].mxu1 %v2997_v35  ;;  %v5780_v35 = vld [vmem:[#allocation4 + $0x640] sm:$0xff]  }
 0x779   : > { %5219 = vmatpush3.bf16.msra.mxu1 %v5732_v34  ;;  %5234 = vmatprep.mubr.msk.bf16.mxu1 %vm5939_vm2, %v6287_v25 }
 0x77a   : > { %5220 = vmatprep.subr.bf16.mxu1 %v6287_v25 }
 0x77d   : > { %5221 = vmatpush3.bf16.msra.mxu1 %v5733_v36  ;;  %v2960_v38 = vld [vmem:[#allocation2] sm:$0xff]  ;;  %v5781_v36 = vld [vmem:[#allocation4 + $0x648] sm:$0xff]  }
 0x77e   : > { %v3174_v39 = vld [vmem:[#allocation2 + $0x2] sm:$0xff]  ;;  %5222 = vmatprep.subr.bf16.mxu1 %v6287_v25  ;;  %v2978_v46 = vpack.c.bf16 %v2960_v38, %v2960_v38 }
 0x77f   : > { %3739 = vst [vmem:[#allocation2] sm:$0xff] %v6287_v25  ;;  %3740 = vst [vmem:[#allocation2 + $0x8] sm:$0xff] %v6287_v25  ;;  %v3192_v56 = vpack.c.bf16 %v3174_v39, %v3174_v39  ;;  %v5783_v38 = vld [vmem:[#allocation4 + $0x658] sm:$0xff]   ;;  %v5784_v39 = vld [vmem:[#allocation4 + $0x660] sm:$0xff]  }
 0x781   : > { %5223 = vmatpush3.bf16.msra.mxu1 %v5734_v37  ;;  %v5782_v37 = vld [vmem:[#allocation4 + $0x650] sm:$0xff]  }
 0x782   : > { %5224 = vmatprep.subr.bf16.mxu1 %v6287_v25 }
 0x785   : > { %5225 = vmatpush3.bf16.msra.mxu1 %v5735_v40  ;;  %v5785_v40 = vld [vmem:[#allocation4 + $0x668] sm:$0xff]  }
 0x786   : > { %5226 = vmatprep.subr.bf16.mxu1 %v6287_v25 }
 0x789   : > { %5227 = vmatpush3.bf16.msra.mxu1 %v5736_v41  ;;  %v5786_v41 = vld [vmem:[#allocation4 + $0x670] sm:$0xff]  }
 0x78a   : > { %5228 = vmatprep.subr.bf16.mxu1 %v6287_v25 }
 0x78d   : > { %5229 = vmatpush3.bf16.msra.mxu1 %v5737_v42  ;;  %v5787_v42 = vld [vmem:[#allocation4 + $0x678] sm:$0xff]  }
 0x78e   : > { %5230 = vmatprep.subr.bf16.mxu1 %v6287_v25 }
 0x791   : > { %5231 = vmatpush3.bf16.msra.mxu1 %v5738_v43 }
 0x792   : > { %5232 = vmatprep.subr.bf16.mxu1 %v6287_v25 }
 0x795   : > { %5233 = vmatpush3.bf16.msra.mxu1 %v5739_v44 }
 0x796   : > { %5238 = vmatprep.subr.bf16.mxu1 %v6287_v25 }
 0x798   : > { %5235 = vmatmul.mubr.bf16.vlgmr.msra.gmra.mrb[16].mxu1 %v2978_v46 }
 0x799   : > { %5239 = vmatpush3.bf16.msra.mxu1 %v5740_v45  ;;  %5254 = vmatprep.mubr.msk.bf16.mxu1 %vm5939_vm2, %v6287_v25 }
 0x79a   : > { %5240 = vmatprep.subr.bf16.mxu1 %v6287_v25 }
 0x79d   : > { %5241 = vmatpush3.bf16.msra.mxu1 %v5741_v47 }
 0x79e   : > { %5242 = vmatprep.subr.bf16.mxu1 %v6287_v25 }
 0x7a1   : > { %5243 = vmatpush3.bf16.msra.mxu1 %v5742_v48 }
 0x7a2   : > { %5244 = vmatprep.subr.bf16.mxu1 %v6287_v25 }
 0x7a5   : > { %5245 = vmatpush3.bf16.msra.mxu1 %v5743_v49 }
 0x7a6   : > { %5246 = vmatprep.subr.bf16.mxu1 %v6287_v25 }
 0x7a9   : > { %5247 = vmatpush3.bf16.msra.mxu1 %v5744_v50 }
 0x7aa   : > { %5248 = vmatprep.subr.bf16.mxu1 %v6287_v25 }
 0x7ad   : > { %5249 = vmatpush3.bf16.msra.mxu1 %v5745_v51 }
 0x7ae   : > { %5250 = vmatprep.subr.bf16.mxu1 %v6287_v25 }
 0x7b1   : > { %5251 = vmatpush3.bf16.msra.mxu1 %v5746_v52 }
 0x7b2   : > { %5252 = vmatprep.subr.bf16.mxu1 %v6287_v25 }
 0x7b5   : > { %5253 = vmatpush3.bf16.msra.mxu1 %v5747_v53 }
 0x7b6   : > { %5318 = vmatprep.subr.bf16.mxu1 %v6287_v25 }
 0x7b8   : > { %5255 = vmatmul.mubr.bf16.vlgmr.msra.gmra.mrb[16].mxu1 %v3192_v56 }
 0x7b9   : > { %5319 = vmatpush3.bf16.msra.mxu1 %v5749_v54  ;;  %5334 = vmatprep.mubr.msk.bf16.mxu1 %vm5939_vm2, %v6287_v25  ;;  %v4441_v54 = vld [vmem:[%s6499_s3 + $0xa] ss:$0 sm:$0xff] }
 0x7ba   : > { %5320 = vmatprep.subr.bf16.mxu1 %v6287_v25 }
 0x7bd   : > { %5321 = vmatpush3.bf16.msra.mxu1 %v5751_v57 }
 0x7be   : > { %5322 = vmatprep.subr.bf16.mxu1 %v6287_v25 }
 0x7c1   : > { %5323 = vmatpush3.bf16.msra.mxu1 %v5753_v58 }
 0x7c2   : > { %5324 = vmatprep.subr.bf16.mxu1 %v6287_v25 }
 0x7c5   : > { %5325 = vmatpush3.bf16.msra.mxu1 %v5755_v59 }
 0x7c6   : > { %5326 = vmatprep.subr.bf16.mxu1 %v6287_v25 }
 0x7c9   : > { %5327 = vmatpush3.bf16.msra.mxu1 %v5757_v61 }
 0x7ca   : > { %5328 = vmatprep.subr.bf16.mxu1 %v6287_v25 }
 0x7cd   : > { %5329 = vmatpush3.bf16.msra.mxu1 %v5759_v63 }
 0x7ce   : > { %5330 = vmatprep.subr.bf16.mxu1 %v6287_v25 }
 0x7d1   : > { %5331 = vmatpush3.bf16.msra.mxu1 %v5761_v2  ;;  %v5790_v2 = vld [vmem:[#allocation4 + $0x610] sm:$0xff]  }
 0x7d2   : > { %5332 = vmatprep.subr.bf16.mxu1 %v6287_v25 }
 0x7d5   : > { %5333 = vmatpush3.bf16.msra.mxu1 %v5763_v4  ;;  %v5792_v4 = vld [vmem:[#allocation4 + $0x620] sm:$0xff]  }
 0x88b   : > { %v3275_v0 = vpop.f32.mrb[16].mxu1 }
 0x88c   : > { %v5418_v8 = vadd.f32 %v4349_v5, %v3275_v0  ;;  %v5256_v9 = vpop.f32.mrb[17].mxu1  ;;  %v5793_v5 = vld [vmem:[#allocation4 + $0x628] sm:$0xff]   ;;  %v5794_v0 = vld [vmem:[#allocation4 + $0x630] sm:$0xff]  }
 0x88d   : > { %v3278_v10 = vpop.f32.mrb[18].mxu1  ;;  %v5796_v9 = vld [vmem:[#allocation4 + $0x680] sm:$0xff]  }
 0x88e   : > { %v5419_v11 = vadd.f32 %v5418_v8, %v4407_v6  ;;  %v5257_v12 = vpop.f32.mrb[19].mxu1  ;;  %v5795_v6 = vld [vmem:[#allocation4 + $0x638] sm:$0xff]  }
 0x88f   : > { %v5798_v12 = vld [vmem:[#allocation4 + $0x690] sm:$0xff]  }
 0x890   : > { %v3289_v13 = vmax.f32 %v5419_v11, 0.0  ;;  %v5797_v11 = vld [vmem:[#allocation4 + $0x688] sm:$0xff]  }
 0x892   : > { %3299 = vst [vmem:[#allocation3 + $0x1] sm:$0xff] %v3289_v13  ;;  %v5799_v13 = vld [vmem:[#allocation4 + $0x698] sm:$0xff]  }
 0x899   : > { %v3300_v15 = vld [vmem:[#allocation3 + $0x1] ss:$2 sm:$0xf]  ;;  %v3624_v16 = vld [vmem:[#allocation3 + $0x2] ss:$2 sm:$0xf] }
 0x89a   : > { %v3301_v17 = vpack.c.bf16 %v3300_v15, %v3300_v15  ;;  %v3642_v18 = vpack.c.bf16 %v3624_v16, %v3624_v16  ;;  %4080 = vst [vmem:[#allocation3 + $0x8] sm:$0xff] %v6287_v25  ;;  %v3412_v19 = vld [vmem:[#allocation3] ss:$2 sm:$0xf]  ;;  %v5801_v15 = vld [vmem:[#allocation4 + $0x6a8] sm:$0xff]   ;;  %v5802_v16 = vld [vmem:[#allocation4 + $0x6b0] sm:$0xff]  }
 0x89b   : > { %4079 = vst [vmem:[#allocation3] sm:$0xff] %v6287_v25  ;;  %v3430_v34 = vpack.c.bf16 %v3412_v19, %v3412_v19 }
 0x89c   : > { %5275 = vmatmul.mubr.bf16.vlgmr.msra.gmra.mrb[28].mxu0 %v3301_v17  ;;  %5335 = vmatmul.mubr.bf16.vlgmr.msra.gmra.mrb[28].mxu1 %v3642_v18 }
 0x89d   : > { %5279 = vmatpush3.bf16.msra.mxu0 %v5764_v14  ;;  %5294 = vmatprep.mubr.msk.bf16.mxu0 %vm5939_vm2, %v6287_v25  ;;  %v5800_v14 = vld [vmem:[#allocation4 + $0x6a0] sm:$0xff]  }
 0x89e   : > { %5280 = vmatprep.subr.bf16.mxu0 %v6287_v25 }
 0x8a1   : > { %5281 = vmatpush3.bf16.msra.mxu0 %v5765_v20  ;;  %v4408_v20 = vld [vmem:[%s6499_s3 + $0xc] ss:$0 sm:$0xff] }
 0x8a2   : > { %5282 = vmatprep.subr.bf16.mxu0 %v6287_v25 }
 0x8a5   : > { %5283 = vmatpush3.bf16.msra.mxu0 %v5766_v21 }
 0x8a6   : > { %5284 = vmatprep.subr.bf16.mxu0 %v6287_v25 }
 0x8a9   : > { %5285 = vmatpush3.bf16.msra.mxu0 %v5767_v22  ;;  %v4466_v22 = vld [vmem:[%s6499_s3 + $0xb] ss:$0 sm:$0xff] }
 0x8aa   : > { %5286 = vmatprep.subr.bf16.mxu0 %v6287_v25 }
 0x8ad   : > { %5287 = vmatpush3.bf16.msra.mxu0 %v5768_v23 }
 0x8ae   : > { %5288 = vmatprep.subr.bf16.mxu0 %v6287_v25 }
 0x8b1   : > { %5289 = vmatpush3.bf16.msra.mxu0 %v5769_v24 }
 0x8b2   : > { %5290 = vmatprep.subr.bf16.mxu0 %v6287_v25 }
 0x8b5   : > { %5291 = vmatpush3.bf16.msra.mxu0 %v5770_v7 }
 0x8b6   : > { %5292 = vmatprep.subr.bf16.mxu0 %v6287_v25 }
 0x8b9   : > { %5293 = vmatpush3.bf16.msra.mxu0 %v5771_v26 }
 0x8ba   : > { %5298 = vmatprep.subr.bf16.mxu0 %v6287_v25 }
 0x8bc   : > { %5295 = vmatmul.mubr.bf16.vlgmr.msra.gmra.mrb[32].mxu0 %v3301_v17  ;;  %v5803_v17 = vld [vmem:[#allocation4 + $0x6b8] sm:$0xff]  }
 0x8bd   : > { %5299 = vmatpush3.bf16.msra.mxu0 %v5772_v27  ;;  %5314 = vmatprep.mubr.msk.bf16.mxu0 %vm5939_vm2, %v6287_v25 }
 0x8be   : > { %5300 = vmatprep.subr.bf16.mxu0 %v6287_v25 }
 0x8c1   : > { %5301 = vmatpush3.bf16.msra.mxu0 %v5773_v28 }
 0x8c2   : > { %5302 = vmatprep.subr.bf16.mxu0 %v6287_v25 }
 0x8c5   : > { %5303 = vmatpush3.bf16.msra.mxu0 %v5774_v55 }
 0x8c6   : > { %5304 = vmatprep.subr.bf16.mxu0 %v6287_v25 }
 0x8c9   : > { %5305 = vmatpush3.bf16.msra.mxu0 %v5775_v29 }
 0x8ca   : > { %5306 = vmatprep.subr.bf16.mxu0 %v6287_v25 }
 0x8cd   : > { %5307 = vmatpush3.bf16.msra.mxu0 %v5776_v30 }
 0x8ce   : > { %5308 = vmatprep.subr.bf16.mxu0 %v6287_v25 }
 0x8d1   : > { %5309 = vmatpush3.bf16.msra.mxu0 %v5777_v31 }
 0x8d2   : > { %5310 = vmatprep.subr.bf16.mxu0 %v6287_v25 }
 0x8d5   : > { %5311 = vmatpush3.bf16.msra.mxu0 %v5778_v32 }
 0x8d6   : > { %5312 = vmatprep.subr.bf16.mxu0 %v6287_v25 }
 0x8d9   : > { %5313 = vmatpush3.bf16.msra.mxu0 %v5779_v33 }
 0x8da   : > { %5338 = vmatprep.subr.bf16.mxu0 %v6287_v25 }
 0x8dc   : > { %5315 = vmatmul.mubr.bf16.vlgmr.msra.gmra.mrb[36].mxu0 %v3430_v34 }
 0x8dd   : > { %5354 = vmatprep.mubr.msk.bf16.mxu0 %vm5939_vm2, %v6287_v25  ;;  %5339 = vmatpush3.bf16.msra.mxu0 %v5780_v35 }
 0x8de   : > { %5340 = vmatprep.subr.bf16.mxu0 %v6287_v25 }
 0x8e1   : > { %5341 = vmatpush3.bf16.msra.mxu0 %v5781_v36 }
 0x8e2   : > { %5342 = vmatprep.subr.bf16.mxu0 %v6287_v25 }
 0x8e5   : > { %5343 = vmatpush3.bf16.msra.mxu0 %v5782_v37 }
 0x8e6   : > { %5344 = vmatprep.subr.bf16.mxu0 %v6287_v25 }
 0x8e9   : > { %5345 = vmatpush3.bf16.msra.mxu0 %v5783_v38 }
 0x8ea   : > { %5346 = vmatprep.subr.bf16.mxu0 %v6287_v25 }
 0x8ed   : > { %5347 = vmatpush3.bf16.msra.mxu0 %v5784_v39 }
 0x8ee   : > { %5348 = vmatprep.subr.bf16.mxu0 %v6287_v25 }
 0x8f1   : > { %5349 = vmatpush3.bf16.msra.mxu0 %v5785_v40 }
 0x8f2   : > { %5350 = vmatprep.subr.bf16.mxu0 %v6287_v25 }
 0x8f5   : > { %5351 = vmatpush3.bf16.msra.mxu0 %v5786_v41 }
 0x8f6   : > { %5352 = vmatprep.subr.bf16.mxu0 %v6287_v25 }
 0x8f9   : > { %5353 = vmatpush3.bf16.msra.mxu0 %v5787_v42 }
 0x8fa   : > { %5358 = vmatprep.subr.bf16.mxu0 %v6287_v25 }
 0x96f   : > { %v3725_v43 = vpop.f32.mrb[28].mxu1 }
 0x970   : > { %v5336_v44 = vpop.f32.mrb[29].mxu1 }
 0x971   : > { %v3728_v45 = vpop.f32.mrb[30].mxu1 }
 0x972   : > { %v5337_v46 = vpop.f32.mrb[31].mxu1 }
 0x98f   : > { %v3530_v47 = vpop.f32.mrb[32].mxu0 }
 0x990   : > { %v5296_v48 = vpop.f32.mrb[33].mxu0 }
 0x991   : > { %v3533_v49 = vpop.f32.mrb[34].mxu0 }
 0x992   : > { %v5297_v50 = vpop.f32.mrb[35].mxu0 }
 0x9af   : > { %v3618_v51 = vpop.f32.mrb[36].mxu0 }
 0x9b0   : > { %v3619_v52 = vadd.f32 %v3618_v51, %v3530_v47  ;;  %v5316_v53 = vpop.f32.mrb[37].mxu0 }
 0x9b1   : > { %v3621_v56 = vpop.f32.mrb[38].mxu0 }
 0x9b2   : > { %v3731_v57 = vadd.f32 %v3725_v43, %v3619_v52  ;;  %v5317_v58 = vpop.f32.mrb[39].mxu0 }
 0x9b4   : > { %v3737_v59 = vadd.f32 %v4441_v54, %v3731_v57 }
 0x9b6   : > { %v3738_v60 = vmax.f32 %v3737_v59, 0.0 }
 0x9b8   : > { %3748 = vst [vmem:[#allocation2 + $0x1] sm:$0xf] %v3738_v60 }
 0x9bf   : > { %v3768_v61 = vld [vmem:[#allocation2 + $0x1] sm:$0xf] }
 0x9c0   : > { %v3786_v63 = vpack.c.bf16 %v3768_v61, %v3768_v61  ;;  %v3749_v8 = vld [vmem:[#allocation2] sm:$0xf] }
 0x9c1   : > { %v3767_v10 = vpack.c.bf16 %v3749_v8, %v3749_v8  ;;  %v3963_v18 = vld [vmem:[#allocation2 + $0x2] sm:$0xf] }
 0x9c2   : > { %5355 = vmatmul.mubr.bf16.vlgmr.msra.gmra.mrb[28].mxu0 %v3786_v63  ;;  %v3981_v19 = vpack.c.bf16 %v3963_v18, %v3963_v18 }
 0x9c3   : > { %5359 = vmatpush3.bf16.msra.mxu0 %v5788_v62  ;;  %5374 = vmatprep.mubr.msk.bf16.mxu0 %vm5939_vm2, %v6287_v25 }
 0x9c4   : > { %5360 = vmatprep.subr.bf16.mxu0 %v6287_v25 }
 0x9c7   : > { %5361 = vmatpush3.bf16.msra.mxu0 %v5789_v1 }
 0x9c8   : > { %5362 = vmatprep.subr.bf16.mxu0 %v6287_v25 }
 0x9cb   : > { %5363 = vmatpush3.bf16.msra.mxu0 %v5790_v2 }
 0x9cc   : > { %5364 = vmatprep.subr.bf16.mxu0 %v6287_v25 }
 0x9cf   : > { %5365 = vmatpush3.bf16.msra.mxu0 %v5791_v3 }
 0x9d0   : > { %5366 = vmatprep.subr.bf16.mxu0 %v6287_v25 }
 0x9d3   : > { %5367 = vmatpush3.bf16.msra.mxu0 %v5792_v4 }
 0x9d4   : > { %5368 = vmatprep.subr.bf16.mxu0 %v6287_v25 }
 0x9d7   : > { %5369 = vmatpush3.bf16.msra.mxu0 %v5793_v5 }
 0x9d8   : > { %5370 = vmatprep.subr.bf16.mxu0 %v6287_v25 }
 0x9db   : > { %5371 = vmatpush3.bf16.msra.mxu0 %v5794_v0 }
 0x9dc   : > { %5372 = vmatprep.subr.bf16.mxu0 %v6287_v25 }
 0x9df   : > { %5373 = vmatpush3.bf16.msra.mxu0 %v5795_v6 }
 0x9e0   : > { %5378 = vmatprep.subr.bf16.mxu0 %v6287_v25 }
 0x9e2   : > { %5375 = vmatmul.mubr.bf16.vlgmr.msra.gmra.mrb[28].mxu0 %v3767_v10 }
 0x9e3   : > { %5379 = vmatpush3.bf16.msra.mxu0 %v5796_v9  ;;  %5394 = vmatprep.mubr.msk.bf16.mxu0 %vm5939_vm2, %v6287_v25 }
 0x9e4   : > { %5380 = vmatprep.subr.bf16.mxu0 %v6287_v25 }
 0x9e7   : > { %5381 = vmatpush3.bf16.msra.mxu0 %v5797_v11 }
 0x9e8   : > { %5382 = vmatprep.subr.bf16.mxu0 %v6287_v25 }
 0x9eb   : > { %5383 = vmatpush3.bf16.msra.mxu0 %v5798_v12 }
 0x9ec   : > { %5384 = vmatprep.subr.bf16.mxu0 %v6287_v25 }
 0x9ef   : > { %5385 = vmatpush3.bf16.msra.mxu0 %v5799_v13 }
 0x9f0   : > { %5386 = vmatprep.subr.bf16.mxu0 %v6287_v25 }
 0x9f3   : > { %5387 = vmatpush3.bf16.msra.mxu0 %v5800_v14 }
 0x9f4   : > { %5388 = vmatprep.subr.bf16.mxu0 %v6287_v25 }
 0x9f7   : > { %5389 = vmatpush3.bf16.msra.mxu0 %v5801_v15 }
 0x9f8   : > { %5390 = vmatprep.subr.bf16.mxu0 %v6287_v25 }
 0x9fb   : > { %5391 = vmatpush3.bf16.msra.mxu0 %v5802_v16 }
 0x9fc   : > { %5392 = vmatprep.subr.bf16.mxu0 %v6287_v25 }
 0x9ff   : > { %5393 = vmatpush3.bf16.msra.mxu0 %v5803_v17 }
 0xa02   : > { %5395 = vmatmul.mubr.bf16.vlgmr.msra.gmra.mrb[28].mxu0 %v3981_v19 }
 0xad5   : > { %v4064_v21 = vpop.f32.mrb[28].mxu0 }
 0xad6   : > { %v5420_v23 = vadd.f32 %v4408_v20, %v4064_v21  ;;  %v5396_v24 = vpop.f32.mrb[29].mxu0 }
 0xad7   : > { %v4067_v7 = vpop.f32.mrb[30].mxu0 }
 0xad8   : > { %v5421_v26 = vadd.f32 %v5420_v23, %v4466_v22  ;;  %v5397_v25 = vpop.f32.mrb[31].mxu0 }
 0xada   : > { %v4078_v27 = vmax.f32 %v5421_v26, 0.0 }
 0xadc   : > { %4088 = vst [vmem:[#allocation3 + $0x1] sm:$0xf] %v4078_v27 }
 0xae3   : > { %v4089_v28 = vld [vmem:[#allocation3 + $0x1] sm:$0xf] }
 0xae4   : > { %v4091_v55 = vsel %vm4090_vm3, %v4089_v28, 0.0 }
 0xae5   : > { %v4092_v29 = vrot.slane %v4091_v55, 4 }
 0xae7   : > { %v4093_v30 = vadd.f32 %v4092_v29, %v4091_v55 }
 0xae9   : > { %v4094_v31 = vrot.slane %v4093_v30, 2 }
 0xaeb   : > { %v4095_v32 = vadd.f32 %v4094_v31, %v4093_v30 }
 0xaed   : > { %v4096_v33 = vrot.slane %v4095_v32, 1 }
 0xaef   : > { %v4097_v34 = vadd.f32 %v4096_v33, %v4095_v32 }
 0xaf1   : > { %v4098_v35 = vmul.f32 0.25, %v4097_v34 }
 0xaf3   : > { %4099 = vst [vmem:[%s219_s14] sm:$0x1] %v4098_v35 }
 0xaf4   : > { %5875 = shalt.err (!%p5872_p11)
}
 0xaf5   : > { %s5876_s7 = scalar_lea.hbm %s6454_s20, 16  ;;  %s5880_s10 = scalar_lea.hbm %s6500_s4, 32 }
 0xaf6   : > { %p5877_p13 = scmp.ne.s32.totalorder %s6454_s20, %s5876_s7  ;;  %p5881_p6 = scmp.lt.u32.totalorder %s6454_s20, %s6500_s4 }
 0xaf7   : > { %p5882_p9 = scmp.lt.u32.totalorder %s5880_s10, %s5876_s7  ;;  %p5884_p10 = scmp.lt.u32.totalorder %s5876_s7, %s6454_s20 }
 0xaf8   : > { %p5878_p5 = pnand %p5877_p13, %p6513_p1 }
 0xaf9   : > { %p5883_p12 = por %p5882_p9, %p5881_p6 }
 0xafa   : > { %p5879_p0 = pneg %p5878_p5 }
 0xafb   : > { %p5885_p2 = por %p5884_p10, %p5883_p12 }
 0xafd   : > { %p5886_p3 = pnand %p5885_p2, %p5879_p0 }
 0xaff   : > { %5889 = shalt.err (!%p5886_p3)
}
 0xb00   : > { %5494 = dma.vmem_to_hbm [thread:$0]  (%p6513_p1), %s6456_s27, 16, %s6454_s20, %s4101_s22  }
 0xb01 PF: > { %p5511_p4 = scmp.ge.s32.totalorder %s5932_s18, 2  ;;  %s4125_s29 = sand.u32 1, %s5920_s15  }
 0xb02   : > { %p6514_p7 = scmp.ne.s32.totalorder %s6505_s26, 0  ;;  %s4126_s13 = scalar_lea.sflag [#allocation6], %s4125_s29 }
 0xb04   : > { %p5504_p8 = pnand %p5511_p4, %p6514_p7 }
 0xb06   : > { %5915 = dma.done.wait (!%p5504_p8), %s4126_s13, 16  }
 0xb07   : > { %5917 = vsyncadd (!%p5504_p8), %s4126_s13, 4294967280  ;;  %p16_p11 = scmp.ge.s32.totalorder %s5991_s21, 4   ;;  %s6515_s15 = smov %s5924_s16 }
 0xb08   : > { %s6516_s16 = smov %s5928_s17  ;;  %s6517_s17 = smov %s6002_s24 }
 0xb09   : > { %s6518_s18 = smov %s5991_s21  ;;  %18 = sbr.rel (!%p16_p11) target bundleno = 5 (0x5), region = 125 }
 0xb10   :  { %4130 = vsyncpa [#allocation5], 1 }
 0xb11   :  { %4132 = vsyncpa [#allocation5 + $0x1], 1 }
 0xb12   :  { %4133 = vsyncpa [#allocation8], 1 }
 0xb13   :  { %4134 = vsyncpa [#allocation6], 1 }
 0xb14   :  { %4136 = vsyncpa [#allocation6 + $0x1], 1 }

</bundles_post_ra>
